<compile_context>
chip_gen: v7x
topology: tpu7x:2x2x1
jax: 0.10.0
libtpu: 0.0.40
codegen_flags: <defaults>
</compile_context>

<pallas_src>
import functools
import math

import jax
import jax.numpy as jnp
from jax.experimental import pallas as pl
from jax.experimental.pallas import tpu as pltpu

LANE = 128
VMEM_LIMIT = 32 * 1024 * 1024  # safe default on v5e/v6e/v7x


# ----------------------------------------------------------------------------
# small helpers
# ----------------------------------------------------------------------------
def _round_up(n, m):
    return ((n + m - 1) // m) * m


def _pad_axis(a, axis, target):
    if a.shape[axis] == target:
        return a
    cfg = [(0, 0)] * a.ndim
    cfg[axis] = (0, target - a.shape[axis])
    return jnp.pad(a, cfg)


def _pad2(m, rows, cols):
    return jnp.pad(m, ((0, rows - m.shape[0]), (0, cols - m.shape[1])))


def _fold_bn(gamma, beta, mean, var, eps, cpad):
    """BatchNorm (eval mode) -> per-channel scale/shift, zero-padded to cpad."""
    scale = gamma / jnp.sqrt(var + eps)
    shift = beta - mean * scale
    scale = _pad_axis(scale, 0, cpad).reshape(1, cpad).astype(jnp.float32)
    shift = _pad_axis(shift, 0, cpad).reshape(1, cpad).astype(jnp.float32)
    return scale, shift


# ----------------------------------------------------------------------------
# kernels
# ----------------------------------------------------------------------------
def _pw_bn_kernel(x_ref, w_ref, sc_ref, sh_ref, o_ref, *, relu):
    # (tm, Cin) @ (Cin, Cout) -> f32 acc, then folded-BN scale/shift (+ReLU).
    acc = jnp.dot(x_ref[...], w_ref[...], preferred_element_type=jnp.float32)
    acc = acc * sc_ref[...] + sh_ref[...]
    if relu:
        acc = jnp.maximum(acc, 0.0)
    o_ref[...] = acc.astype(o_ref.dtype)


def _conv3x3_bn_relu_kernel(x_ref, w_ref, sc_ref, sh_ref, o_ref, *, stride):
    # x_ref: (H+2, W+2, Cin) spatially padded image (one batch element)
    # w_ref: (9, Cin, Cout) HW-major taps; sc/sh: (1, Cout); o_ref: (OH, OW, Cout)
    cin = x_ref.shape[-1]
    oh, ow, cout = o_ref.shape
    acc = jnp.zeros((oh * ow, cout), jnp.float32)
    for kh in range(3):
        for kw in range(3):
            if stride == 1:
                patch = x_ref[kh:kh + oh, kw:kw + ow, :]
            else:
                patch = x_ref[pl.ds(kh, oh, stride=stride),
                              pl.ds(kw, ow, stride=stride), :]
            acc = acc + jnp.dot(patch.reshape(oh * ow, cin),
                                w_ref[kh * 3 + kw],
                                preferred_element_type=jnp.float32)
    acc = acc * sc_ref[...] + sh_ref[...]
    o_ref[...] = jnp.maximum(acc, 0.0).reshape(oh, ow, cout).astype(o_ref.dtype)


def _out_proj_kernel(h_ref, w3_ref, sc3_ref, sh3_ref,
                     xs_ref, ws_ref, scs_ref, shs_ref, o_ref):
    # main:      bn3(conv1x1(h2))
    # shortcut:  bn_sc(conv1x1_stride(x))   (fused second matmul)
    main = jnp.dot(h_ref[...], w3_ref[...], preferred_element_type=jnp.float32)
    main = main * sc3_ref[...] + sh3_ref[...]
    sc = jnp.dot(xs_ref[...], ws_ref[...], preferred_element_type=jnp.float32)
    sc = sc * scs_ref[...] + shs_ref[...]
    o_ref[...] = jnp.maximum(main + sc, 0.0).astype(o_ref.dtype)


def _out_id_kernel(h_ref, w3_ref, sc3_ref, sh3_ref, xs_ref, o_ref):
    main = jnp.dot(h_ref[...], w3_ref[...], preferred_element_type=jnp.float32)
    main = main * sc3_ref[...] + sh3_ref[...]
    o_ref[...] = jnp.maximum(main + xs_ref[...].astype(jnp.float32),
                             0.0).astype(o_ref.dtype)


# ----------------------------------------------------------------------------
# pallas_call wrappers
# ----------------------------------------------------------------------------
def _compiler_params(n_axes):
    return pltpu.CompilerParams(
        dimension_semantics=("parallel",) * n_axes,
        vmem_limit_bytes=VMEM_LIMIT)


def _pw_bn(x2d, w, sc, sh, *, relu, out_dtype, tm=256):
    M, Cin = x2d.shape
    Cout = w.shape[1]
    tm_eff = min(tm, _round_up(M, 16))
    Mp = _round_up(M, tm_eff)
    if Mp != M:
        x2d = _pad_axis(x2d, 0, Mp)
    out = pl.pallas_call(
        functools.partial(_pw_bn_kernel, relu=relu),
        out_shape=jax.ShapeDtypeStruct((Mp, Cout), out_dtype),
        grid_spec=pltpu.PrefetchScalarGridSpec(
            num_scalar_prefetch=0,
            grid=(Mp // tm_eff,),
            in_specs=[
                pl.BlockSpec((tm_eff, Cin), lambda i: (i, 0)),
                pl.BlockSpec((Cin, Cout), lambda i: (0, 0)),
                pl.BlockSpec((1, Cout), lambda i: (0, 0)),
                pl.BlockSpec((1, Cout), lambda i: (0, 0)),
            ],
            out_specs=pl.BlockSpec((tm_eff, Cout), lambda i: (i, 0)),
        ),
        compiler_params=_compiler_params(1),
        cost_estimate=pl.CostEstimate(
            flops=2 * Mp * Cin * Cout,
            transcendentals=0,
            bytes_accessed=(Mp * Cin * x2d.dtype.itemsize
                            + Cin * Cout * w.dtype.itemsize
                            + Mp * Cout * jnp.dtype(out_dtype).itemsize)),
    )(x2d, w, sc, sh)
    return out[:M] if Mp != M else out


def _conv3x3_bn_relu(x_pad_nhwc, w9, sc, sh, *, stride, out_dtype):
    N, Hp2, Wp2, Cin = x_pad_nhwc.shape
    Cout = w9.shape[-1]
    OH = (Hp2 - 3) // stride + 1
    OW = (Wp2 - 3) // stride + 1
    out = pl.pallas_call(
        functools.partial(_conv3x3_bn_relu_kernel, stride=stride),
        out_shape=jax.ShapeDtypeStruct((N, OH, OW, Cout), out_dtype),
        grid_spec=pltpu.PrefetchScalarGridSpec(
            num_scalar_prefetch=0,
            grid=(N,),
            in_specs=[
                pl.BlockSpec((None, Hp2, Wp2, Cin), lambda n: (n, 0, 0, 0)),
                pl.BlockSpec((9, Cin, Cout), lambda n: (0, 0, 0)),
                pl.BlockSpec((1, Cout), lambda n: (0, 0)),
                pl.BlockSpec((1, Cout), lambda n: (0, 0)),
            ],
            out_specs=pl.BlockSpec((None, OH, OW, Cout), lambda n: (n, 0, 0, 0)),
        ),
        compiler_params=_compiler_params(1),
        cost_estimate=pl.CostEstimate(
            flops=2 * N * OH * OW * 9 * Cin * Cout,
            transcendentals=0,
            bytes_accessed=(x_pad_nhwc.size * x_pad_nhwc.dtype.itemsize
                            + w9.size * w9.dtype.itemsize
                            + N * OH * OW * Cout * jnp.dtype(out_dtype).itemsize)),
    )(x_pad_nhwc, w9, sc, sh)
    return out


def _out_stage(h2d, w3, sc3, sh3, xs2d, ws, scs, shs, *, out_dtype, tm=256):
    M, C1 = h2d.shape
    Cout = w3.shape[1]
    tm_eff = min(tm, _round_up(M, 16))
    Mp = _round_up(M, tm_eff)
    if Mp != M:
        h2d = _pad_axis(h2d, 0, Mp)
        xs2d = _pad_axis(xs2d, 0, Mp)
    grid = (Mp // tm_eff,)

    if ws is None:  # identity shortcut
        kernel = _out_id_kernel
        operands = (h2d, w3, sc3, sh3, xs2d)
        in_specs = [
            pl.BlockSpec((tm_eff, C1), lambda i: (i, 0)),
            pl.BlockSpec((C1, Cout), lambda i: (0, 0)),
            pl.BlockSpec((1, Cout), lambda i: (0, 0)),
            pl.BlockSpec((1, Cout), lambda i: (0, 0)),
            pl.BlockSpec((tm_eff, Cout), lambda i: (i, 0)),
        ]
        flops = 2 * Mp * C1 * Cout
    else:           # projection shortcut fused into this kernel
        Cin = xs2d.shape[1]
        kernel = _out_proj_kernel
        operands = (h2d, w3, sc3, sh3, xs2d, ws, scs, shs)
        in_specs = [
            pl.BlockSpec((tm_eff, C1), lambda i: (i, 0)),
            pl.BlockSpec((C1, Cout), lambda i: (0, 0)),
            pl.BlockSpec((1, Cout), lambda i: (0, 0)),
            pl.BlockSpec((1, Cout), lambda i: (0, 0)),
            pl.BlockSpec((tm_eff, Cin), lambda i: (i, 0)),
            pl.BlockSpec((Cin, Cout), lambda i: (0, 0)),
            pl.BlockSpec((1, Cout), lambda i: (0, 0)),
            pl.BlockSpec((1, Cout), lambda i: (0, 0)),
        ]
        flops = 2 * Mp * (C1 + Cin) * Cout

    bytes_accessed = sum(int(o.size) * o.dtype.itemsize for o in operands)
    bytes_accessed += Mp * Cout * jnp.dtype(out_dtype).itemsize
    out = pl.pallas_call(
        kernel,
        out_shape=jax.ShapeDtypeStruct((Mp, Cout), out_dtype),
        grid_spec=pltpu.PrefetchScalarGridSpec(
            num_scalar_prefetch=0,
            grid=grid,
            in_specs=in_specs,
            out_specs=pl.BlockSpec((tm_eff, Cout), lambda i: (i, 0)),
        ),
        compiler_params=_compiler_params(1),
        cost_estimate=pl.CostEstimate(flops=flops, transcendentals=0,
                                      bytes_accessed=bytes_accessed),
    )(*operands)
    return out[:M] if Mp != M else out


# ----------------------------------------------------------------------------
# Bottleneck forward (Pallas)
# ----------------------------------------------------------------------------
def bottleneck_forward(x, params, *, stride=1, eps=1e-5,
                       compute_dtype=jnp.float32):
    """Pallas forward of the PyTorch Bottleneck block (inference-mode BN).

    x: (N, Cin, H, W) float32 (NCHW, PyTorch convention).
    params: dict with OIHW conv weights and (gamma, beta, mean, var) BN tuples.
    Returns (N, 4*planes, OH, OW) float32 in NCHW.
    """
    N, Cin, H, W = x.shape
    w1, w2, w3 = params["conv1_w"], params["conv2_w"], params["conv3_w"]
    planes = w1.shape[0]
    Cout = w3.shape[0]                       # expansion * planes
    has_proj = "conv_sc_w" in params
    s = stride
    OH = (H + 2 - 3) // s + 1
    OW = (W + 2 - 3) // s + 1

    Cin_p = _round_up(Cin, LANE)
    C1_p = _round_up(planes, LANE)
    C4_p = _round_up(Cout, LANE)
    cdt = compute_dtype

    # ---- glue: NCHW -> lane-dense NHWC, channel pad, weight/BN repack -------
    x_nhwc_p = _pad_axis(jnp.transpose(x, (0, 2, 3, 1)), 3, Cin_p)
    x2d = x_nhwc_p.reshape(N * H * W, Cin_p).astype(cdt)

    w1c = _pad2(w1.reshape(planes, Cin).T, Cin_p, C1_p).astype(cdt)
    w3c = _pad2(w3.reshape(Cout, planes).T, C1_p, C4_p).astype(cdt)
    w2c = jnp.transpose(w2, (2, 3, 1, 0)).reshape(9, planes, planes)
    w2c = _pad_axis(_pad_axis(w2c, 1, C1_p), 2, C1_p).astype(cdt)

    sc1, sh1 = _fold_bn(*params["bn1"], eps, C1_p)
    sc2, sh2 = _fold_bn(*params["bn2"], eps, C1_p)
    sc3, sh3 = _fold_bn(*params["bn3"], eps, C4_p)

    # ---- stage 1: conv1x1 + bn1 + relu --------------------------------------
    h1 = _pw_bn(x2d, w1c, sc1, sh1, relu=True, out_dtype=cdt)

    # ---- stage 2: conv3x3 (stride, pad=1) + bn2 + relu ----------------------
    h1_pad = jnp.pad(h1.reshape(N, H, W, C1_p),
                     ((0, 0), (1, 1), (1, 1), (0, 0)))
    h2 = _conv3x3_bn_relu(h1_pad, w2c, sc2, sh2, stride=s, out_dtype=cdt)
    h2d = h2.reshape(N * OH * OW, C1_p)

    # ---- stage 3: conv1x1 + bn3 + shortcut + relu (fused) -------------------
    if has_proj:
        ws = params["conv_sc_w"]
        wsc = _pad2(ws.reshape(Cout, Cin).T, Cin_p, C4_p).astype(cdt)
        scS, shS = _fold_bn(*params["bn_sc"], eps, C4_p)
        xs = x_nhwc_p[:, ::s, ::s, :].reshape(N * OH * OW, Cin_p).astype(cdt)
        out2d = _out_stage(h2d, w3c, sc3, sh3, xs, wsc, scS, shS,
                           out_dtype=jnp.float32)
    else:
        assert s == 1 and Cin == Cout, "identity shortcut requires stride=1, Cin==4*planes"
        xs = x_nhwc_p.reshape(N * H * W, Cin_p)         # f32 residual, Cin_p==C4_p
        out2d = _out_stage(h2d, w3c, sc3, sh3, xs, None, None, None,
                           out_dtype=jnp.float32)

    out = out2d.reshape(N, OH, OW, C4_p)[:, :, :, :Cout]
    return jnp.transpose(out, (0, 3, 1, 2))   # back to NCHW for module parity


# ----------------------------------------------------------------------------
# reference + demo
# ----------------------------------------------------------------------------
def bottleneck_ref(x, params, stride, eps=1e-5):
    def bn(y, p):
        g, b, m, v = p
        inv = g / jnp.sqrt(v + eps)
        return y * inv.reshape(1, -1, 1, 1) + (b - m * inv).reshape(1, -1, 1, 1)

    def conv(y, w, s=1, p=0):
        return jax.lax.conv_general_dilated(
            y, w, (s, s), [(p, p), (p, p)],
            dimension_numbers=("NCHW", "OIHW", "NCHW"))

    out = jax.nn.relu(bn(conv(x, params["conv1_w"]), params["bn1"]))
    out = jax.nn.relu(bn(conv(out, params["conv2_w"], stride, 1), params["bn2"]))
    out = bn(conv(out, params["conv3_w"]), params["bn3"])
    if "conv_sc_w" in params:
        sc = bn(conv(x, params["conv_sc_w"], stride, 0), params["bn_sc"])
    else:
        sc = x
    return jax.nn.relu(out + sc)


def make_params(key, in_planes, planes, stride, expansion=4):
    cout = expansion * planes
    ks = iter(jax.random.split(key, 16))

    def conv_w(k, oc, ic, kh, kw):
        bound = 1.0 / math.sqrt(ic * kh * kw)
        return jax.random.uniform(k, (oc, ic, kh, kw), jnp.float32, -bound, bound)

    def bn_p(k, c):
        k1, k2, k3, k4 = jax.random.split(k, 4)
        gamma = jax.random.uniform(k1, (c,), jnp.float32, 0.5, 1.5)
        beta = 0.1 * jax.random.normal(k2, (c,), jnp.float32)
        mean = 0.1 * jax.random.normal(k3, (c,), jnp.float32)
        var = jax.random.uniform(k4, (c,), jnp.float32, 0.5, 1.5)
        return (gamma, beta, mean, var)

    params = {
        "conv1_w": conv_w(next(ks), planes, in_planes, 1, 1),
        "bn1": bn_p(next(ks), planes),
        "conv2_w": conv_w(next(ks), planes, planes, 3, 3),
        "bn2": bn_p(next(ks), planes),
        "conv3_w": conv_w(next(ks), cout, planes, 1, 1),
        "bn3": bn_p(next(ks), cout),
    }
    if stride != 1 or in_planes != cout:
        params["conv_sc_w"] = conv_w(next(ks), cout, in_planes, 1, 1)
        params["bn_sc"] = bn_p(next(ks), cout)
    return params


if __name__ == "__main__":
    key = jax.random.PRNGKey(0)
    kx, kp1, kp2 = jax.random.split(key, 3)

    # --- Config A: projection shortcut (in_planes != 4*planes), stride=1 ----
    N, in_planes, planes, H, W, stride = 2, 8, 4, 16, 16, 1
    x = jax.random.normal(kx, (N, in_planes, H, W), jnp.float32)
    params = make_params(kp1, in_planes, planes, stride)
    ref = bottleneck_ref(x, params, stride)

    fwd_f32 = jax.jit(functools.partial(bottleneck_forward, stride=stride,
                                        compute_dtype=jnp.float32))
    out = jax.block_until_ready(fwd_f32(x, params))
    assert out.shape == ref.shape == (N, 4 * planes, H, W), out.shape
    assert jnp.allclose(out, ref, atol=1e-4, rtol=1e-4), \
        float(jnp.abs(out - ref).max())

    # bf16 matmul-input fast path (f32 accumulate) -> looser tolerance.
    fwd_bf16 = jax.jit(functools.partial(bottleneck_forward, stride=stride,
                                         compute_dtype=jnp.bfloat16))
    out_bf = jax.block_until_ready(fwd_bf16(x, params))
    assert jnp.allclose(out_bf, ref, atol=1e-1, rtol=1e-1), \
        float(jnp.abs(out_bf - ref).max())

    # --- Config B: identity shortcut (in_planes == 4*planes), stride=1 ------
    in_planes_b = 4 * planes
    xb = jax.random.normal(kx, (N, in_planes_b, H, W), jnp.float32)
    params_b = make_params(kp2, in_planes_b, planes, 1)
    fwd_b = jax.jit(functools.partial(bottleneck_forward, stride=1,
                                      compute_dtype=jnp.float32))
    out_b = jax.block_until_ready(fwd_b(xb, params_b))
    ref_b = bottleneck_ref(xb, params_b, 1)
    assert jnp.allclose(out_b, ref_b, atol=1e-4, rtol=1e-4), \
        float(jnp.abs(out_b - ref_b).max())

    print("KERNEL_OK")
</pallas_src>

<mosaic_0001>
module attributes {stable_mosaic.version = 11 : i64} {
  func.func @_pw_bn_kernel(%arg0: i32, %arg1: memref<256x128xf32, #tpu.memory_space<vmem>>, %arg2: memref<128x128xf32, #tpu.memory_space<vmem>>, %arg3: memref<1x128xf32, #tpu.memory_space<vmem>>, %arg4: memref<1x128xf32, #tpu.memory_space<vmem>>, %arg5: memref<256x128xf32, #tpu.memory_space<vmem>>) attributes {dimension_semantics = [#tpu.dimension_semantics<parallel>], iteration_bounds = array<i64: 2>, scalar_prefetch = 0 : i64, scratch_operands = 0 : i64, tpu.core_type = #tpu.core_type<tc>, window_params = [{transform_indices = @transform_0, window_bounds = array<i64: 256, 128>}, {pipeline_mode = #tpu.pipeline_mode<synchronous>, transform_indices = @transform_1, window_bounds = array<i64: 128, 128>}, {pipeline_mode = #tpu.pipeline_mode<synchronous>, transform_indices = @transform_2, window_bounds = array<i64: 1, 128>}, {pipeline_mode = #tpu.pipeline_mode<synchronous>, transform_indices = @transform_3, window_bounds = array<i64: 1, 128>}, {transform_indices = @transform_4, window_bounds = array<i64: 256, 128>}]} {
    %c0 = arith.constant 0 : index
    %c0_0 = arith.constant 0 : index
    %0 = vector.load %arg1[%c0, %c0_0] : memref<256x128xf32, #tpu.memory_space<vmem>>, vector<256x128xf32>
    %c0_1 = arith.constant 0 : index
    %c0_2 = arith.constant 0 : index
    %1 = vector.load %arg2[%c0_1, %c0_2] : memref<128x128xf32, #tpu.memory_space<vmem>>, vector<128x128xf32>
    %cst = arith.constant dense<0.000000e+00> : vector<256x128xf32>
    %2 = tpu.matmul %0, %1, %cst {dimension_numbers = #tpu.dot_dimension_numbers<[1], [0], [0], [1], [0, 0, 1, 1], [], []>} : vector<256x128xf32>, vector<128x128xf32>, vector<256x128xf32> -> vector<256x128xf32>
    %c0_3 = arith.constant 0 : index
    %c0_4 = arith.constant 0 : index
    %3 = vector.load %arg3[%c0_3, %c0_4] : memref<1x128xf32, #tpu.memory_space<vmem>>, vector<1x128xf32>
    %4 = vector.broadcast %3 : vector<1x128xf32> to vector<256x128xf32>
    %5 = arith.mulf %2, %4 : vector<256x128xf32>
    %c0_5 = arith.constant 0 : index
    %c0_6 = arith.constant 0 : index
    %6 = vector.load %arg4[%c0_5, %c0_6] : memref<1x128xf32, #tpu.memory_space<vmem>>, vector<1x128xf32>
    %7 = vector.broadcast %6 : vector<1x128xf32> to vector<256x128xf32>
    %8 = arith.addf %5, %7 : vector<256x128xf32>
    %cst_7 = arith.constant 0.000000e+00 : f32
    %9 = vector.broadcast %cst_7 : f32 to vector<256x128xf32>
    %10 = arith.maximumf %8, %9 : vector<256x128xf32>
    %c0_8 = arith.constant 0 : index
    %c0_9 = arith.constant 0 : index
    %11 = vector.load %arg5[%c0_8, %c0_9] : memref<256x128xf32, #tpu.memory_space<vmem>>, vector<256x128xf32>
    tpu.vector_store %arg5[%c0_8, %c0_9], %10 {strides = array<i32>} : memref<256x128xf32, #tpu.memory_space<vmem>>, vector<256x128xf32>,
    return
  }
  func.func @transform_0(%arg0: i32) -> (i32, i32) {
    %c0_i32 = arith.constant 0 : i32
    %c0_i32_0 = arith.constant 0 : i32
    return %arg0, %c0_i32 : i32, i32
  }
  func.func @transform_1(%arg0: i32) -> (i32, i32) {
    %c0_i32 = arith.constant 0 : i32
    %c0_i32_0 = arith.constant 0 : i32
    %c0_i32_1 = arith.constant 0 : i32
    return %c0_i32, %c0_i32_0 : i32, i32
  }
  func.func @transform_2(%arg0: i32) -> (i32, i32) {
    %c0_i32 = arith.constant 0 : i32
    %c0_i32_0 = arith.constant 0 : i32
    %c0_i32_1 = arith.constant 0 : i32
    return %c0_i32, %c0_i32_0 : i32, i32
  }
  func.func @transform_3(%arg0: i32) -> (i32, i32) {
    %c0_i32 = arith.constant 0 : i32
    %c0_i32_0 = arith.constant 0 : i32
    %c0_i32_1 = arith.constant 0 : i32
    return %c0_i32, %c0_i32_0 : i32, i32
  }
  func.func @transform_4(%arg0: i32) -> (i32, i32) {
    %c0_i32 = arith.constant 0 : i32
    %c0_i32_0 = arith.constant 0 : i32
    return %arg0, %c0_i32 : i32, i32
  }
}

module attributes {stable_mosaic.version = 11 : i64} {
  func.func @_conv3x3_bn_relu_kernel(%arg0: i32, %arg1: memref<1x18x18x128xf32, #tpu.memory_space<vmem>>, %arg2: memref<9x128x128xf32, #tpu.memory_space<vmem>>, %arg3: memref<1x128xf32, #tpu.memory_space<vmem>>, %arg4: memref<1x128xf32, #tpu.memory_space<vmem>>, %arg5: memref<1x16x16x128xf32, #tpu.memory_space<vmem>>) attributes {dimension_semantics = [#tpu.dimension_semantics<parallel>], iteration_bounds = array<i64: 2>, scalar_prefetch = 0 : i64, scratch_operands = 0 : i64, tpu.core_type = #tpu.core_type<tc>, window_params = [{transform_indices = @transform_0, window_bounds = array<i64: 1, 18, 18, 128>}, {pipeline_mode = #tpu.pipeline_mode<synchronous>, transform_indices = @transform_1, window_bounds = array<i64: 9, 128, 128>}, {pipeline_mode = #tpu.pipeline_mode<synchronous>, transform_indices = @transform_2, window_bounds = array<i64: 1, 128>}, {pipeline_mode = #tpu.pipeline_mode<synchronous>, transform_indices = @transform_3, window_bounds = array<i64: 1, 128>}, {transform_indices = @transform_4, window_bounds = array<i64: 1, 16, 16, 128>}]} {
    %cst = arith.constant 0.000000e+00 : f32
    %0 = vector.broadcast %cst : f32 to vector<256x128xf32>
    %c0 = arith.constant 0 : index
    %c0_0 = arith.constant 0 : index
    %c0_1 = arith.constant 0 : index
    %c0_2 = arith.constant 0 : index
    %1 = vector.load %arg1[%c0, %c0_0, %c0_1, %c0_2] : memref<1x18x18x128xf32, #tpu.memory_space<vmem>>, vector<1x16x16x128xf32>
    %2 = vector.shape_cast %1 : vector<1x16x16x128xf32> to vector<16x16x128xf32>
    %3 = vector.shape_cast %2 : vector<16x16x128xf32> to vector<256x128xf32>
    %c0_3 = arith.constant 0 : index
    %c0_4 = arith.constant 0 : index
    %c0_5 = arith.constant 0 : index
    %4 = vector.load %arg2[%c0_3, %c0_4, %c0_5] : memref<9x128x128xf32, #tpu.memory_space<vmem>>, vector<1x128x128xf32>
    %5 = vector.shape_cast %4 : vector<1x128x128xf32> to vector<128x128xf32>
    %cst_6 = arith.constant dense<0.000000e+00> : vector<256x128xf32>
    %6 = tpu.matmul %3, %5, %cst_6 {dimension_numbers = #tpu.dot_dimension_numbers<[1], [0], [0], [1], [0, 0, 1, 1], [], []>} : vector<256x128xf32>, vector<128x128xf32>, vector<256x128xf32> -> vector<256x128xf32>
    %7 = arith.addf %0, %6 : vector<256x128xf32>
    %c0_7 = arith.constant 0 : index
    %c0_8 = arith.constant 0 : index
    %c1 = arith.constant 1 : index
    %c0_9 = arith.constant 0 : index
    %8 = vector.load %arg1[%c0_7, %c0_8, %c1, %c0_9] : memref<1x18x18x128xf32, #tpu.memory_space<vmem>>, vector<1x16x16x128xf32>
    %9 = vector.shape_cast %8 : vector<1x16x16x128xf32> to vector<16x16x128xf32>
    %10 = vector.shape_cast %9 : vector<16x16x128xf32> to vector<256x128xf32>
    %c1_10 = arith.constant 1 : index
    %c0_11 = arith.constant 0 : index
    %c0_12 = arith.constant 0 : index
    %11 = vector.load %arg2[%c1_10, %c0_11, %c0_12] : memref<9x128x128xf32, #tpu.memory_space<vmem>>, vector<1x128x128xf32>
    %12 = vector.shape_cast %11 : vector<1x128x128xf32> to vector<128x128xf32>
    %cst_13 = arith.constant dense<0.000000e+00> : vector<256x128xf32>
    %13 = tpu.matmul %10, %12, %cst_13 {dimension_numbers = #tpu.dot_dimension_numbers<[1], [0], [0], [1], [0, 0, 1, 1], [], []>} : vector<256x128xf32>, vector<128x128xf32>, vector<256x128xf32> -> vector<256x128xf32>
    %14 = arith.addf %7, %13 : vector<256x128xf32>
    %c0_14 = arith.constant 0 : index
    %c0_15 = arith.constant 0 : index
    %c2 = arith.constant 2 : index
    %c0_16 = arith.constant 0 : index
    %15 = vector.load %arg1[%c0_14, %c0_15, %c2, %c0_16] : memref<1x18x18x128xf32, #tpu.memory_space<vmem>>, vector<1x16x16x128xf32>
    %16 = vector.shape_cast %15 : vector<1x16x16x128xf32> to vector<16x16x128xf32>
    %17 = vector.shape_cast %16 : vector<16x16x128xf32> to vector<256x128xf32>
    %c2_17 = arith.constant 2 : index
    %c0_18 = arith.constant 0 : index
    %c0_19 = arith.constant 0 : index
    %18 = vector.load %arg2[%c2_17, %c0_18, %c0_19] : memref<9x128x128xf32, #tpu.memory_space<vmem>>, vector<1x128x128xf32>
    %19 = vector.shape_cast %18 : vector<1x128x128xf32> to vector<128x128xf32>
    %cst_20 = arith.constant dense<0.000000e+00> : vector<256x128xf32>
    %20 = tpu.matmul %17, %19, %cst_20 {dimension_numbers = #tpu.dot_dimension_numbers<[1], [0], [0], [1], [0, 0, 1, 1], [], []>} : vector<256x128xf32>, vector<128x128xf32>, vector<256x128xf32> -> vector<256x128xf32>
    %21 = arith.addf %14, %20 : vector<256x128xf32>
    %c0_21 = arith.constant 0 : index
    %c1_22 = arith.constant 1 : index
    %c0_23 = arith.constant 0 : index
    %c0_24 = arith.constant 0 : index
    %22 = vector.load %arg1[%c0_21, %c1_22, %c0_23, %c0_24] : memref<1x18x18x128xf32, #tpu.memory_space<vmem>>, vector<1x16x16x128xf32>
    %23 = vector.shape_cast %22 : vector<1x16x16x128xf32> to vector<16x16x128xf32>
    %24 = vector.shape_cast %23 : vector<16x16x128xf32> to vector<256x128xf32>
    %c3 = arith.constant 3 : index
    %c0_25 = arith.constant 0 : index
    %c0_26 = arith.constant 0 : index
    %25 = vector.load %arg2[%c3, %c0_25, %c0_26] : memref<9x128x128xf32, #tpu.memory_space<vmem>>, vector<1x128x128xf32>
    %26 = vector.shape_cast %25 : vector<1x128x128xf32> to vector<128x128xf32>
    %cst_27 = arith.constant dense<0.000000e+00> : vector<256x128xf32>
    %27 = tpu.matmul %24, %26, %cst_27 {dimension_numbers = #tpu.dot_dimension_numbers<[1], [0], [0], [1], [0, 0, 1, 1], [], []>} : vector<256x128xf32>, vector<128x128xf32>, vector<256x128xf32> -> vector<256x128xf32>
    %28 = arith.addf %21, %27 : vector<256x128xf32>
    %c0_28 = arith.constant 0 : index
    %c1_29 = arith.constant 1 : index
    %c1_30 = arith.constant 1 : index
    %c0_31 = arith.constant 0 : index
    %29 = vector.load %arg1[%c0_28, %c1_29, %c1_30, %c0_31] : memref<1x18x18x128xf32, #tpu.memory_space<vmem>>, vector<1x16x16x128xf32>
    %30 = vector.shape_cast %29 : vector<1x16x16x128xf32> to vector<16x16x128xf32>
    %31 = vector.shape_cast %30 : vector<16x16x128xf32> to vector<256x128xf32>
    %c4 = arith.constant 4 : index
    %c0_32 = arith.constant 0 : index
    %c0_33 = arith.constant 0 : index
    %32 = vector.load %arg2[%c4, %c0_32, %c0_33] : memref<9x128x128xf32, #tpu.memory_space<vmem>>, vector<1x128x128xf32>
    %33 = vector.shape_cast %32 : vector<1x128x128xf32> to vector<128x128xf32>
    %cst_34 = arith.constant dense<0.000000e+00> : vector<256x128xf32>
    %34 = tpu.matmul %31, %33, %cst_34 {dimension_numbers = #tpu.dot_dimension_numbers<[1], [0], [0], [1], [0, 0, 1, 1], [], []>} : vector<256x128xf32>, vector<128x128xf32>, vector<256x128xf32> -> vector<256x128xf32>
    %35 = arith.addf %28, %34 : vector<256x128xf32>
    %c0_35 = arith.constant 0 : index
    %c1_36 = arith.constant 1 : index
    %c2_37 = arith.constant 2 : index
    %c0_38 = arith.constant 0 : index
    %36 = vector.load %arg1[%c0_35, %c1_36, %c2_37, %c0_38] : memref<1x18x18x128xf32, #tpu.memory_space<vmem>>, vector<1x16x16x128xf32>
    %37 = vector.shape_cast %36 : vector<1x16x16x128xf32> to vector<16x16x128xf32>
    %38 = vector.shape_cast %37 : vector<16x16x128xf32> to vector<256x128xf32>
    %c5 = arith.constant 5 : index
    %c0_39 = arith.constant 0 : index
    %c0_40 = arith.constant 0 : index
    %39 = vector.load %arg2[%c5, %c0_39, %c0_40] : memref<9x128x128xf32, #tpu.memory_space<vmem>>, vector<1x128x128xf32>
    %40 = vector.shape_cast %39 : vector<1x128x128xf32> to vector<128x128xf32>
    %cst_41 = arith.constant dense<0.000000e+00> : vector<256x128xf32>
    %41 = tpu.matmul %38, %40, %cst_41 {dimension_numbers = #tpu.dot_dimension_numbers<[1], [0], [0], [1], [0, 0, 1, 1], [], []>} : vector<256x128xf32>, vector<128x128xf32>, vector<256x128xf32> -> vector<256x128xf32>
    %42 = arith.addf %35, %41 : vector<256x128xf32>
    %c0_42 = arith.constant 0 : index
    %c2_43 = arith.constant 2 : index
    %c0_44 = arith.constant 0 : index
    %c0_45 = arith.constant 0 : index
    %43 = vector.load %arg1[%c0_42, %c2_43, %c0_44, %c0_45] : memref<1x18x18x128xf32, #tpu.memory_space<vmem>>, vector<1x16x16x128xf32>
    %44 = vector.shape_cast %43 : vector<1x16x16x128xf32> to vector<16x16x128xf32>
    %45 = vector.shape_cast %44 : vector<16x16x128xf32> to vector<256x128xf32>
    %c6 = arith.constant 6 : index
    %c0_46 = arith.constant 0 : index
    %c0_47 = arith.constant 0 : index
    %46 = vector.load %arg2[%c6, %c0_46, %c0_47] : memref<9x128x128xf32, #tpu.memory_space<vmem>>, vector<1x128x128xf32>
    %47 = vector.shape_cast %46 : vector<1x128x128xf32> to vector<128x128xf32>
    %cst_48 = arith.constant dense<0.000000e+00> : vector<256x128xf32>
    %48 = tpu.matmul %45, %47, %cst_48 {dimension_numbers = #tpu.dot_dimension_numbers<[1], [0], [0], [1], [0, 0, 1, 1], [], []>} : vector<256x128xf32>, vector<128x128xf32>, vector<256x128xf32> -> vector<256x128xf32>
    %49 = arith.addf %42, %48 : vector<256x128xf32>
    %c0_49 = arith.constant 0 : index
    %c2_50 = arith.constant 2 : index
    %c1_51 = arith.constant 1 : index
    %c0_52 = arith.constant 0 : index
    %50 = vector.load %arg1[%c0_49, %c2_50, %c1_51, %c0_52] : memref<1x18x18x128xf32, #tpu.memory_space<vmem>>, vector<1x16x16x128xf32>
    %51 = vector.shape_cast %50 : vector<1x16x16x128xf32> to vector<16x16x128xf32>
    %52 = vector.shape_cast %51 : vector<16x16x128xf32> to vector<256x128xf32>
    %c7 = arith.constant 7 : index
    %c0_53 = arith.constant 0 : index
    %c0_54 = arith.constant 0 : index
    %53 = vector.load %arg2[%c7, %c0_53, %c0_54] : memref<9x128x128xf32, #tpu.memory_space<vmem>>, vector<1x128x128xf32>
    %54 = vector.shape_cast %53 : vector<1x128x128xf32> to vector<128x128xf32>
    %cst_55 = arith.constant dense<0.000000e+00> : vector<256x128xf32>
    %55 = tpu.matmul %52, %54, %cst_55 {dimension_numbers = #tpu.dot_dimension_numbers<[1], [0], [0], [1], [0, 0, 1, 1], [], []>} : vector<256x128xf32>, vector<128x128xf32>, vector<256x128xf32> -> vector<256x128xf32>
    %56 = arith.addf %49, %55 : vector<256x128xf32>
    %c0_56 = arith.constant 0 : index
    %c2_57 = arith.constant 2 : index
    %c2_58 = arith.constant 2 : index
    %c0_59 = arith.constant 0 : index
    %57 = vector.load %arg1[%c0_56, %c2_57, %c2_58, %c0_59] : memref<1x18x18x128xf32, #tpu.memory_space<vmem>>, vector<1x16x16x128xf32>
    %58 = vector.shape_cast %57 : vector<1x16x16x128xf32> to vector<16x16x128xf32>
    %59 = vector.shape_cast %58 : vector<16x16x128xf32> to vector<256x128xf32>
    %c8 = arith.constant 8 : index
    %c0_60 = arith.constant 0 : index
    %c0_61 = arith.constant 0 : index
    %60 = vector.load %arg2[%c8, %c0_60, %c0_61] : memref<9x128x128xf32, #tpu.memory_space<vmem>>, vector<1x128x128xf32>
    %61 = vector.shape_cast %60 : vector<1x128x128xf32> to vector<128x128xf32>
    %cst_62 = arith.constant dense<0.000000e+00> : vector<256x128xf32>
    %62 = tpu.matmul %59, %61, %cst_62 {dimension_numbers = #tpu.dot_dimension_numbers<[1], [0], [0], [1], [0, 0, 1, 1], [], []>} : vector<256x128xf32>, vector<128x128xf32>, vector<256x128xf32> -> vector<256x128xf32>
    %63 = arith.addf %56, %62 : vector<256x128xf32>
    %c0_63 = arith.constant 0 : index
    %c0_64 = arith.constant 0 : index
    %64 = vector.load %arg3[%c0_63, %c0_64] : memref<1x128xf32, #tpu.memory_space<vmem>>, vector<1x128xf32>
    %65 = vector.broadcast %64 : vector<1x128xf32> to vector<256x128xf32>
    %66 = arith.mulf %63, %65 : vector<256x128xf32>
    %c0_65 = arith.constant 0 : index
    %c0_66 = arith.constant 0 : index
    %67 = vector.load %arg4[%c0_65, %c0_66] : memref<1x128xf32, #tpu.memory_space<vmem>>, vector<1x128xf32>
    %68 = vector.broadcast %67 : vector<1x128xf32> to vector<256x128xf32>
    %69 = arith.addf %66, %68 : vector<256x128xf32>
    %cst_67 = arith.constant 0.000000e+00 : f32
    %70 = vector.broadcast %cst_67 : f32 to vector<256x128xf32>
    %71 = arith.maximumf %69, %70 : vector<256x128xf32>
    %72 = vector.shape_cast %71 : vector<256x128xf32> to vector<16x16x128xf32>
    %c0_68 = arith.constant 0 : index
    %c0_69 = arith.constant 0 : index
    %c0_70 = arith.constant 0 : index
    %c0_71 = arith.constant 0 : index
    %73 = vector.load %arg5[%c0_68, %c0_69, %c0_70, %c0_71] : memref<1x16x16x128xf32, #tpu.memory_space<vmem>>, vector<1x16x16x128xf32>
    %74 = vector.shape_cast %73 : vector<1x16x16x128xf32> to vector<16x16x128xf32>
    %75 = vector.shape_cast %72 : vector<16x16x128xf32> to vector<1x16x16x128xf32>
    tpu.vector_store %arg5[%c0_68, %c0_69, %c0_70, %c0_71], %75 {strides = array<i32>} : memref<1x16x16x128xf32, #tpu.memory_space<vmem>>, vector<1x16x16x128xf32>,
    return
  }
  func.func @transform_0(%arg0: i32) -> (i32, i32, i32, i32) {
    %c0_i32 = arith.constant 0 : i32
    %c0_i32_0 = arith.constant 0 : i32
    %c0_i32_1 = arith.constant 0 : i32
    %c0_i32_2 = arith.constant 0 : i32
    return %arg0, %c0_i32, %c0_i32_0, %c0_i32_1 : i32, i32, i32, i32
  }
  func.func @transform_1(%arg0: i32) -> (i32, i32, i32) {
    %c0_i32 = arith.constant 0 : i32
    %c0_i32_0 = arith.constant 0 : i32
    %c0_i32_1 = arith.constant 0 : i32
    %c0_i32_2 = arith.constant 0 : i32
    return %c0_i32, %c0_i32_0, %c0_i32_1 : i32, i32, i32
  }
  func.func @transform_2(%arg0: i32) -> (i32, i32) {
    %c0_i32 = arith.constant 0 : i32
    %c0_i32_0 = arith.constant 0 : i32
    %c0_i32_1 = arith.constant 0 : i32
    return %c0_i32, %c0_i32_0 : i32, i32
  }
  func.func @transform_3(%arg0: i32) -> (i32, i32) {
    %c0_i32 = arith.constant 0 : i32
    %c0_i32_0 = arith.constant 0 : i32
    %c0_i32_1 = arith.constant 0 : i32
    return %c0_i32, %c0_i32_0 : i32, i32
  }
  func.func @transform_4(%arg0: i32) -> (i32, i32, i32, i32) {
    %c0_i32 = arith.constant 0 : i32
    %c0_i32_0 = arith.constant 0 : i32
    %c0_i32_1 = arith.constant 0 : i32
    %c0_i32_2 = arith.constant 0 : i32
    return %arg0, %c0_i32, %c0_i32_0, %c0_i32_1 : i32, i32, i32, i32
  }
}

module attributes {stable_mosaic.version = 11 : i64} {
  func.func @_out_proj_kernel(%arg0: i32, %arg1: memref<256x128xf32, #tpu.memory_space<vmem>>, %arg2: memref<128x128xf32, #tpu.memory_space<vmem>>, %arg3: memref<1x128xf32, #tpu.memory_space<vmem>>, %arg4: memref<1x128xf32, #tpu.memory_space<vmem>>, %arg5: memref<256x128xf32, #tpu.memory_space<vmem>>, %arg6: memref<128x128xf32, #tpu.memory_space<vmem>>, %arg7: memref<1x128xf32, #tpu.memory_space<vmem>>, %arg8: memref<1x128xf32, #tpu.memory_space<vmem>>, %arg9: memref<256x128xf32, #tpu.memory_space<vmem>>) attributes {dimension_semantics = [#tpu.dimension_semantics<parallel>], iteration_bounds = array<i64: 2>, scalar_prefetch = 0 : i64, scratch_operands = 0 : i64, tpu.core_type = #tpu.core_type<tc>, window_params = [{transform_indices = @transform_0, window_bounds = array<i64: 256, 128>}, {pipeline_mode = #tpu.pipeline_mode<synchronous>, transform_indices = @transform_1, window_bounds = array<i64: 128, 128>}, {pipeline_mode = #tpu.pipeline_mode<synchronous>, transform_indices = @transform_2, window_bounds = array<i64: 1, 128>}, {pipeline_mode = #tpu.pipeline_mode<synchronous>, transform_indices = @transform_3, window_bounds = array<i64: 1, 128>}, {transform_indices = @transform_4, window_bounds = array<i64: 256, 128>}, {pipeline_mode = #tpu.pipeline_mode<synchronous>, transform_indices = @transform_5, window_bounds = array<i64: 128, 128>}, {pipeline_mode = #tpu.pipeline_mode<synchronous>, transform_indices = @transform_6, window_bounds = array<i64: 1, 128>}, {pipeline_mode = #tpu.pipeline_mode<synchronous>, transform_indices = @transform_7, window_bounds = array<i64: 1, 128>}, {transform_indices = @transform_8, window_bounds = array<i64: 256, 128>}]} {
    %c0 = arith.constant 0 : index
    %c0_0 = arith.constant 0 : index
    %0 = vector.load %arg1[%c0, %c0_0] : memref<256x128xf32, #tpu.memory_space<vmem>>, vector<256x128xf32>
    %c0_1 = arith.constant 0 : index
    %c0_2 = arith.constant 0 : index
    %1 = vector.load %arg2[%c0_1, %c0_2] : memref<128x128xf32, #tpu.memory_space<vmem>>, vector<128x128xf32>
    %cst = arith.constant dense<0.000000e+00> : vector<256x128xf32>
    %2 = tpu.matmul %0, %1, %cst {dimension_numbers = #tpu.dot_dimension_numbers<[1], [0], [0], [1], [0, 0, 1, 1], [], []>} : vector<256x128xf32>, vector<128x128xf32>, vector<256x128xf32> -> vector<256x128xf32>
    %c0_3 = arith.constant 0 : index
    %c0_4 = arith.constant 0 : index
    %3 = vector.load %arg3[%c0_3, %c0_4] : memref<1x128xf32, #tpu.memory_space<vmem>>, vector<1x128xf32>
    %4 = vector.broadcast %3 : vector<1x128xf32> to vector<256x128xf32>
    %5 = arith.mulf %2, %4 : vector<256x128xf32>
    %c0_5 = arith.constant 0 : index
    %c0_6 = arith.constant 0 : index
    %6 = vector.load %arg4[%c0_5, %c0_6] : memref<1x128xf32, #tpu.memory_space<vmem>>, vector<1x128xf32>
    %7 = vector.broadcast %6 : vector<1x128xf32> to vector<256x128xf32>
    %8 = arith.addf %5, %7 : vector<256x128xf32>
    %c0_7 = arith.constant 0 : index
    %c0_8 = arith.constant 0 : index
    %9 = vector.load %arg5[%c0_7, %c0_8] : memref<256x128xf32, #tpu.memory_space<vmem>>, vector<256x128xf32>
    %c0_9 = arith.constant 0 : index
    %c0_10 = arith.constant 0 : index
    %10 = vector.load %arg6[%c0_9, %c0_10] : memref<128x128xf32, #tpu.memory_space<vmem>>, vector<128x128xf32>
    %cst_11 = arith.constant dense<0.000000e+00> : vector<256x128xf32>
    %11 = tpu.matmul %9, %10, %cst_11 {dimension_numbers = #tpu.dot_dimension_numbers<[1], [0], [0], [1], [0, 0, 1, 1], [], []>} : vector<256x128xf32>, vector<128x128xf32>, vector<256x128xf32> -> vector<256x128xf32>
    %c0_12 = arith.constant 0 : index
    %c0_13 = arith.constant 0 : index
    %12 = vector.load %arg7[%c0_12, %c0_13] : memref<1x128xf32, #tpu.memory_space<vmem>>, vector<1x128xf32>
    %13 = vector.broadcast %12 : vector<1x128xf32> to vector<256x128xf32>
    %14 = arith.mulf %11, %13 : vector<256x128xf32>
    %c0_14 = arith.constant 0 : index
    %c0_15 = arith.constant 0 : index
    %15 = vector.load %arg8[%c0_14, %c0_15] : memref<1x128xf32, #tpu.memory_space<vmem>>, vector<1x128xf32>
    %16 = vector.broadcast %15 : vector<1x128xf32> to vector<256x128xf32>
    %17 = arith.addf %14, %16 : vector<256x128xf32>
    %18 = arith.addf %8, %17 : vector<256x128xf32>
    %cst_16 = arith.constant 0.000000e+00 : f32
    %19 = vector.broadcast %cst_16 : f32 to vector<256x128xf32>
    %20 = arith.maximumf %18, %19 : vector<256x128xf32>
    %c0_17 = arith.constant 0 : index
    %c0_18 = arith.constant 0 : index
    %21 = vector.load %arg9[%c0_17, %c0_18] : memref<256x128xf32, #tpu.memory_space<vmem>>, vector<256x128xf32>
    tpu.vector_store %arg9[%c0_17, %c0_18], %20 {strides = array<i32>} : memref<256x128xf32, #tpu.memory_space<vmem>>, vector<256x128xf32>,
    return
  }
  func.func @transform_0(%arg0: i32) -> (i32, i32) {
    %c0_i32 = arith.constant 0 : i32
    %c0_i32_0 = arith.constant 0 : i32
    return %arg0, %c0_i32 : i32, i32
  }
  func.func @transform_1(%arg0: i32) -> (i32, i32) {
    %c0_i32 = arith.constant 0 : i32
    %c0_i32_0 = arith.constant 0 : i32
    %c0_i32_1 = arith.constant 0 : i32
    return %c0_i32, %c0_i32_0 : i32, i32
  }
  func.func @transform_2(%arg0: i32) -> (i32, i32) {
    %c0_i32 = arith.constant 0 : i32
    %c0_i32_0 = arith.constant 0 : i32
    %c0_i32_1 = arith.constant 0 : i32
    return %c0_i32, %c0_i32_0 : i32, i32
  }
  func.func @transform_3(%arg0: i32) -> (i32, i32) {
    %c0_i32 = arith.constant 0 : i32
    %c0_i32_0 = arith.constant 0 : i32
    %c0_i32_1 = arith.constant 0 : i32
    return %c0_i32, %c0_i32_0 : i32, i32
  }
  func.func @transform_4(%arg0: i32) -> (i32, i32) {
    %c0_i32 = arith.constant 0 : i32
    %c0_i32_0 = arith.constant 0 : i32
    return %arg0, %c0_i32 : i32, i32
  }
  func.func @transform_5(%arg0: i32) -> (i32, i32) {
    %c0_i32 = arith.constant 0 : i32
    %c0_i32_0 = arith.constant 0 : i32
    %c0_i32_1 = arith.constant 0 : i32
    return %c0_i32, %c0_i32_0 : i32, i32
  }
  func.func @transform_6(%arg0: i32) -> (i32, i32) {
    %c0_i32 = arith.constant 0 : i32
    %c0_i32_0 = arith.constant 0 : i32
    %c0_i32_1 = arith.constant 0 : i32
    return %c0_i32, %c0_i32_0 : i32, i32
  }
  func.func @transform_7(%arg0: i32) -> (i32, i32) {
    %c0_i32 = arith.constant 0 : i32
    %c0_i32_0 = arith.constant 0 : i32
    %c0_i32_1 = arith.constant 0 : i32
    return %c0_i32, %c0_i32_0 : i32, i32
  }
  func.func @transform_8(%arg0: i32) -> (i32, i32) {
    %c0_i32 = arith.constant 0 : i32
    %c0_i32_0 = arith.constant 0 : i32
    return %arg0, %c0_i32 : i32, i32
  }
}

</mosaic_0001>

<bundles_post_ra>
// kernel: bottleneck_forward.3
= control target key start
LH: loop header
LB: loop body
LE: loop exit
PB: predicated region body
PF: predicated region fallthrough
CT: control target
= control target key end

     0   :  { %s902_s15 = smov 0   ;;  %s1116_s0 = inlined_call_operand.vmem [shape: f32[512,128], index: 0, kind: input, shape index: {}]   ;;  %s1117_s1 = inlined_call_operand.vmem [shape: f32[128,128], index: 1, kind: input, shape index: {}]   ;;  %s1118_s2 = inlined_call_operand.vmem [shape: f32[1,128], index: 2, kind: input, shape index: {}]   ;;  %s1119_s3 = inlined_call_operand.vmem [shape: f32[1,128], index: 3, kind: input, shape index: {}]   ;;  %s1120_s4 = inlined_call_operand.vmem [shape: f32[512,128], index: 4, kind: output, shape index: {}]  }
   0x1 LB: > { %s672_s16 = sadd.s32 4294967295, %s875_s15   ;;  %p676_p0 = scmp.ge.s32.totalorder %s875_s15, 1  ;;  %s875_s15 = sphi %s902_s15, %s14_s15  }
   0x2   : > { %p163_p1 = scmp.lt.s32.totalorder %s875_s15, 3 }
   0x4   : > { %p164_p2 = pnand %p676_p0, %p163_p1 }
   0x5   : > { %v233_v0 = vld [vmem:[%s1117_s1] sm:$0xff] (!%p164_p2)  ;;  %v234_v1 = vld [vmem:[%s1117_s1 + $0x8] sm:$0xff] (!%p164_p2)  ;;  %v235_v2 = vld [vmem:[%s1117_s1 + $0x10] sm:$0xff] (!%p164_p2)  ;;  %s677_s23 = sshll.u32 (!%p164_p2), %s672_s16, 5 }
   0x6   : > { %167 = sbr.rel (%p164_p2) target bundleno = 289 (0x121), region = 36  ;;  %v813_v3 = vpack.c.bf16 (!%p164_p2), %v234_v1, %v233_v0  ;;  %v236_v4 = vld [vmem:[%s1117_s1 + $0x18] sm:$0xff] (!%p164_p2)  ;;  %p190_p3 = scmp.lt.s32.totalorder (!%p164_p2), %s677_s23, 63  ;;  %v237_v6 = vld [vmem:[%s1117_s1 + $0x20] sm:$0xff] (!%p164_p2)  ;;  %v238_v7 = vld [vmem:[%s1117_s1 + $0x28] sm:$0xff] (!%p164_p2) }
   0x7   : > { %v817_v5 = vpack.c.bf16 (!%p164_p2), %v236_v4, %v235_v2  ;;  %v821_v8 = vpack.c.bf16 (!%p164_p2), %v238_v7, %v237_v6  ;;  %v239_v9 = vld [vmem:[%s1117_s1 + $0x30] sm:$0xff] (!%p164_p2)  ;;  %v240_v10 = vld [vmem:[%s1117_s1 + $0x38] sm:$0xff] (!%p164_p2)  ;;  %v241_v14 = vld [vmem:[%s1117_s1 + $0x40] sm:$0xff] (!%p164_p2) }
   0x8   : > { %814 = vmatprep.subr.bf16.mxu0 (!%p164_p2), %v813_v3  ;;  %845 = vmatprep.subr.bf16.mxu1 (!%p164_p2), %v813_v3  ;;  %v825_v13 = vpack.c.bf16 (!%p164_p2), %v240_v10, %v239_v9  ;;  %v242_v15 = vld [vmem:[%s1117_s1 + $0x48] sm:$0xff] (!%p164_p2)  ;;  %v243_v17 = vld [vmem:[%s1117_s1 + $0x50] sm:$0xff] (!%p164_p2)  ;;  %v244_v18 = vld [vmem:[%s1117_s1 + $0x58] sm:$0xff] (!%p164_p2) }
   0x9   : > { %816 = vmatpush3.bf16.msra.mxu0 (!%p164_p2), %v813_v3  ;;  %853 = vmatpush3.bf16.msra.mxu1 (!%p164_p2), %v813_v3  ;;  %v829_v16 = vpack.c.bf16 (!%p164_p2), %v242_v15, %v241_v14  ;;  %v833_v19 = vpack.c.bf16 (!%p164_p2), %v244_v18, %v243_v17  ;;  %v245_v20 = vld [vmem:[%s1117_s1 + $0x60] sm:$0xff] (!%p164_p2)  ;;  %v246_v21 = vld [vmem:[%s1117_s1 + $0x68] sm:$0xff] (!%p164_p2)  ;;  %v247_v23 = vld [vmem:[%s1117_s1 + $0x70] sm:$0xff] (!%p164_p2) }
   0xa   : > { %818 = vmatprep.subr.bf16.mxu0 (!%p164_p2), %v817_v5  ;;  %846 = vmatprep.subr.bf16.mxu1 (!%p164_p2), %v817_v5  ;;  %v837_v22 = vpack.c.bf16 (!%p164_p2), %v246_v21, %v245_v20  ;;  %v248_v24 = vld [vmem:[%s1117_s1 + $0x78] sm:$0xff] (!%p164_p2)  ;;  %v1003_v56 = vld [vmem:[%s1118_s2] ss:$0 sm:$0xff] (!%p164_p2) }
   0xb   : > { %v841_v25 = vpack.c.bf16 (!%p164_p2), %v248_v24, %v247_v23  ;;  %v1008_v58 = vld [vmem:[%s1119_s3] ss:$0 sm:$0xff] (!%p164_p2) }
   0xd   : > { %s1122_s23 = smov (!%p190_p3, %s677_s23), 63  ;;  %820 = vmatpush3.bf16.msra.mxu0 %v817_v5  ;;  %854 = vmatpush3.bf16.msra.mxu1 %v817_v5 }
   0xe   : > { %s678_s30 = sshll.u32 %s1122_s23, 3  ;;  %822 = vmatprep.subr.bf16.mxu0 %v821_v8  ;;  %847 = vmatprep.subr.bf16.mxu1 %v821_v8 }
   0xf   : > { %s942_s11 = scalar_lea.vmem %s1116_s0, %s678_s30 }
  0x10   : > { %v201_v11 = vld [vmem:[%s942_s11] sm:$0xff]  ;;  %v202_v26 = vld [vmem:[%s942_s11 + $0x8] sm:$0xff]  ;;  %v203_v28 = vld [vmem:[%s942_s11 + $0x10] sm:$0xff] }
  0x11   : > { %v217_v12 = vld [vmem:[%s942_s11 + $0x80] sm:$0xff]  ;;  %765 = vmatprep.mubr.f32.mxu0 %v201_v11  ;;  %824 = vmatpush3.bf16.msra.mxu0 %v821_v8  ;;  %v218_v27 = vld [vmem:[%s942_s11 + $0x88] sm:$0xff]  ;;  %v219_v29 = vld [vmem:[%s942_s11 + $0x90] sm:$0xff] }
  0x12   : > { %789 = vmatprep.mubr.f32.mxu1 %v217_v12  ;;  %855 = vmatpush3.bf16.msra.mxu1 %v821_v8  ;;  %v204_v30 = vld [vmem:[%s942_s11 + $0x18] sm:$0xff]  ;;  %v205_v32 = vld [vmem:[%s942_s11 + $0x20] sm:$0xff]  ;;  %v206_v34 = vld [vmem:[%s942_s11 + $0x28] sm:$0xff] }
  0x13   : > { %826 = vmatprep.subr.bf16.mxu0 %v825_v13  ;;  %848 = vmatprep.subr.bf16.mxu1 %v825_v13  ;;  %v220_v31 = vld [vmem:[%s942_s11 + $0x98] sm:$0xff]  ;;  %v221_v33 = vld [vmem:[%s942_s11 + $0xa0] sm:$0xff]  ;;  %v222_v35 = vld [vmem:[%s942_s11 + $0xa8] sm:$0xff] }
  0x14   : > { %v207_v36 = vld [vmem:[%s942_s11 + $0x30] sm:$0xff]  ;;  %v208_v38 = vld [vmem:[%s942_s11 + $0x38] sm:$0xff]  ;;  %v209_v40 = vld [vmem:[%s942_s11 + $0x40] sm:$0xff] }
  0x15   : > { %828 = vmatpush3.bf16.msra.mxu0 %v825_v13  ;;  %v223_v37 = vld [vmem:[%s942_s11 + $0xb0] sm:$0xff]  ;;  %v224_v39 = vld [vmem:[%s942_s11 + $0xb8] sm:$0xff]  ;;  %v225_v41 = vld [vmem:[%s942_s11 + $0xc0] sm:$0xff] }
  0x16   : > { %856 = vmatpush3.bf16.msra.mxu1 %v825_v13  ;;  %830 = vmatprep.subr.bf16.mxu0 %v829_v16  ;;  %v210_v42 = vld [vmem:[%s942_s11 + $0x48] sm:$0xff]  ;;  %v211_v44 = vld [vmem:[%s942_s11 + $0x50] sm:$0xff]  ;;  %v212_v46 = vld [vmem:[%s942_s11 + $0x58] sm:$0xff] }
  0x17   : > { %849 = vmatprep.subr.bf16.mxu1 %v829_v16  ;;  %v226_v43 = vld [vmem:[%s942_s11 + $0xc8] sm:$0xff]  ;;  %v227_v45 = vld [vmem:[%s942_s11 + $0xd0] sm:$0xff]  ;;  %v228_v47 = vld [vmem:[%s942_s11 + $0xd8] sm:$0xff] }
  0x18   : > { %v213_v48 = vld [vmem:[%s942_s11 + $0x60] sm:$0xff]  ;;  %v214_v50 = vld [vmem:[%s942_s11 + $0x68] sm:$0xff]  ;;  %v215_v52 = vld [vmem:[%s942_s11 + $0x70] sm:$0xff] }
  0x19   : > { %832 = vmatpush3.bf16.msra.mxu0 %v829_v16  ;;  %v229_v49 = vld [vmem:[%s942_s11 + $0xe0] sm:$0xff]  ;;  %v230_v51 = vld [vmem:[%s942_s11 + $0xe8] sm:$0xff]  ;;  %v231_v53 = vld [vmem:[%s942_s11 + $0xf0] sm:$0xff] }
  0x1a   : > { %857 = vmatpush3.bf16.msra.mxu1 %v829_v16  ;;  %834 = vmatprep.subr.bf16.mxu0 %v833_v19  ;;  %v216_v54 = vld [vmem:[%s942_s11 + $0x78] sm:$0xff] }
  0x1b   : > { %850 = vmatprep.subr.bf16.mxu1 %v833_v19  ;;  %v232_v55 = vld [vmem:[%s942_s11 + $0xf8] sm:$0xff]  ;;  %s1021_s11 = scalar_lea.vmem %s1120_s4, %s678_s30 }
  0x1d   : > { %836 = vmatpush3.bf16.msra.mxu0 %v833_v19 }
  0x1e   : > { %858 = vmatpush3.bf16.msra.mxu1 %v833_v19  ;;  %838 = vmatprep.subr.bf16.mxu0 %v837_v22 }
  0x1f   : > { %851 = vmatprep.subr.bf16.mxu1 %v837_v22 }
  0x21   : > { %840 = vmatpush3.bf16.msra.mxu0 %v837_v22 }
  0x22   : > { %859 = vmatpush3.bf16.msra.mxu1 %v837_v22  ;;  %842 = vmatprep.subr.bf16.mxu0 %v841_v25 }
  0x23   : > { %852 = vmatprep.subr.bf16.mxu1 %v841_v25 }
  0x25   : > { %844 = vmatpush3.bf16.msra.mxu0 %v841_v25 }
  0x26   : > { %860 = vmatpush3.bf16.msra.mxu1 %v841_v25 }
  0x28   : > { %766 = vmatmul.mubr.f32.vlgmr.msra.gmra.mrb[0].mxu0 %v202_v26 }
  0x29   : > { %790 = vmatmul.mubr.f32.vlgmr.msra.gmra.mrb[0].mxu1 %v218_v27  ;;  %768 = vmatprep.mubr.f32.mxu0 %v203_v28 }
  0x2a   : > { %792 = vmatprep.mubr.f32.mxu1 %v219_v29 }
  0x2c   : > { %769 = vmatmul.mubr.f32.gmra.mrb[2].mxu0 %v204_v30 }
  0x2d   : > { %793 = vmatmul.mubr.f32.gmra.mrb[2].mxu1 %v220_v31  ;;  %771 = vmatprep.mubr.f32.mxu0 %v205_v32 }
  0x2e   : > { %795 = vmatprep.mubr.f32.mxu1 %v221_v33 }
  0x30   : > { %772 = vmatmul.mubr.f32.gmra.mrb[4].mxu0 %v206_v34 }
  0x31   : > { %796 = vmatmul.mubr.f32.gmra.mrb[4].mxu1 %v222_v35  ;;  %774 = vmatprep.mubr.f32.mxu0 %v207_v36 }
  0x32   : > { %798 = vmatprep.mubr.f32.mxu1 %v223_v37 }
  0x34   : > { %775 = vmatmul.mubr.f32.gmra.mrb[6].mxu0 %v208_v38 }
  0x35   : > { %799 = vmatmul.mubr.f32.gmra.mrb[6].mxu1 %v224_v39  ;;  %777 = vmatprep.mubr.f32.mxu0 %v209_v40 }
  0x36   : > { %801 = vmatprep.mubr.f32.mxu1 %v225_v41 }
  0x38   : > { %778 = vmatmul.mubr.f32.gmra.mrb[8].mxu0 %v210_v42 }
  0x39   : > { %802 = vmatmul.mubr.f32.gmra.mrb[8].mxu1 %v226_v43  ;;  %780 = vmatprep.mubr.f32.mxu0 %v211_v44 }
  0x3a   : > { %804 = vmatprep.mubr.f32.mxu1 %v227_v45 }
  0x3c   : > { %781 = vmatmul.mubr.f32.gmra.mrb[10].mxu0 %v212_v46 }
  0x3d   : > { %805 = vmatmul.mubr.f32.gmra.mrb[10].mxu1 %v228_v47  ;;  %783 = vmatprep.mubr.f32.mxu0 %v213_v48 }
  0x3e   : > { %807 = vmatprep.mubr.f32.mxu1 %v229_v49 }
  0x40   : > { %784 = vmatmul.mubr.f32.gmra.mrb[12].mxu0 %v214_v50 }
  0x41   : > { %808 = vmatmul.mubr.f32.gmra.mrb[12].mxu1 %v230_v51  ;;  %786 = vmatprep.mubr.f32.mxu0 %v215_v52 }
  0x42   : > { %810 = vmatprep.mubr.f32.mxu1 %v231_v53 }
  0x44   : > { %787 = vmatmul.mubr.f32.gmra.mrb[14].mxu0 %v216_v54 }
  0x45   : > { %811 = vmatmul.mubr.f32.gmra.mrb[14].mxu1 %v232_v55 }
  0xfb   : > { %v767_v57 = vpop.f32.mrb[0].mxu0 }
  0xfc   : > { %v791_v59 = vpop.f32.mrb[0].mxu1  ;;  %v482_v60 = vmul.f32 %v767_v57, %v1003_v56  ;;  %v315_v62 = vpop.f32.mrb[1].mxu0 }
  0xfd   : > { %v498_v61 = vmul.f32 %v791_v59, %v1003_v56  ;;  %v395_v63 = vpop.f32.mrb[1].mxu1  ;;  %v481_v0 = vmul.f32 %v1003_v56, %v315_v62 }
  0xfe   : > { %v497_v1 = vmul.f32 %v1003_v56, %v395_v63  ;;  %v521_v2 = vadd.f32 %v1008_v58, %v482_v60 }
  0xff   : > { %v537_v3 = vadd.f32 %v1008_v58, %v498_v61  ;;  %v520_v4 = vadd.f32 %v1008_v58, %v481_v0  ;;  %v770_v6 = vpop.f32.mrb[2].mxu0 }
 0x100   : > { %v536_v5 = vadd.f32 %v1008_v58, %v497_v1  ;;  %v794_v7 = vpop.f32.mrb[2].mxu1  ;;  %v553_v8 = vmax.f32 %v521_v2, 0.0  ;;  %v484_v10 = vmul.f32 %v770_v6, %v1003_v56  ;;  %v325_v12 = vpop.f32.mrb[3].mxu0 }
 0x101   : > { %v569_v9 = vmax.f32 %v537_v3, 0.0  ;;  %v500_v11 = vmul.f32 %v794_v7, %v1003_v56  ;;  %v405_v13 = vpop.f32.mrb[3].mxu1  ;;  %v552_v14 = vmax.f32 %v520_v4, 0.0  ;;  %v483_v16 = vmul.f32 %v1003_v56, %v325_v12 }
 0x102   : > { %v568_v15 = vmax.f32 %v536_v5, 0.0  ;;  %v499_v17 = vmul.f32 %v1003_v56, %v405_v13  ;;  %585 = vst [vmem:[%s1021_s11 + $0x8] sm:$0xff] %v553_v8  ;;  %v523_v18 = vadd.f32 %v1008_v58, %v484_v10 }
 0x103   : > { %601 = vst [vmem:[%s1021_s11 + $0x88] sm:$0xff] %v569_v9  ;;  %v539_v19 = vadd.f32 %v1008_v58, %v500_v11  ;;  %584 = vst [vmem:[%s1021_s11] sm:$0xff] %v552_v14  ;;  %v522_v20 = vadd.f32 %v1008_v58, %v483_v16  ;;  %v773_v22 = vpop.f32.mrb[4].mxu0 }
 0x104   : > { %600 = vst [vmem:[%s1021_s11 + $0x80] sm:$0xff] %v568_v15  ;;  %v538_v21 = vadd.f32 %v1008_v58, %v499_v17  ;;  %v797_v23 = vpop.f32.mrb[4].mxu1  ;;  %v555_v24 = vmax.f32 %v523_v18, 0.0  ;;  %v486_v26 = vmul.f32 %v773_v22, %v1003_v56  ;;  %v335_v28 = vpop.f32.mrb[5].mxu0 }
 0x105   : > { %v571_v25 = vmax.f32 %v539_v19, 0.0  ;;  %v502_v27 = vmul.f32 %v797_v23, %v1003_v56  ;;  %v415_v29 = vpop.f32.mrb[5].mxu1  ;;  %v554_v30 = vmax.f32 %v522_v20, 0.0  ;;  %v485_v32 = vmul.f32 %v1003_v56, %v335_v28 }
 0x106   : > { %v570_v31 = vmax.f32 %v538_v21, 0.0  ;;  %v501_v33 = vmul.f32 %v1003_v56, %v415_v29  ;;  %587 = vst [vmem:[%s1021_s11 + $0x18] sm:$0xff] %v555_v24  ;;  %v525_v34 = vadd.f32 %v1008_v58, %v486_v26 }
 0x107   : > { %603 = vst [vmem:[%s1021_s11 + $0x98] sm:$0xff] %v571_v25  ;;  %v541_v35 = vadd.f32 %v1008_v58, %v502_v27  ;;  %586 = vst [vmem:[%s1021_s11 + $0x10] sm:$0xff] %v554_v30  ;;  %v524_v36 = vadd.f32 %v1008_v58, %v485_v32  ;;  %v776_v38 = vpop.f32.mrb[6].mxu0 }
 0x108   : > { %602 = vst [vmem:[%s1021_s11 + $0x90] sm:$0xff] %v570_v31  ;;  %v540_v37 = vadd.f32 %v1008_v58, %v501_v33  ;;  %v800_v39 = vpop.f32.mrb[6].mxu1  ;;  %v557_v40 = vmax.f32 %v525_v34, 0.0  ;;  %v488_v42 = vmul.f32 %v776_v38, %v1003_v56  ;;  %v345_v44 = vpop.f32.mrb[7].mxu0 }
 0x109   : > { %v573_v41 = vmax.f32 %v541_v35, 0.0  ;;  %v504_v43 = vmul.f32 %v800_v39, %v1003_v56  ;;  %v425_v45 = vpop.f32.mrb[7].mxu1  ;;  %v556_v46 = vmax.f32 %v524_v36, 0.0  ;;  %v487_v48 = vmul.f32 %v1003_v56, %v345_v44 }
 0x10a   : > { %v572_v47 = vmax.f32 %v540_v37, 0.0  ;;  %v503_v49 = vmul.f32 %v1003_v56, %v425_v45  ;;  %589 = vst [vmem:[%s1021_s11 + $0x28] sm:$0xff] %v557_v40  ;;  %v527_v50 = vadd.f32 %v1008_v58, %v488_v42 }
 0x10b   : > { %605 = vst [vmem:[%s1021_s11 + $0xa8] sm:$0xff] %v573_v41  ;;  %v543_v51 = vadd.f32 %v1008_v58, %v504_v43  ;;  %588 = vst [vmem:[%s1021_s11 + $0x20] sm:$0xff] %v556_v46  ;;  %v526_v52 = vadd.f32 %v1008_v58, %v487_v48  ;;  %v779_v54 = vpop.f32.mrb[8].mxu0 }
 0x10c   : > { %604 = vst [vmem:[%s1021_s11 + $0xa0] sm:$0xff] %v572_v47  ;;  %v542_v53 = vadd.f32 %v1008_v58, %v503_v49  ;;  %v803_v55 = vpop.f32.mrb[8].mxu1  ;;  %v559_v57 = vmax.f32 %v527_v50, 0.0  ;;  %v490_v60 = vmul.f32 %v779_v54, %v1003_v56  ;;  %v355_v62 = vpop.f32.mrb[9].mxu0 }
 0x10d   : > { %v575_v59 = vmax.f32 %v543_v51, 0.0  ;;  %v506_v61 = vmul.f32 %v803_v55, %v1003_v56  ;;  %v435_v63 = vpop.f32.mrb[9].mxu1  ;;  %v558_v0 = vmax.f32 %v526_v52, 0.0  ;;  %v489_v2 = vmul.f32 %v1003_v56, %v355_v62 }
 0x10e   : > { %v574_v1 = vmax.f32 %v542_v53, 0.0  ;;  %v505_v3 = vmul.f32 %v1003_v56, %v435_v63  ;;  %591 = vst [vmem:[%s1021_s11 + $0x38] sm:$0xff] %v559_v57  ;;  %v529_v4 = vadd.f32 %v1008_v58, %v490_v60 }
 0x10f   : > { %607 = vst [vmem:[%s1021_s11 + $0xb8] sm:$0xff] %v575_v59  ;;  %v545_v5 = vadd.f32 %v1008_v58, %v506_v61  ;;  %590 = vst [vmem:[%s1021_s11 + $0x30] sm:$0xff] %v558_v0  ;;  %v528_v6 = vadd.f32 %v1008_v58, %v489_v2  ;;  %v782_v8 = vpop.f32.mrb[10].mxu0 }
 0x110   : > { %606 = vst [vmem:[%s1021_s11 + $0xb0] sm:$0xff] %v574_v1  ;;  %v544_v7 = vadd.f32 %v1008_v58, %v505_v3  ;;  %v806_v9 = vpop.f32.mrb[10].mxu1  ;;  %v561_v10 = vmax.f32 %v529_v4, 0.0  ;;  %v492_v12 = vmul.f32 %v782_v8, %v1003_v56  ;;  %v365_v14 = vpop.f32.mrb[11].mxu0 }
 0x111   : > { %v577_v11 = vmax.f32 %v545_v5, 0.0  ;;  %v508_v13 = vmul.f32 %v806_v9, %v1003_v56  ;;  %v445_v15 = vpop.f32.mrb[11].mxu1  ;;  %v560_v16 = vmax.f32 %v528_v6, 0.0  ;;  %v491_v18 = vmul.f32 %v1003_v56, %v365_v14 }
 0x112   : > { %v576_v17 = vmax.f32 %v544_v7, 0.0  ;;  %v507_v19 = vmul.f32 %v1003_v56, %v445_v15  ;;  %593 = vst [vmem:[%s1021_s11 + $0x48] sm:$0xff] %v561_v10  ;;  %v531_v20 = vadd.f32 %v1008_v58, %v492_v12 }
 0x113   : > { %609 = vst [vmem:[%s1021_s11 + $0xc8] sm:$0xff] %v577_v11  ;;  %v547_v21 = vadd.f32 %v1008_v58, %v508_v13  ;;  %592 = vst [vmem:[%s1021_s11 + $0x40] sm:$0xff] %v560_v16  ;;  %v530_v22 = vadd.f32 %v1008_v58, %v491_v18  ;;  %v785_v24 = vpop.f32.mrb[12].mxu0 }
 0x114   : > { %608 = vst [vmem:[%s1021_s11 + $0xc0] sm:$0xff] %v576_v17  ;;  %v546_v23 = vadd.f32 %v1008_v58, %v507_v19  ;;  %v809_v25 = vpop.f32.mrb[12].mxu1  ;;  %v563_v26 = vmax.f32 %v531_v20, 0.0  ;;  %v494_v28 = vmul.f32 %v785_v24, %v1003_v56  ;;  %v375_v30 = vpop.f32.mrb[13].mxu0 }
 0x115   : > { %v579_v27 = vmax.f32 %v547_v21, 0.0  ;;  %v510_v29 = vmul.f32 %v809_v25, %v1003_v56  ;;  %v455_v31 = vpop.f32.mrb[13].mxu1  ;;  %v562_v32 = vmax.f32 %v530_v22, 0.0  ;;  %v493_v34 = vmul.f32 %v1003_v56, %v375_v30 }
 0x116   : > { %v578_v33 = vmax.f32 %v546_v23, 0.0  ;;  %v509_v35 = vmul.f32 %v1003_v56, %v455_v31  ;;  %595 = vst [vmem:[%s1021_s11 + $0x58] sm:$0xff] %v563_v26  ;;  %v533_v36 = vadd.f32 %v1008_v58, %v494_v28 }
 0x117   : > { %611 = vst [vmem:[%s1021_s11 + $0xd8] sm:$0xff] %v579_v27  ;;  %v549_v37 = vadd.f32 %v1008_v58, %v510_v29  ;;  %594 = vst [vmem:[%s1021_s11 + $0x50] sm:$0xff] %v562_v32  ;;  %v532_v38 = vadd.f32 %v1008_v58, %v493_v34  ;;  %v788_v40 = vpop.f32.mrb[14].mxu0 }
 0x118   : > { %610 = vst [vmem:[%s1021_s11 + $0xd0] sm:$0xff] %v578_v33  ;;  %v548_v39 = vadd.f32 %v1008_v58, %v509_v35  ;;  %v812_v41 = vpop.f32.mrb[14].mxu1  ;;  %v565_v42 = vmax.f32 %v533_v36, 0.0  ;;  %v496_v44 = vmul.f32 %v788_v40, %v1003_v56  ;;  %v385_v46 = vpop.f32.mrb[15].mxu0 }
 0x119   : > { %v581_v43 = vmax.f32 %v549_v37, 0.0  ;;  %v512_v45 = vmul.f32 %v812_v41, %v1003_v56  ;;  %v465_v47 = vpop.f32.mrb[15].mxu1  ;;  %v564_v48 = vmax.f32 %v532_v38, 0.0  ;;  %v495_v50 = vmul.f32 %v1003_v56, %v385_v46 }
 0x11a   : > { %v580_v49 = vmax.f32 %v548_v39, 0.0  ;;  %v511_v51 = vmul.f32 %v1003_v56, %v465_v47  ;;  %597 = vst [vmem:[%s1021_s11 + $0x68] sm:$0xff] %v565_v42  ;;  %v535_v52 = vadd.f32 %v1008_v58, %v496_v44 }
 0x11b   : > { %613 = vst [vmem:[%s1021_s11 + $0xe8] sm:$0xff] %v581_v43  ;;  %v551_v53 = vadd.f32 %v1008_v58, %v512_v45  ;;  %596 = vst [vmem:[%s1021_s11 + $0x60] sm:$0xff] %v564_v48  ;;  %v534_v54 = vadd.f32 %v1008_v58, %v495_v50 }
 0x11c   : > { %612 = vst [vmem:[%s1021_s11 + $0xe0] sm:$0xff] %v580_v49  ;;  %v550_v55 = vadd.f32 %v1008_v58, %v511_v51  ;;  %v567_v57 = vmax.f32 %v535_v52, 0.0 }
 0x11d   : > { %v583_v59 = vmax.f32 %v551_v53, 0.0  ;;  %v566_v60 = vmax.f32 %v534_v54, 0.0 }
 0x11e   : > { %v582_v61 = vmax.f32 %v550_v55, 0.0  ;;  %599 = vst [vmem:[%s1021_s11 + $0x78] sm:$0xff] %v567_v57 }
 0x11f   : > { %615 = vst [vmem:[%s1021_s11 + $0xf8] sm:$0xff] %v583_v59  ;;  %598 = vst [vmem:[%s1021_s11 + $0x70] sm:$0xff] %v566_v60 }
 0x120   : > { %614 = vst [vmem:[%s1021_s11 + $0xf0] sm:$0xff] %v582_v61 }
 0x121 PF: > { %s14_s15 = sadd.s32 1, %s875_s15  }
 0x122   : > { %p11_p4 = scmp.ge.s32.totalorder %s14_s15, 4  }
 0x124   :  { %13 = sbr.rel (!%p11_p4) target bundleno = 1 (0x1), region = 66 }

// kernel: bottleneck_forward.5
= control target key start
LH: loop header
LB: loop body
LE: loop exit
PB: predicated region body
PF: predicated region fallthrough
CT: control target
= control target key end

     0   :  { %s1595_s27 = smov 0   ;;  %s1966_s0 = inlined_call_operand.vmem [shape: f32[512,128], index: 0, kind: input, shape index: {}]   ;;  %s1967_s1 = inlined_call_operand.vmem [shape: f32[128,128], index: 1, kind: input, shape index: {}]   ;;  %s1968_s2 = inlined_call_operand.vmem [shape: f32[1,128], index: 2, kind: input, shape index: {}]   ;;  %s1969_s3 = inlined_call_operand.vmem [shape: f32[1,128], index: 3, kind: input, shape index: {}]   ;;  %s1970_s4 = inlined_call_operand.vmem [shape: f32[512,128], index: 4, kind: input, shape index: {}]   ;;  %s1971_s5 = inlined_call_operand.vmem [shape: f32[128,128], index: 5, kind: input, shape index: {}]   ;;  %s1972_s6 = inlined_call_operand.vmem [shape: f32[1,128], index: 6, kind: input, shape index: {}]   ;;  %s1973_s7 = inlined_call_operand.vmem [shape: f32[1,128], index: 7, kind: input, shape index: {}]   ;;  %s1974_s8 = inlined_call_operand.vmem [shape: f32[512,128], index: 8, kind: output, shape index: {}]  }
   0x1 LB: > { %s1197_s28 = sadd.s32 4294967295, %s1548_s27   ;;  %p1201_p0 = scmp.ge.s32.totalorder %s1548_s27, 1  ;;  %s1548_s27 = sphi %s1595_s27, %s18_s27  }
   0x2   : > { %p274_p1 = scmp.lt.s32.totalorder %s1548_s27, 3 }
   0x4   : > { %p275_p2 = pnand %p1201_p0, %p274_p1 }
   0x5   : > { %v363_v0 = vld [vmem:[%s1967_s1] sm:$0xff] (!%p275_p2)  ;;  %v364_v1 = vld [vmem:[%s1967_s1 + $0x8] sm:$0xff] (!%p275_p2)  ;;  %s1202_s13 = sshll.u32 (!%p275_p2), %s1197_s28, 5  ;;  %v365_v5 = vld [vmem:[%s1967_s1 + $0x10] sm:$0xff] (!%p275_p2) }
   0x6   : > { %278 = sbr.rel (%p275_p2) target bundleno = 323 (0x143), region = 52  ;;  %v714_v2 = vld [vmem:[%s1971_s5] sm:$0xff] (!%p275_p2)  ;;  %v1470_v3 = vpack.c.bf16 (!%p275_p2), %v364_v1, %v363_v0  ;;  %v715_v4 = vld [vmem:[%s1971_s5 + $0x8] sm:$0xff] (!%p275_p2)  ;;  %v366_v6 = vld [vmem:[%s1967_s1 + $0x18] sm:$0xff] (!%p275_p2)  ;;  %p314_p3 = scmp.lt.s32.totalorder (!%p275_p2), %s1202_s13, 63 }
   0x7   : > { %v1502_v7 = vpack.c.bf16 (!%p275_p2), %v715_v4, %v714_v2  ;;  %v1474_v8 = vpack.c.bf16 (!%p275_p2), %v366_v6, %v365_v5  ;;  %v716_v9 = vld [vmem:[%s1971_s5 + $0x10] sm:$0xff] (!%p275_p2)  ;;  %v717_v10 = vld [vmem:[%s1971_s5 + $0x18] sm:$0xff] (!%p275_p2)  ;;  %v367_v11 = vld [vmem:[%s1967_s1 + $0x20] sm:$0xff] (!%p275_p2) }
   0x8   : > { %1471 = vmatprep.subr.bf16.mxu0 (!%p275_p2), %v1470_v3  ;;  %v1506_v12 = vpack.c.bf16 (!%p275_p2), %v717_v10, %v716_v9  ;;  %v368_v13 = vld [vmem:[%s1967_s1 + $0x28] sm:$0xff] (!%p275_p2)  ;;  %v718_v14 = vld [vmem:[%s1971_s5 + $0x20] sm:$0xff] (!%p275_p2)  ;;  %v369_v18 = vld [vmem:[%s1967_s1 + $0x30] sm:$0xff] (!%p275_p2) }
   0x9   : > { %v719_v15 = vld [vmem:[%s1971_s5 + $0x28] sm:$0xff] (!%p275_p2)  ;;  %1503 = vmatprep.subr.bf16.mxu1 (!%p275_p2), %v1502_v7  ;;  %1473 = vmatpush3.bf16.msra.mxu0 (!%p275_p2), %v1470_v3  ;;  %v1478_v16 = vpack.c.bf16 (!%p275_p2), %v368_v13, %v367_v11  ;;  %v370_v19 = vld [vmem:[%s1967_s1 + $0x38] sm:$0xff] (!%p275_p2)  ;;  %v720_v20 = vld [vmem:[%s1971_s5 + $0x30] sm:$0xff] (!%p275_p2) }
   0xa   : > { %1505 = vmatpush3.bf16.msra.mxu1 (!%p275_p2), %v1502_v7  ;;  %1475 = vmatprep.subr.bf16.mxu0 (!%p275_p2), %v1474_v8  ;;  %v1510_v17 = vpack.c.bf16 (!%p275_p2), %v719_v15, %v718_v14  ;;  %v721_v21 = vld [vmem:[%s1971_s5 + $0x38] sm:$0xff] (!%p275_p2)  ;;  %v1482_v22 = vpack.c.bf16 (!%p275_p2), %v370_v19, %v369_v18  ;;  %v371_v24 = vld [vmem:[%s1967_s1 + $0x40] sm:$0xff] (!%p275_p2)  ;;  %v372_v25 = vld [vmem:[%s1967_s1 + $0x48] sm:$0xff] (!%p275_p2) }
   0xb   : > { %1507 = vmatprep.subr.bf16.mxu1 (!%p275_p2), %v1506_v12  ;;  %v1514_v23 = vpack.c.bf16 (!%p275_p2), %v721_v21, %v720_v20  ;;  %v722_v27 = vld [vmem:[%s1971_s5 + $0x40] sm:$0xff] (!%p275_p2)  ;;  %v723_v28 = vld [vmem:[%s1971_s5 + $0x48] sm:$0xff] (!%p275_p2)  ;;  %v1486_v30 = vpack.c.bf16 (!%p275_p2), %v372_v25, %v371_v24  ;;  %v373_v32 = vld [vmem:[%s1967_s1 + $0x50] sm:$0xff] (!%p275_p2) }
   0xc   : > { %v1518_v31 = vpack.c.bf16 (!%p275_p2), %v723_v28, %v722_v27  ;;  %v374_v33 = vld [vmem:[%s1967_s1 + $0x58] sm:$0xff] (!%p275_p2)  ;;  %v724_v34 = vld [vmem:[%s1971_s5 + $0x50] sm:$0xff] (!%p275_p2)  ;;  %v375_v38 = vld [vmem:[%s1967_s1 + $0x60] sm:$0xff] (!%p275_p2) }
   0xd   : > { %s1976_s13 = smov (!%p314_p3, %s1202_s13), 63  ;;  %1477 = vmatpush3.bf16.msra.mxu0 %v1474_v8  ;;  %v725_v35 = vld [vmem:[%s1971_s5 + $0x58] sm:$0xff]  ;;  %v1490_v36 = vpack.c.bf16 %v374_v33, %v373_v32  ;;  %v376_v39 = vld [vmem:[%s1967_s1 + $0x68] sm:$0xff]  ;;  %v726_v40 = vld [vmem:[%s1971_s5 + $0x60] sm:$0xff] }
   0xe   : > { %s1639_s11 = sshll.u32 %s1976_s13, 3  ;;  %1509 = vmatpush3.bf16.msra.mxu1 %v1506_v12  ;;  %1479 = vmatprep.subr.bf16.mxu0 %v1478_v16  ;;  %v1522_v37 = vpack.c.bf16 %v725_v35, %v724_v34  ;;  %v727_v41 = vld [vmem:[%s1971_s5 + $0x68] sm:$0xff]  ;;  %v1494_v42 = vpack.c.bf16 %v376_v39, %v375_v38  ;;  %v377_v44 = vld [vmem:[%s1967_s1 + $0x70] sm:$0xff]  ;;  %v378_v45 = vld [vmem:[%s1967_s1 + $0x78] sm:$0xff] }
   0xf   : > { %s1657_s22 = scalar_lea.vmem %s1966_s0, %s1639_s11  ;;  %s1663_s25 = scalar_lea.vmem %s1970_s4, %s1639_s11  ;;  %1511 = vmatprep.subr.bf16.mxu1 %v1510_v17  ;;  %v1526_v43 = vpack.c.bf16 %v727_v41, %v726_v40  ;;  %v728_v46 = vld [vmem:[%s1971_s5 + $0x70] sm:$0xff]  ;;  %v729_v47 = vld [vmem:[%s1971_s5 + $0x78] sm:$0xff]  ;;  %v1498_v48 = vpack.c.bf16 %v378_v45, %v377_v44 }
  0x10   : > { %v331_v26 = vld [vmem:[%s1657_s22] sm:$0xff]  ;;  %v1530_v49 = vpack.c.bf16 %v729_v47, %v728_v46  ;;  %v332_v50 = vld [vmem:[%s1657_s22 + $0x8] sm:$0xff]  ;;  %v333_v52 = vld [vmem:[%s1657_s22 + $0x10] sm:$0xff]  ;;  %s1812_s9 = scalar_lea.vmem %s1974_s8, %s1639_s11 }
  0x11   : > { %1342 = vmatprep.mubr.f32.mxu0 %v331_v26  ;;  %v682_v29 = vld [vmem:[%s1663_s25] sm:$0xff]  ;;  %1481 = vmatpush3.bf16.msra.mxu0 %v1478_v16  ;;  %v683_v51 = vld [vmem:[%s1663_s25 + $0x8] sm:$0xff]  ;;  %v684_v53 = vld [vmem:[%s1663_s25 + $0x10] sm:$0xff] }
  0x12   : > { %1422 = vmatprep.mubr.f32.mxu1 %v682_v29  ;;  %1513 = vmatpush3.bf16.msra.mxu1 %v1510_v17  ;;  %v334_v54 = vld [vmem:[%s1657_s22 + $0x18] sm:$0xff]  ;;  %v335_v56 = vld [vmem:[%s1657_s22 + $0x20] sm:$0xff]  ;;  %v336_v58 = vld [vmem:[%s1657_s22 + $0x28] sm:$0xff] }
  0x13   : > { %1483 = vmatprep.subr.bf16.mxu0 %v1482_v22  ;;  %1515 = vmatprep.subr.bf16.mxu1 %v1514_v23  ;;  %v685_v55 = vld [vmem:[%s1663_s25 + $0x18] sm:$0xff]  ;;  %v686_v57 = vld [vmem:[%s1663_s25 + $0x20] sm:$0xff]  ;;  %v687_v59 = vld [vmem:[%s1663_s25 + $0x28] sm:$0xff] }
  0x14   : > { %v337_v60 = vld [vmem:[%s1657_s22 + $0x30] sm:$0xff]  ;;  %v338_v62 = vld [vmem:[%s1657_s22 + $0x38] sm:$0xff]  ;;  %v339_v0 = vld [vmem:[%s1657_s22 + $0x40] sm:$0xff] }
  0x15   : > { %1485 = vmatpush3.bf16.msra.mxu0 %v1482_v22  ;;  %v688_v61 = vld [vmem:[%s1663_s25 + $0x30] sm:$0xff]  ;;  %v689_v63 = vld [vmem:[%s1663_s25 + $0x38] sm:$0xff]  ;;  %v690_v1 = vld [vmem:[%s1663_s25 + $0x40] sm:$0xff] }
  0x16   : > { %1517 = vmatpush3.bf16.msra.mxu1 %v1514_v23  ;;  %1487 = vmatprep.subr.bf16.mxu0 %v1486_v30  ;;  %v340_v2 = vld [vmem:[%s1657_s22 + $0x48] sm:$0xff]  ;;  %v341_v4 = vld [vmem:[%s1657_s22 + $0x50] sm:$0xff]  ;;  %v342_v6 = vld [vmem:[%s1657_s22 + $0x58] sm:$0xff] }
  0x17   : > { %1519 = vmatprep.subr.bf16.mxu1 %v1518_v31  ;;  %v691_v3 = vld [vmem:[%s1663_s25 + $0x48] sm:$0xff]  ;;  %v692_v5 = vld [vmem:[%s1663_s25 + $0x50] sm:$0xff]  ;;  %v693_v7 = vld [vmem:[%s1663_s25 + $0x58] sm:$0xff] }
  0x18   : > { %v343_v8 = vld [vmem:[%s1657_s22 + $0x60] sm:$0xff]  ;;  %v344_v10 = vld [vmem:[%s1657_s22 + $0x68] sm:$0xff]  ;;  %v345_v12 = vld [vmem:[%s1657_s22 + $0x70] sm:$0xff] }
  0x19   : > { %1489 = vmatpush3.bf16.msra.mxu0 %v1486_v30  ;;  %v694_v9 = vld [vmem:[%s1663_s25 + $0x60] sm:$0xff]  ;;  %v695_v11 = vld [vmem:[%s1663_s25 + $0x68] sm:$0xff]  ;;  %v696_v13 = vld [vmem:[%s1663_s25 + $0x70] sm:$0xff] }
  0x1a   : > { %1521 = vmatpush3.bf16.msra.mxu1 %v1518_v31  ;;  %1491 = vmatprep.subr.bf16.mxu0 %v1490_v36  ;;  %v346_v14 = vld [vmem:[%s1657_s22 + $0x78] sm:$0xff]  ;;  %v347_v16 = vld [vmem:[%s1657_s22 + $0x80] sm:$0xff]  ;;  %v348_v18 = vld [vmem:[%s1657_s22 + $0x88] sm:$0xff] }
  0x1b   : > { %1523 = vmatprep.subr.bf16.mxu1 %v1522_v37  ;;  %v697_v15 = vld [vmem:[%s1663_s25 + $0x78] sm:$0xff]  ;;  %v698_v17 = vld [vmem:[%s1663_s25 + $0x80] sm:$0xff]  ;;  %v699_v19 = vld [vmem:[%s1663_s25 + $0x88] sm:$0xff] }
  0x1c   : > { %v349_v20 = vld [vmem:[%s1657_s22 + $0x90] sm:$0xff]  ;;  %v350_v22 = vld [vmem:[%s1657_s22 + $0x98] sm:$0xff]  ;;  %v351_v24 = vld [vmem:[%s1657_s22 + $0xa0] sm:$0xff] }
  0x1d   : > { %1493 = vmatpush3.bf16.msra.mxu0 %v1490_v36  ;;  %v700_v21 = vld [vmem:[%s1663_s25 + $0x90] sm:$0xff]  ;;  %v701_v23 = vld [vmem:[%s1663_s25 + $0x98] sm:$0xff]  ;;  %v702_v25 = vld [vmem:[%s1663_s25 + $0xa0] sm:$0xff] }
  0x1e   : > { %1525 = vmatpush3.bf16.msra.mxu1 %v1522_v37  ;;  %1495 = vmatprep.subr.bf16.mxu0 %v1494_v42  ;;  %v352_v26 = vld [vmem:[%s1657_s22 + $0xa8] sm:$0xff]  ;;  %v353_v28 = vld [vmem:[%s1657_s22 + $0xb0] sm:$0xff]  ;;  %v354_v30 = vld [vmem:[%s1657_s22 + $0xb8] sm:$0xff] }
  0x1f   : > { %1527 = vmatprep.subr.bf16.mxu1 %v1526_v43  ;;  %v703_v27 = vld [vmem:[%s1663_s25 + $0xa8] sm:$0xff]  ;;  %v704_v29 = vld [vmem:[%s1663_s25 + $0xb0] sm:$0xff]  ;;  %v705_v31 = vld [vmem:[%s1663_s25 + $0xb8] sm:$0xff] }
  0x20   : > { %v355_v32 = vld [vmem:[%s1657_s22 + $0xc0] sm:$0xff]  ;;  %v356_v34 = vld [vmem:[%s1657_s22 + $0xc8] sm:$0xff]  ;;  %v357_v36 = vld [vmem:[%s1657_s22 + $0xd0] sm:$0xff] }
  0x21   : > { %1497 = vmatpush3.bf16.msra.mxu0 %v1494_v42  ;;  %v706_v33 = vld [vmem:[%s1663_s25 + $0xc0] sm:$0xff]  ;;  %v707_v35 = vld [vmem:[%s1663_s25 + $0xc8] sm:$0xff]  ;;  %v708_v37 = vld [vmem:[%s1663_s25 + $0xd0] sm:$0xff] }
  0x22   : > { %1529 = vmatpush3.bf16.msra.mxu1 %v1526_v43  ;;  %1499 = vmatprep.subr.bf16.mxu0 %v1498_v48  ;;  %v358_v38 = vld [vmem:[%s1657_s22 + $0xd8] sm:$0xff]  ;;  %v359_v40 = vld [vmem:[%s1657_s22 + $0xe0] sm:$0xff]  ;;  %v360_v42 = vld [vmem:[%s1657_s22 + $0xe8] sm:$0xff] }
  0x23   : > { %1531 = vmatprep.subr.bf16.mxu1 %v1530_v49  ;;  %v709_v39 = vld [vmem:[%s1663_s25 + $0xd8] sm:$0xff]  ;;  %v710_v41 = vld [vmem:[%s1663_s25 + $0xe0] sm:$0xff]  ;;  %v711_v43 = vld [vmem:[%s1663_s25 + $0xe8] sm:$0xff] }
  0x24   : > { %v361_v44 = vld [vmem:[%s1657_s22 + $0xf0] sm:$0xff]  ;;  %v362_v46 = vld [vmem:[%s1657_s22 + $0xf8] sm:$0xff] }
  0x25   : > { %1501 = vmatpush3.bf16.msra.mxu0 %v1498_v48  ;;  %v712_v45 = vld [vmem:[%s1663_s25 + $0xf0] sm:$0xff]  ;;  %v713_v47 = vld [vmem:[%s1663_s25 + $0xf8] sm:$0xff]  ;;  %v1780_v48 = vld [vmem:[%s1968_s2] ss:$0 sm:$0xff] }
  0x26   : > { %1533 = vmatpush3.bf16.msra.mxu1 %v1530_v49  ;;  %v1785_v49 = vld [vmem:[%s1972_s6] ss:$0 sm:$0xff] }
  0x28   : > { %1343 = vmatmul.mubr.f32.vlgmr.msra.gmra.mrb[0].mxu0 %v332_v50 }
  0x29   : > { %1423 = vmatmul.mubr.f32.vlgmr.msra.gmra.mrb[0].mxu1 %v683_v51  ;;  %1345 = vmatprep.mubr.f32.mxu0 %v333_v52  ;;  %v1790_v51 = vld [vmem:[%s1969_s3] ss:$0 sm:$0xff] }
  0x2a   : > { %1425 = vmatprep.mubr.f32.mxu1 %v684_v53 }
  0x2c   : > { %1346 = vmatmul.mubr.f32.gmra.mrb[2].mxu0 %v334_v54  ;;  %v1796_v54 = vld [vmem:[%s1973_s7] ss:$0 sm:$0xff] }
  0x2d   : > { %1426 = vmatmul.mubr.f32.gmra.mrb[2].mxu1 %v685_v55  ;;  %1348 = vmatprep.mubr.f32.mxu0 %v335_v56 }
  0x2e   : > { %1428 = vmatprep.mubr.f32.mxu1 %v686_v57 }
  0x30   : > { %1349 = vmatmul.mubr.f32.gmra.mrb[4].mxu0 %v336_v58 }
  0x31   : > { %1429 = vmatmul.mubr.f32.gmra.mrb[4].mxu1 %v687_v59  ;;  %1351 = vmatprep.mubr.f32.mxu0 %v337_v60 }
  0x32   : > { %1431 = vmatprep.mubr.f32.mxu1 %v688_v61 }
  0x34   : > { %1352 = vmatmul.mubr.f32.gmra.mrb[6].mxu0 %v338_v62 }
  0x35   : > { %1432 = vmatmul.mubr.f32.gmra.mrb[6].mxu1 %v689_v63  ;;  %1354 = vmatprep.mubr.f32.mxu0 %v339_v0 }
  0x36   : > { %1434 = vmatprep.mubr.f32.mxu1 %v690_v1 }
  0x38   : > { %1355 = vmatmul.mubr.f32.gmra.mrb[8].mxu0 %v340_v2 }
  0x39   : > { %1435 = vmatmul.mubr.f32.gmra.mrb[8].mxu1 %v691_v3  ;;  %1357 = vmatprep.mubr.f32.mxu0 %v341_v4 }
  0x3a   : > { %1437 = vmatprep.mubr.f32.mxu1 %v692_v5 }
  0x3c   : > { %1358 = vmatmul.mubr.f32.gmra.mrb[10].mxu0 %v342_v6 }
  0x3d   : > { %1438 = vmatmul.mubr.f32.gmra.mrb[10].mxu1 %v693_v7  ;;  %1360 = vmatprep.mubr.f32.mxu0 %v343_v8 }
  0x3e   : > { %1440 = vmatprep.mubr.f32.mxu1 %v694_v9 }
  0x40   : > { %1361 = vmatmul.mubr.f32.gmra.mrb[12].mxu0 %v344_v10 }
  0x41   : > { %1441 = vmatmul.mubr.f32.gmra.mrb[12].mxu1 %v695_v11  ;;  %1363 = vmatprep.mubr.f32.mxu0 %v345_v12 }
  0x42   : > { %1443 = vmatprep.mubr.f32.mxu1 %v696_v13 }
  0x44   : > { %1364 = vmatmul.mubr.f32.gmra.mrb[14].mxu0 %v346_v14 }
  0x45   : > { %1444 = vmatmul.mubr.f32.gmra.mrb[14].mxu1 %v697_v15  ;;  %1366 = vmatprep.mubr.f32.mxu0 %v347_v16 }
  0x46   : > { %1446 = vmatprep.mubr.f32.mxu1 %v698_v17 }
  0x48   : > { %1367 = vmatmul.mubr.f32.gmra.mrb[16].mxu0 %v348_v18 }
  0x49   : > { %1447 = vmatmul.mubr.f32.gmra.mrb[16].mxu1 %v699_v19  ;;  %1369 = vmatprep.mubr.f32.mxu0 %v349_v20 }
  0x4a   : > { %1449 = vmatprep.mubr.f32.mxu1 %v700_v21 }
  0x4c   : > { %1370 = vmatmul.mubr.f32.gmra.mrb[18].mxu0 %v350_v22 }
  0x4d   : > { %1450 = vmatmul.mubr.f32.gmra.mrb[18].mxu1 %v701_v23  ;;  %1372 = vmatprep.mubr.f32.mxu0 %v351_v24 }
  0x4e   : > { %1452 = vmatprep.mubr.f32.mxu1 %v702_v25 }
  0x50   : > { %1373 = vmatmul.mubr.f32.gmra.mrb[20].mxu0 %v352_v26 }
  0x51   : > { %1453 = vmatmul.mubr.f32.gmra.mrb[20].mxu1 %v703_v27  ;;  %1375 = vmatprep.mubr.f32.mxu0 %v353_v28 }
  0x52   : > { %1455 = vmatprep.mubr.f32.mxu1 %v704_v29 }
  0x54   : > { %1376 = vmatmul.mubr.f32.gmra.mrb[22].mxu0 %v354_v30 }
  0x55   : > { %1456 = vmatmul.mubr.f32.gmra.mrb[22].mxu1 %v705_v31  ;;  %1378 = vmatprep.mubr.f32.mxu0 %v355_v32 }
  0x56   : > { %1458 = vmatprep.mubr.f32.mxu1 %v706_v33 }
  0x58   : > { %1379 = vmatmul.mubr.f32.gmra.mrb[24].mxu0 %v356_v34 }
  0x59   : > { %1459 = vmatmul.mubr.f32.gmra.mrb[24].mxu1 %v707_v35  ;;  %1381 = vmatprep.mubr.f32.mxu0 %v357_v36 }
  0x5a   : > { %1461 = vmatprep.mubr.f32.mxu1 %v708_v37 }
  0x5c   : > { %1382 = vmatmul.mubr.f32.gmra.mrb[26].mxu0 %v358_v38 }
  0x5d   : > { %1462 = vmatmul.mubr.f32.gmra.mrb[26].mxu1 %v709_v39  ;;  %1384 = vmatprep.mubr.f32.mxu0 %v359_v40 }
  0x5e   : > { %1464 = vmatprep.mubr.f32.mxu1 %v710_v41 }
  0x60   : > { %1385 = vmatmul.mubr.f32.gmra.mrb[28].mxu0 %v360_v42 }
  0x61   : > { %1465 = vmatmul.mubr.f32.gmra.mrb[28].mxu1 %v711_v43  ;;  %1387 = vmatprep.mubr.f32.mxu0 %v361_v44 }
  0x62   : > { %1467 = vmatprep.mubr.f32.mxu1 %v712_v45 }
  0x64   : > { %1388 = vmatmul.mubr.f32.gmra.mrb[30].mxu0 %v362_v46 }
  0x65   : > { %1468 = vmatmul.mubr.f32.gmra.mrb[30].mxu1 %v713_v47 }
  0xfb   : > { %v1344_v50 = vpop.f32.mrb[0].mxu0 }
  0xfc   : > { %v612_v52 = vmul.f32 %v1344_v50, %v1780_v48  ;;  %v1424_v53 = vpop.f32.mrb[0].mxu1  ;;  %v445_v55 = vpop.f32.mrb[1].mxu0 }
  0xfd   : > { %v963_v56 = vmul.f32 %v1424_v53, %v1785_v49  ;;  %v611_v57 = vmul.f32 %v1780_v48, %v445_v55  ;;  %v796_v58 = vpop.f32.mrb[1].mxu1 }
  0xfe   : > { %v651_v59 = vadd.f32 %v1790_v51, %v612_v52  ;;  %v962_v60 = vmul.f32 %v1785_v49, %v796_v58 }
  0xff   : > { %v1002_v61 = vadd.f32 %v1796_v54, %v963_v56  ;;  %v650_v62 = vadd.f32 %v1790_v51, %v611_v57  ;;  %v1347_v63 = vpop.f32.mrb[2].mxu0 }
 0x100   : > { %v1001_v0 = vadd.f32 %v1796_v54, %v962_v60  ;;  %v614_v1 = vmul.f32 %v1347_v63, %v1780_v48  ;;  %v1427_v2 = vpop.f32.mrb[2].mxu1  ;;  %v455_v3 = vpop.f32.mrb[3].mxu0 }
 0x101   : > { %v1034_v4 = vadd.f32 %v1002_v61, %v651_v59  ;;  %v965_v5 = vmul.f32 %v1427_v2, %v1785_v49  ;;  %v613_v6 = vmul.f32 %v1780_v48, %v455_v3  ;;  %v806_v7 = vpop.f32.mrb[3].mxu1 }
 0x102   : > { %v1033_v8 = vadd.f32 %v1001_v0, %v650_v62  ;;  %v653_v9 = vadd.f32 %v1790_v51, %v614_v1  ;;  %v964_v10 = vmul.f32 %v1785_v49, %v806_v7 }
 0x103   : > { %v1066_v11 = vmax.f32 %v1034_v4, 0.0  ;;  %v1004_v12 = vadd.f32 %v1796_v54, %v965_v5  ;;  %v652_v13 = vadd.f32 %v1790_v51, %v613_v6  ;;  %v1350_v14 = vpop.f32.mrb[4].mxu0 }
 0x104   : > { %v1065_v15 = vmax.f32 %v1033_v8, 0.0  ;;  %v1003_v16 = vadd.f32 %v1796_v54, %v964_v10  ;;  %v616_v17 = vmul.f32 %v1350_v14, %v1780_v48  ;;  %v1430_v18 = vpop.f32.mrb[4].mxu1  ;;  %v465_v19 = vpop.f32.mrb[5].mxu0 }
 0x105   : > { %1098 = vst [vmem:[%s1812_s9 + $0x8] sm:$0xff] %v1066_v11  ;;  %v1036_v20 = vadd.f32 %v1004_v12, %v653_v9  ;;  %v967_v21 = vmul.f32 %v1430_v18, %v1785_v49  ;;  %v615_v22 = vmul.f32 %v1780_v48, %v465_v19  ;;  %v816_v23 = vpop.f32.mrb[5].mxu1 }
 0x106   : > { %1097 = vst [vmem:[%s1812_s9] sm:$0xff] %v1065_v15  ;;  %v1035_v24 = vadd.f32 %v1003_v16, %v652_v13  ;;  %v655_v25 = vadd.f32 %v1790_v51, %v616_v17  ;;  %v966_v26 = vmul.f32 %v1785_v49, %v816_v23 }
 0x107   : > { %v1068_v27 = vmax.f32 %v1036_v20, 0.0  ;;  %v1006_v28 = vadd.f32 %v1796_v54, %v967_v21  ;;  %v654_v29 = vadd.f32 %v1790_v51, %v615_v22  ;;  %v1353_v30 = vpop.f32.mrb[6].mxu0 }
 0x108   : > { %v1067_v31 = vmax.f32 %v1035_v24, 0.0  ;;  %v1005_v32 = vadd.f32 %v1796_v54, %v966_v26  ;;  %v618_v33 = vmul.f32 %v1353_v30, %v1780_v48  ;;  %v1433_v34 = vpop.f32.mrb[6].mxu1  ;;  %v475_v35 = vpop.f32.mrb[7].mxu0 }
 0x109   : > { %1100 = vst [vmem:[%s1812_s9 + $0x18] sm:$0xff] %v1068_v27  ;;  %v1038_v36 = vadd.f32 %v1006_v28, %v655_v25  ;;  %v969_v37 = vmul.f32 %v1433_v34, %v1785_v49  ;;  %v617_v38 = vmul.f32 %v1780_v48, %v475_v35  ;;  %v826_v39 = vpop.f32.mrb[7].mxu1 }
 0x10a   : > { %1099 = vst [vmem:[%s1812_s9 + $0x10] sm:$0xff] %v1067_v31  ;;  %v1037_v40 = vadd.f32 %v1005_v32, %v654_v29  ;;  %v657_v41 = vadd.f32 %v1790_v51, %v618_v33  ;;  %v968_v42 = vmul.f32 %v1785_v49, %v826_v39 }
 0x10b   : > { %v1070_v43 = vmax.f32 %v1038_v36, 0.0  ;;  %v1008_v44 = vadd.f32 %v1796_v54, %v969_v37  ;;  %v656_v45 = vadd.f32 %v1790_v51, %v617_v38  ;;  %v1356_v46 = vpop.f32.mrb[8].mxu0 }
 0x10c   : > { %v1069_v47 = vmax.f32 %v1037_v40, 0.0  ;;  %v1007_v50 = vadd.f32 %v1796_v54, %v968_v42  ;;  %v620_v52 = vmul.f32 %v1356_v46, %v1780_v48  ;;  %v1436_v53 = vpop.f32.mrb[8].mxu1  ;;  %v485_v55 = vpop.f32.mrb[9].mxu0 }
 0x10d   : > { %1102 = vst [vmem:[%s1812_s9 + $0x28] sm:$0xff] %v1070_v43  ;;  %v1040_v56 = vadd.f32 %v1008_v44, %v657_v41  ;;  %v971_v57 = vmul.f32 %v1436_v53, %v1785_v49  ;;  %v619_v58 = vmul.f32 %v1780_v48, %v485_v55  ;;  %v836_v59 = vpop.f32.mrb[9].mxu1 }
 0x10e   : > { %1101 = vst [vmem:[%s1812_s9 + $0x20] sm:$0xff] %v1069_v47  ;;  %v1039_v60 = vadd.f32 %v1007_v50, %v656_v45  ;;  %v659_v61 = vadd.f32 %v1790_v51, %v620_v52  ;;  %v970_v62 = vmul.f32 %v1785_v49, %v836_v59 }
 0x10f   : > { %v1072_v63 = vmax.f32 %v1040_v56, 0.0  ;;  %v1010_v0 = vadd.f32 %v1796_v54, %v971_v57  ;;  %v658_v1 = vadd.f32 %v1790_v51, %v619_v58  ;;  %v1359_v2 = vpop.f32.mrb[10].mxu0 }
 0x110   : > { %v1071_v3 = vmax.f32 %v1039_v60, 0.0  ;;  %v1009_v4 = vadd.f32 %v1796_v54, %v970_v62  ;;  %v622_v5 = vmul.f32 %v1359_v2, %v1780_v48  ;;  %v1439_v6 = vpop.f32.mrb[10].mxu1  ;;  %v495_v7 = vpop.f32.mrb[11].mxu0 }
 0x111   : > { %1104 = vst [vmem:[%s1812_s9 + $0x38] sm:$0xff] %v1072_v63  ;;  %v1042_v8 = vadd.f32 %v1010_v0, %v659_v61  ;;  %v973_v9 = vmul.f32 %v1439_v6, %v1785_v49  ;;  %v621_v10 = vmul.f32 %v1780_v48, %v495_v7  ;;  %v846_v11 = vpop.f32.mrb[11].mxu1 }
 0x112   : > { %1103 = vst [vmem:[%s1812_s9 + $0x30] sm:$0xff] %v1071_v3  ;;  %v1041_v12 = vadd.f32 %v1009_v4, %v658_v1  ;;  %v661_v13 = vadd.f32 %v1790_v51, %v622_v5  ;;  %v972_v14 = vmul.f32 %v1785_v49, %v846_v11 }
 0x113   : > { %v1074_v15 = vmax.f32 %v1042_v8, 0.0  ;;  %v1012_v16 = vadd.f32 %v1796_v54, %v973_v9  ;;  %v660_v17 = vadd.f32 %v1790_v51, %v621_v10  ;;  %v1362_v18 = vpop.f32.mrb[12].mxu0 }
 0x114   : > { %v1073_v19 = vmax.f32 %v1041_v12, 0.0  ;;  %v1011_v20 = vadd.f32 %v1796_v54, %v972_v14  ;;  %v624_v21 = vmul.f32 %v1362_v18, %v1780_v48  ;;  %v1442_v22 = vpop.f32.mrb[12].mxu1  ;;  %v505_v23 = vpop.f32.mrb[13].mxu0 }
 0x115   : > { %1106 = vst [vmem:[%s1812_s9 + $0x48] sm:$0xff] %v1074_v15  ;;  %v1044_v24 = vadd.f32 %v1012_v16, %v661_v13  ;;  %v975_v25 = vmul.f32 %v1442_v22, %v1785_v49  ;;  %v623_v26 = vmul.f32 %v1780_v48, %v505_v23  ;;  %v856_v27 = vpop.f32.mrb[13].mxu1 }
 0x116   : > { %1105 = vst [vmem:[%s1812_s9 + $0x40] sm:$0xff] %v1073_v19  ;;  %v1043_v28 = vadd.f32 %v1011_v20, %v660_v17  ;;  %v663_v29 = vadd.f32 %v1790_v51, %v624_v21  ;;  %v974_v30 = vmul.f32 %v1785_v49, %v856_v27 }
 0x117   : > { %v1076_v31 = vmax.f32 %v1044_v24, 0.0  ;;  %v1014_v32 = vadd.f32 %v1796_v54, %v975_v25  ;;  %v662_v33 = vadd.f32 %v1790_v51, %v623_v26  ;;  %v1365_v34 = vpop.f32.mrb[14].mxu0 }
 0x118   : > { %v1075_v35 = vmax.f32 %v1043_v28, 0.0  ;;  %v1013_v36 = vadd.f32 %v1796_v54, %v974_v30  ;;  %v626_v37 = vmul.f32 %v1365_v34, %v1780_v48  ;;  %v1445_v38 = vpop.f32.mrb[14].mxu1  ;;  %v515_v39 = vpop.f32.mrb[15].mxu0 }
 0x119   : > { %1108 = vst [vmem:[%s1812_s9 + $0x58] sm:$0xff] %v1076_v31  ;;  %v1046_v40 = vadd.f32 %v1014_v32, %v663_v29  ;;  %v977_v41 = vmul.f32 %v1445_v38, %v1785_v49  ;;  %v625_v42 = vmul.f32 %v1780_v48, %v515_v39  ;;  %v866_v43 = vpop.f32.mrb[15].mxu1 }
 0x11a   : > { %1107 = vst [vmem:[%s1812_s9 + $0x50] sm:$0xff] %v1075_v35  ;;  %v1045_v44 = vadd.f32 %v1013_v36, %v662_v33  ;;  %v665_v45 = vadd.f32 %v1790_v51, %v626_v37  ;;  %v976_v46 = vmul.f32 %v1785_v49, %v866_v43 }
 0x11b   : > { %v1078_v47 = vmax.f32 %v1046_v40, 0.0  ;;  %v1016_v50 = vadd.f32 %v1796_v54, %v977_v41  ;;  %v664_v52 = vadd.f32 %v1790_v51, %v625_v42  ;;  %v1368_v53 = vpop.f32.mrb[16].mxu0 }
 0x11c   : > { %v1077_v55 = vmax.f32 %v1045_v44, 0.0  ;;  %v1015_v56 = vadd.f32 %v1796_v54, %v976_v46  ;;  %v628_v57 = vmul.f32 %v1368_v53, %v1780_v48  ;;  %v1448_v58 = vpop.f32.mrb[16].mxu1  ;;  %v525_v59 = vpop.f32.mrb[17].mxu0 }
 0x11d   : > { %1110 = vst [vmem:[%s1812_s9 + $0x68] sm:$0xff] %v1078_v47  ;;  %v1048_v60 = vadd.f32 %v1016_v50, %v665_v45  ;;  %v979_v61 = vmul.f32 %v1448_v58, %v1785_v49  ;;  %v627_v62 = vmul.f32 %v1780_v48, %v525_v59  ;;  %v876_v63 = vpop.f32.mrb[17].mxu1 }
 0x11e   : > { %1109 = vst [vmem:[%s1812_s9 + $0x60] sm:$0xff] %v1077_v55  ;;  %v1047_v0 = vadd.f32 %v1015_v56, %v664_v52  ;;  %v667_v1 = vadd.f32 %v1790_v51, %v628_v57  ;;  %v978_v2 = vmul.f32 %v1785_v49, %v876_v63 }
 0x11f   : > { %v1080_v3 = vmax.f32 %v1048_v60, 0.0  ;;  %v1018_v4 = vadd.f32 %v1796_v54, %v979_v61  ;;  %v666_v5 = vadd.f32 %v1790_v51, %v627_v62  ;;  %v1371_v6 = vpop.f32.mrb[18].mxu0 }
 0x120   : > { %v1079_v7 = vmax.f32 %v1047_v0, 0.0  ;;  %v1017_v8 = vadd.f32 %v1796_v54, %v978_v2  ;;  %v630_v9 = vmul.f32 %v1371_v6, %v1780_v48  ;;  %v1451_v10 = vpop.f32.mrb[18].mxu1  ;;  %v535_v11 = vpop.f32.mrb[19].mxu0 }
 0x121   : > { %1112 = vst [vmem:[%s1812_s9 + $0x78] sm:$0xff] %v1080_v3  ;;  %v1050_v12 = vadd.f32 %v1018_v4, %v667_v1  ;;  %v981_v13 = vmul.f32 %v1451_v10, %v1785_v49  ;;  %v629_v14 = vmul.f32 %v1780_v48, %v535_v11  ;;  %v886_v15 = vpop.f32.mrb[19].mxu1 }
 0x122   : > { %1111 = vst [vmem:[%s1812_s9 + $0x70] sm:$0xff] %v1079_v7  ;;  %v1049_v16 = vadd.f32 %v1017_v8, %v666_v5  ;;  %v669_v17 = vadd.f32 %v1790_v51, %v630_v9  ;;  %v980_v18 = vmul.f32 %v1785_v49, %v886_v15 }
 0x123   : > { %v1082_v19 = vmax.f32 %v1050_v12, 0.0  ;;  %v1020_v20 = vadd.f32 %v1796_v54, %v981_v13  ;;  %v668_v21 = vadd.f32 %v1790_v51, %v629_v14  ;;  %v1374_v22 = vpop.f32.mrb[20].mxu0 }
 0x124   : > { %v1081_v23 = vmax.f32 %v1049_v16, 0.0  ;;  %v1019_v24 = vadd.f32 %v1796_v54, %v980_v18  ;;  %v632_v25 = vmul.f32 %v1374_v22, %v1780_v48  ;;  %v1454_v26 = vpop.f32.mrb[20].mxu1  ;;  %v545_v27 = vpop.f32.mrb[21].mxu0 }
 0x125   : > { %1114 = vst [vmem:[%s1812_s9 + $0x88] sm:$0xff] %v1082_v19  ;;  %v1052_v28 = vadd.f32 %v1020_v20, %v669_v17  ;;  %v983_v29 = vmul.f32 %v1454_v26, %v1785_v49  ;;  %v631_v30 = vmul.f32 %v1780_v48, %v545_v27  ;;  %v896_v31 = vpop.f32.mrb[21].mxu1 }
 0x126   : > { %1113 = vst [vmem:[%s1812_s9 + $0x80] sm:$0xff] %v1081_v23  ;;  %v1051_v32 = vadd.f32 %v1019_v24, %v668_v21  ;;  %v671_v33 = vadd.f32 %v1790_v51, %v632_v25  ;;  %v982_v34 = vmul.f32 %v1785_v49, %v896_v31 }
 0x127   : > { %v1084_v35 = vmax.f32 %v1052_v28, 0.0  ;;  %v1022_v36 = vadd.f32 %v1796_v54, %v983_v29  ;;  %v670_v37 = vadd.f32 %v1790_v51, %v631_v30  ;;  %v1377_v38 = vpop.f32.mrb[22].mxu0 }
 0x128   : > { %v1083_v39 = vmax.f32 %v1051_v32, 0.0  ;;  %v1021_v40 = vadd.f32 %v1796_v54, %v982_v34  ;;  %v634_v41 = vmul.f32 %v1377_v38, %v1780_v48  ;;  %v1457_v42 = vpop.f32.mrb[22].mxu1  ;;  %v555_v43 = vpop.f32.mrb[23].mxu0 }
 0x129   : > { %1116 = vst [vmem:[%s1812_s9 + $0x98] sm:$0xff] %v1084_v35  ;;  %v1054_v44 = vadd.f32 %v1022_v36, %v671_v33  ;;  %v985_v45 = vmul.f32 %v1457_v42, %v1785_v49  ;;  %v633_v46 = vmul.f32 %v1780_v48, %v555_v43  ;;  %v906_v47 = vpop.f32.mrb[23].mxu1 }
 0x12a   : > { %1115 = vst [vmem:[%s1812_s9 + $0x90] sm:$0xff] %v1083_v39  ;;  %v1053_v50 = vadd.f32 %v1021_v40, %v670_v37  ;;  %v673_v52 = vadd.f32 %v1790_v51, %v634_v41  ;;  %v984_v53 = vmul.f32 %v1785_v49, %v906_v47 }
 0x12b   : > { %v1086_v55 = vmax.f32 %v1054_v44, 0.0  ;;  %v1024_v56 = vadd.f32 %v1796_v54, %v985_v45  ;;  %v672_v57 = vadd.f32 %v1790_v51, %v633_v46  ;;  %v1380_v58 = vpop.f32.mrb[24].mxu0 }
 0x12c   : > { %v1085_v59 = vmax.f32 %v1053_v50, 0.0  ;;  %v1023_v60 = vadd.f32 %v1796_v54, %v984_v53  ;;  %v636_v61 = vmul.f32 %v1380_v58, %v1780_v48  ;;  %v1460_v62 = vpop.f32.mrb[24].mxu1  ;;  %v565_v63 = vpop.f32.mrb[25].mxu0 }
 0x12d   : > { %1118 = vst [vmem:[%s1812_s9 + $0xa8] sm:$0xff] %v1086_v55  ;;  %v1056_v0 = vadd.f32 %v1024_v56, %v673_v52  ;;  %v987_v1 = vmul.f32 %v1460_v62, %v1785_v49  ;;  %v635_v2 = vmul.f32 %v1780_v48, %v565_v63  ;;  %v916_v3 = vpop.f32.mrb[25].mxu1 }
 0x12e   : > { %1117 = vst [vmem:[%s1812_s9 + $0xa0] sm:$0xff] %v1085_v59  ;;  %v1055_v4 = vadd.f32 %v1023_v60, %v672_v57  ;;  %v675_v5 = vadd.f32 %v1790_v51, %v636_v61  ;;  %v986_v6 = vmul.f32 %v1785_v49, %v916_v3 }
 0x12f   : > { %v1088_v7 = vmax.f32 %v1056_v0, 0.0  ;;  %v1026_v8 = vadd.f32 %v1796_v54, %v987_v1  ;;  %v674_v9 = vadd.f32 %v1790_v51, %v635_v2  ;;  %v1383_v10 = vpop.f32.mrb[26].mxu0 }
 0x130   : > { %v1087_v11 = vmax.f32 %v1055_v4, 0.0  ;;  %v1025_v12 = vadd.f32 %v1796_v54, %v986_v6  ;;  %v638_v13 = vmul.f32 %v1383_v10, %v1780_v48  ;;  %v1463_v14 = vpop.f32.mrb[26].mxu1  ;;  %v575_v15 = vpop.f32.mrb[27].mxu0 }
 0x131   : > { %1120 = vst [vmem:[%s1812_s9 + $0xb8] sm:$0xff] %v1088_v7  ;;  %v1058_v16 = vadd.f32 %v1026_v8, %v675_v5  ;;  %v989_v17 = vmul.f32 %v1463_v14, %v1785_v49  ;;  %v637_v18 = vmul.f32 %v1780_v48, %v575_v15  ;;  %v926_v19 = vpop.f32.mrb[27].mxu1 }
 0x132   : > { %1119 = vst [vmem:[%s1812_s9 + $0xb0] sm:$0xff] %v1087_v11  ;;  %v1057_v20 = vadd.f32 %v1025_v12, %v674_v9  ;;  %v677_v21 = vadd.f32 %v1790_v51, %v638_v13  ;;  %v988_v22 = vmul.f32 %v1785_v49, %v926_v19 }
 0x133   : > { %v1090_v23 = vmax.f32 %v1058_v16, 0.0  ;;  %v1028_v24 = vadd.f32 %v1796_v54, %v989_v17  ;;  %v676_v25 = vadd.f32 %v1790_v51, %v637_v18  ;;  %v1386_v26 = vpop.f32.mrb[28].mxu0 }
 0x134   : > { %v1089_v27 = vmax.f32 %v1057_v20, 0.0  ;;  %v1027_v28 = vadd.f32 %v1796_v54, %v988_v22  ;;  %v640_v29 = vmul.f32 %v1386_v26, %v1780_v48  ;;  %v1466_v30 = vpop.f32.mrb[28].mxu1  ;;  %v585_v31 = vpop.f32.mrb[29].mxu0 }
 0x135   : > { %1122 = vst [vmem:[%s1812_s9 + $0xc8] sm:$0xff] %v1090_v23  ;;  %v1060_v32 = vadd.f32 %v1028_v24, %v677_v21  ;;  %v991_v33 = vmul.f32 %v1466_v30, %v1785_v49  ;;  %v639_v34 = vmul.f32 %v1780_v48, %v585_v31  ;;  %v936_v35 = vpop.f32.mrb[29].mxu1 }
 0x136   : > { %1121 = vst [vmem:[%s1812_s9 + $0xc0] sm:$0xff] %v1089_v27  ;;  %v1059_v36 = vadd.f32 %v1027_v28, %v676_v25  ;;  %v679_v37 = vadd.f32 %v1790_v51, %v640_v29  ;;  %v990_v38 = vmul.f32 %v1785_v49, %v936_v35 }
 0x137   : > { %v1092_v39 = vmax.f32 %v1060_v32, 0.0  ;;  %v1030_v40 = vadd.f32 %v1796_v54, %v991_v33  ;;  %v678_v41 = vadd.f32 %v1790_v51, %v639_v34  ;;  %v1389_v42 = vpop.f32.mrb[30].mxu0 }
 0x138   : > { %v1091_v43 = vmax.f32 %v1059_v36, 0.0  ;;  %v1029_v44 = vadd.f32 %v1796_v54, %v990_v38  ;;  %v642_v45 = vmul.f32 %v1389_v42, %v1780_v48  ;;  %v1469_v46 = vpop.f32.mrb[30].mxu1  ;;  %v595_v47 = vpop.f32.mrb[31].mxu0 }
 0x139   : > { %1124 = vst [vmem:[%s1812_s9 + $0xd8] sm:$0xff] %v1092_v39  ;;  %v1062_v50 = vadd.f32 %v1030_v40, %v679_v37  ;;  %v993_v52 = vmul.f32 %v1469_v46, %v1785_v49  ;;  %v641_v53 = vmul.f32 %v1780_v48, %v595_v47  ;;  %v946_v55 = vpop.f32.mrb[31].mxu1 }
 0x13a   : > { %1123 = vst [vmem:[%s1812_s9 + $0xd0] sm:$0xff] %v1091_v43  ;;  %v1061_v56 = vadd.f32 %v1029_v44, %v678_v41  ;;  %v681_v57 = vadd.f32 %v1790_v51, %v642_v45  ;;  %v992_v58 = vmul.f32 %v1785_v49, %v946_v55 }
 0x13b   : > { %v1094_v59 = vmax.f32 %v1062_v50, 0.0  ;;  %v1032_v60 = vadd.f32 %v1796_v54, %v993_v52  ;;  %v680_v61 = vadd.f32 %v1790_v51, %v641_v53 }
 0x13c   : > { %v1093_v62 = vmax.f32 %v1061_v56, 0.0  ;;  %v1031_v63 = vadd.f32 %v1796_v54, %v992_v58 }
 0x13d   : > { %1126 = vst [vmem:[%s1812_s9 + $0xe8] sm:$0xff] %v1094_v59  ;;  %v1064_v0 = vadd.f32 %v1032_v60, %v681_v57 }
 0x13e   : > { %1125 = vst [vmem:[%s1812_s9 + $0xe0] sm:$0xff] %v1093_v62  ;;  %v1063_v48 = vadd.f32 %v1031_v63, %v680_v61 }
 0x13f   : > { %v1096_v1 = vmax.f32 %v1064_v0, 0.0 }
 0x140   : > { %v1095_v2 = vmax.f32 %v1063_v48, 0.0 }
 0x141   : > { %1128 = vst [vmem:[%s1812_s9 + $0xf8] sm:$0xff] %v1096_v1 }
 0x142   : > { %1127 = vst [vmem:[%s1812_s9 + $0xf0] sm:$0xff] %v1095_v2 }
 0x143 PF: > { %s18_s27 = sadd.s32 1, %s1548_s27  }
 0x144   : > { %p15_p4 = scmp.ge.s32.totalorder %s18_s27, 4  }
 0x146   :  { %17 = sbr.rel (!%p15_p4) target bundleno = 1 (0x1), region = 85 }

// kernel: bottleneck_forward.4
= control target key start
LH: loop header
LB: loop body
LE: loop exit
PB: predicated region body
PF: predicated region fallthrough
CT: control target
= control target key end

     0   :  { %s5173_s15 = smov 0   ;;  %s6340_s0 = inlined_call_operand.vmem [shape: f32[2,18,18,128], index: 0, kind: input, shape index: {}]   ;;  %s6341_s1 = inlined_call_operand.vmem [shape: f32[9,128,128], index: 1, kind: input, shape index: {}]   ;;  %s6342_s2 = inlined_call_operand.vmem [shape: f32[1,128], index: 2, kind: input, shape index: {}]   ;;  %s6343_s3 = inlined_call_operand.vmem [shape: f32[1,128], index: 3, kind: input, shape index: {}]   ;;  %s6344_s4 = inlined_call_operand.vmem [shape: f32[2,16,16,128], index: 4, kind: output, shape index: {}]  }
   0x1 LB: > { %s3086_s16 = sadd.s32 4294967295, %s5146_s15   ;;  %p3090_p0 = scmp.ge.s32.totalorder %s5146_s15, 1  ;;  %s5146_s15 = sphi %s5173_s15, %s14_s15  }
   0x2   : > { %p162_p1 = scmp.lt.s32.totalorder %s5146_s15, 3 }
   0x4   : > { %p163_p2 = pnand %p3090_p0, %p162_p1 }
   0x6   : > { %166 = sbr.rel (%p163_p2) target bundleno = 555 (0x22b), region = 36 }
   0xd   : > { %v3094_v0 = vld [vmem:[%s6341_s1 + $0x80] sm:$0xff]  ;;  %v3095_v1 = vld [vmem:[%s6341_s1 + $0x88] sm:$0xff]  ;;  %p188_p3 = scmp.lt.s32.totalorder %s3086_s16, 1  ;;  %v3096_v5 = vld [vmem:[%s6341_s1 + $0x90] sm:$0xff] }
   0xe   : > { %v3206_v2 = vld [vmem:[%s6341_s1 + $0x200] sm:$0xff]  ;;  %v4571_v3 = vpack.c.bf16 %v3095_v1, %v3094_v0  ;;  %v3207_v4 = vld [vmem:[%s6341_s1 + $0x208] sm:$0xff]  ;;  %v3097_v6 = vld [vmem:[%s6341_s1 + $0x98] sm:$0xff] }
   0xf   : > { %v5199_v7 = vpack.c.bf16 %v3207_v4, %v3206_v2  ;;  %v4575_v8 = vpack.c.bf16 %v3097_v6, %v3096_v5  ;;  %v3208_v9 = vld [vmem:[%s6341_s1 + $0x210] sm:$0xff]  ;;  %v3209_v10 = vld [vmem:[%s6341_s1 + $0x218] sm:$0xff]  ;;  %v3098_v11 = vld [vmem:[%s6341_s1 + $0xa0] sm:$0xff]  ;;  %s6446_s16 = smov (!%p188_p3, %s3086_s16), 1 }
  0x10   : > { %4572 = vmatprep.subr.bf16.mxu1 %v4571_v3  ;;  %v5212_v12 = vpack.c.bf16 %v3209_v10, %v3208_v9  ;;  %v3099_v13 = vld [vmem:[%s6341_s1 + $0xa8] sm:$0xff]  ;;  %v3210_v14 = vld [vmem:[%s6341_s1 + $0x220] sm:$0xff]  ;;  %s5131_s17 = smul.u32 432, %s6446_s16  ;;  %v3100_v18 = vld [vmem:[%s6341_s1 + $0xb0] sm:$0xff]  ;;  %s3418_s9 = sshll.u32 %s6446_s16, 8 }
  0x11   : > { %v3211_v15 = vld [vmem:[%s6341_s1 + $0x228] sm:$0xff]  ;;  %4700 = vmatprep.subr.bf16.mxu0 %v5199_v7  ;;  %4574 = vmatpush3.bf16.msra.mxu1 %v4571_v3  ;;  %v4579_v16 = vpack.c.bf16 %v3099_v13, %v3098_v11  ;;  %v3101_v19 = vld [vmem:[%s6341_s1 + $0xb8] sm:$0xff]  ;;  %v3212_v20 = vld [vmem:[%s6341_s1 + $0x230] sm:$0xff]  ;;  %s6236_s12 = scalar_lea.vmem %s6344_s4, %s3418_s9 }
  0x12   : > { %6383 = vst [vmem:[#allocation2_spill] sm:$0xff] %v5212_v12  ;;  %4702 = vmatpush3.bf16.msra.mxu0 %v5199_v7  ;;  %4576 = vmatprep.subr.bf16.mxu1 %v4575_v8  ;;  %v5227_v17 = vpack.c.bf16 %v3211_v15, %v3210_v14  ;;  %v3213_v21 = vld [vmem:[%s6341_s1 + $0x238] sm:$0xff]  ;;  %s5244_s28 = scalar_lea.vmem %s6340_s0, %s5131_s17  ;;  %v4583_v22 = vpack.c.bf16 %v3101_v19, %v3100_v18  ;;  %v3102_v24 = vld [vmem:[%s6341_s1 + $0xc0] sm:$0xff]  ;;  %v3103_v25 = vld [vmem:[%s6341_s1 + $0xc8] sm:$0xff] }
  0x13   : > { %4704 = vmatprep.subr.bf16.mxu0 %v5212_v12  ;;  %v5248_v23 = vpack.c.bf16 %v3213_v21, %v3212_v20  ;;  %v246_v26 = vld [vmem:[%s5244_s28 + $0x1] sm:$0xff]  ;;  %v5264_v29 = vld [vmem:[%s5244_s28 + $0x19] sm:$0xff]  ;;  %v4587_v30 = vpack.c.bf16 %v3103_v25, %v3102_v24  ;;  %v3104_v32 = vld [vmem:[%s6341_s1 + $0xd0] sm:$0xff] }
  0x14   : > { %6384 = vst [vmem:[#allocation3_spill] sm:$0xff] %v5227_v17  ;;  %v3214_v27 = vld [vmem:[%s6341_s1 + $0x240] sm:$0xff]  ;;  %v3215_v28 = vld [vmem:[%s6341_s1 + $0x248] sm:$0xff]  ;;  %3883 = vmatprep.mubr.f32.mxu1 %v246_v26  ;;  %4203 = vmatprep.mubr.f32.mxu0 %v5264_v29  ;;  %v3105_v33 = vld [vmem:[%s6341_s1 + $0xd8] sm:$0xff] }
  0x15   : > { %4578 = vmatpush3.bf16.msra.mxu1 %v4575_v8  ;;  %6385 = vst [vmem:[#allocation4_spill] sm:$0xff] %v5248_v23  ;;  %v5269_v31 = vpack.c.bf16 %v3215_v28, %v3214_v27  ;;  %v3216_v34 = vld [vmem:[%s6341_s1 + $0x250] sm:$0xff]  ;;  %v3217_v35 = vld [vmem:[%s6341_s1 + $0x258] sm:$0xff]  ;;  %v4591_v36 = vpack.c.bf16 %v3105_v33, %v3104_v32  ;;  %v3106_v38 = vld [vmem:[%s6341_s1 + $0xe0] sm:$0xff] }
  0x16   : > { %4706 = vmatpush3.bf16.msra.mxu0 %v5212_v12  ;;  %4580 = vmatprep.subr.bf16.mxu1 %v4579_v16  ;;  %v5285_v37 = vpack.c.bf16 %v3217_v35, %v3216_v34  ;;  %v3107_v39 = vld [vmem:[%s6341_s1 + $0xe8] sm:$0xff]  ;;  %v3218_v40 = vld [vmem:[%s6341_s1 + $0x260] sm:$0xff]  ;;  %v3108_v44 = vld [vmem:[%s6341_s1 + $0xf0] sm:$0xff] }
  0x17   : > { %4708 = vmatprep.subr.bf16.mxu0 %v5227_v17  ;;  %6386 = vst [vmem:[#allocation5_spill] sm:$0xff] %v5269_v31  ;;  %v3219_v41 = vld [vmem:[%s6341_s1 + $0x268] sm:$0xff]  ;;  %v4595_v42 = vpack.c.bf16 %v3107_v39, %v3106_v38  ;;  %v3109_v45 = vld [vmem:[%s6341_s1 + $0xf8] sm:$0xff]  ;;  %v3220_v46 = vld [vmem:[%s6341_s1 + $0x270] sm:$0xff] }
  0x18   : > { %6387 = vst [vmem:[#allocation6_spill] sm:$0xff] %v5285_v37  ;;  %v5301_v43 = vpack.c.bf16 %v3219_v41, %v3218_v40  ;;  %v3221_v47 = vld [vmem:[%s6341_s1 + $0x278] sm:$0xff]  ;;  %v4599_v48 = vpack.c.bf16 %v3109_v45, %v3108_v44  ;;  %v230_v50 = vld [vmem:[%s6341_s1] sm:$0xff]  ;;  %v231_v51 = vld [vmem:[%s6341_s1 + $0x8] sm:$0xff] }
  0x19   : > { %4582 = vmatpush3.bf16.msra.mxu1 %v4579_v16  ;;  %v5317_v49 = vpack.c.bf16 %v3221_v47, %v3220_v46  ;;  %v3254_v52 = vld [vmem:[%s6341_s1 + $0x280] sm:$0xff]  ;;  %v3255_v53 = vld [vmem:[%s6341_s1 + $0x288] sm:$0xff]  ;;  %v4603_v54 = vpack.c.bf16 %v231_v51, %v230_v50  ;;  %v3256_v56 = vld [vmem:[%s6341_s1 + $0x290] sm:$0xff] }
  0x1a   : > { %4710 = vmatpush3.bf16.msra.mxu0 %v5227_v17  ;;  %4584 = vmatprep.subr.bf16.mxu1 %v4583_v22  ;;  %6388 = vst [vmem:[#allocation7_spill] sm:$0xff] %v5301_v43  ;;  %v4731_v55 = vpack.c.bf16 %v3255_v53, %v3254_v52  ;;  %v3257_v57 = vld [vmem:[%s6341_s1 + $0x298] sm:$0xff]  ;;  %v247_v58 = vld [vmem:[%s5244_s28 + $0x9] sm:$0xff]  ;;  %v3175_v61 = vld [vmem:[%s5244_s28 + $0x21] sm:$0xff] }
  0x1b   : > { %4712 = vmatprep.subr.bf16.mxu0 %v5248_v23  ;;  %6389 = vst [vmem:[#allocation8_spill] sm:$0xff] %v5317_v49  ;;  %v232_v59 = vld [vmem:[%s6341_s1 + $0x10] sm:$0xff]  ;;  %v233_v60 = vld [vmem:[%s6341_s1 + $0x18] sm:$0xff]  ;;  %v4735_v62 = vpack.c.bf16 %v3257_v57, %v3256_v56  ;;  %v3258_v1 = vld [vmem:[%s6341_s1 + $0x2a0] sm:$0xff] }
  0x1c   : > { %v3176_v63 = vld [vmem:[%s5244_s28 + $0x31] sm:$0xff]  ;;  %v4607_v0 = vpack.c.bf16 %v233_v60, %v232_v59  ;;  %v3259_v2 = vld [vmem:[%s6341_s1 + $0x2a8] sm:$0xff]  ;;  %v234_v3 = vld [vmem:[%s6341_s1 + $0x20] sm:$0xff] }
  0x1d   : > { %4586 = vmatpush3.bf16.msra.mxu1 %v4583_v22  ;;  %v235_v4 = vld [vmem:[%s6341_s1 + $0x28] sm:$0xff]  ;;  %v3177_v5 = vld [vmem:[%s5244_s28 + $0x39] sm:$0xff]  ;;  %v4739_v8 = vpack.c.bf16 %v3259_v2, %v3258_v1  ;;  %v3260_v9 = vld [vmem:[%s6341_s1 + $0x2b0] sm:$0xff] }
  0x1e   : > { %4714 = vmatpush3.bf16.msra.mxu0 %v5248_v23  ;;  %4588 = vmatprep.subr.bf16.mxu1 %v4587_v30  ;;  %v3178_v6 = vld [vmem:[%s5244_s28 + $0x49] sm:$0xff]  ;;  %v3261_v10 = vld [vmem:[%s6341_s1 + $0x2b8] sm:$0xff]  ;;  %v4611_v11 = vpack.c.bf16 %v235_v4, %v234_v3  ;;  %v3180_v16 = vld [vmem:[%s5244_s28 + $0x61] sm:$0xff] }
  0x1f   : > { %4716 = vmatprep.subr.bf16.mxu0 %v5269_v31  ;;  %v236_v13 = vld [vmem:[%s6341_s1 + $0x30] sm:$0xff]  ;;  %v237_v14 = vld [vmem:[%s6341_s1 + $0x38] sm:$0xff]  ;;  %v4743_v18 = vpack.c.bf16 %v3261_v10, %v3260_v9  ;;  %v3262_v19 = vld [vmem:[%s6341_s1 + $0x2c0] sm:$0xff] }
  0x20   : > { %v3179_v15 = vld [vmem:[%s5244_s28 + $0x51] sm:$0xff]  ;;  %v3263_v20 = vld [vmem:[%s6341_s1 + $0x2c8] sm:$0xff]  ;;  %v4615_v21 = vpack.c.bf16 %v237_v14, %v236_v13  ;;  %v238_v22 = vld [vmem:[%s6341_s1 + $0x40] sm:$0xff] }
  0x21   : > { %4590 = vmatpush3.bf16.msra.mxu1 %v4587_v30  ;;  %v239_v24 = vld [vmem:[%s6341_s1 + $0x48] sm:$0xff]  ;;  %v3182_v26 = vld [vmem:[%s5244_s28 + $0x79] sm:$0xff]  ;;  %v4747_v27 = vpack.c.bf16 %v3263_v20, %v3262_v19  ;;  %v3264_v28 = vld [vmem:[%s6341_s1 + $0x2d0] sm:$0xff] }
  0x22   : > { %4718 = vmatpush3.bf16.msra.mxu0 %v5269_v31  ;;  %4592 = vmatprep.subr.bf16.mxu1 %v4591_v36  ;;  %v3181_v25 = vld [vmem:[%s5244_s28 + $0x69] sm:$0xff]  ;;  %v4619_v30 = vpack.c.bf16 %v239_v24, %v238_v22  ;;  %v241_v33 = vld [vmem:[%s6341_s1 + $0x58] sm:$0xff]  ;;  %v3183_v34 = vld [vmem:[%s5244_s28 + $0x81] sm:$0xff] }
  0x23   : > { %4720 = vmatprep.subr.bf16.mxu0 %v5285_v37  ;;  %v240_v32 = vld [vmem:[%s6341_s1 + $0x50] sm:$0xff]  ;;  %v3266_v38 = vld [vmem:[%s6341_s1 + $0x2e0] sm:$0xff]  ;;  %v3267_v39 = vld [vmem:[%s6341_s1 + $0x2e8] sm:$0xff] }
  0x24   : > { %v5406_v35 = vld [vmem:[%s5244_s28 + $0x91] sm:$0xff]  ;;  %v4623_v40 = vpack.c.bf16 %v241_v33, %v240_v32  ;;  %v242_v41 = vld [vmem:[%s6341_s1 + $0x60] sm:$0xff]  ;;  %v3186_v45 = vld [vmem:[%s5244_s28 + $0xa9] sm:$0xff]  ;;  %v4755_v46 = vpack.c.bf16 %v3267_v39, %v3266_v38 }
  0x25   : > { %4594 = vmatpush3.bf16.msra.mxu1 %v4591_v36  ;;  %v3185_v44 = vld [vmem:[%s5244_s28 + $0x99] sm:$0xff]  ;;  %v3268_v47 = vld [vmem:[%s6341_s1 + $0x2f0] sm:$0xff]  ;;  %v3303_v57 = vld [vmem:[%s6341_s1 + $0x308] sm:$0xff] }
  0x26   : > { %4722 = vmatpush3.bf16.msra.mxu0 %v5285_v37  ;;  %4596 = vmatprep.subr.bf16.mxu1 %v4595_v42  ;;  %v244_v51 = vld [vmem:[%s6341_s1 + $0x70] sm:$0xff]  ;;  %v245_v52 = vld [vmem:[%s6341_s1 + $0x78] sm:$0xff]  ;;  %v3302_v56 = vld [vmem:[%s6341_s1 + $0x300] sm:$0xff] }
  0x27   : > { %4724 = vmatprep.subr.bf16.mxu0 %v5301_v43  ;;  %v3187_v53 = vld [vmem:[%s5244_s28 + $0xb1] sm:$0xff]  ;;  %v3110_v59 = vld [vmem:[%s6341_s1 + $0x100] sm:$0xff]  ;;  %v3111_v60 = vld [vmem:[%s6341_s1 + $0x108] sm:$0xff] }
  0x28   : > { %v3305_v1 = vld [vmem:[%s6341_s1 + $0x318] sm:$0xff]  ;;  %v5465_v2 = vpack.c.bf16 %v3111_v60, %v3110_v59  ;;  %v5471_v3 = vld [vmem:[%s5244_s28 + $0x22] sm:$0xff]  ;;  %v5500_v14 = vld [vmem:[%s5244_s28 + $0x4a] sm:$0xff] }
  0x29   : > { %4598 = vmatpush3.bf16.msra.mxu1 %v4595_v42  ;;  %v243_v42 = vld [vmem:[%s6341_s1 + $0x68] sm:$0xff]  ;;  %v5474_v4 = vld [vmem:[%s5244_s28 + $0xd9] sm:$0xff]  ;;  %v5497_v13 = vld [vmem:[%s5244_s28 + $0xf1] sm:$0xff] }
  0x2a   : > { %4726 = vmatpush3.bf16.msra.mxu0 %v5301_v43  ;;  %4600 = vmatprep.subr.bf16.mxu1 %v4599_v48  ;;  %v4627_v50 = vpack.c.bf16 %v243_v42, %v242_v41  ;;  %v3307_v9 = vld [vmem:[%s6341_s1 + $0x328] sm:$0xff]  ;;  %v5512_v19 = vld [vmem:[%s5244_s28 + $0xf9] sm:$0xff]  ;;  %v3312_v33 = vld [vmem:[%s6341_s1 + $0x350] sm:$0xff] }
  0x2b   : > { %4728 = vmatprep.subr.bf16.mxu0 %v5317_v49  ;;  %v5490_v10 = vld [vmem:[%s5244_s28 + $0xe1] sm:$0xff]  ;;  %v5516_v20 = vld [vmem:[%s5244_s28 + $0x52] sm:$0xff] }
  0x2c   : > { %v5522_v22 = vld [vmem:[%s5244_s28 + $0x62] sm:$0xff]  ;;  %v5563_v39 = vld [vmem:[%s5244_s28 + $0x139] sm:$0xff] }
  0x2d   : > { %4602 = vmatpush3.bf16.msra.mxu1 %v4599_v48  ;;  %v3269_v48 = vld [vmem:[%s6341_s1 + $0x2f8] sm:$0xff]  ;;  %v5560_v38 = vld [vmem:[%s5244_s28 + $0x82] sm:$0xff]  ;;  %6394 = vst [vmem:[#allocation13_spill] sm:$0xff] %v5563_v39 }
  0x2e   : > { %4730 = vmatpush3.bf16.msra.mxu0 %v5317_v49  ;;  %4604 = vmatprep.subr.bf16.mxu1 %v4603_v54  ;;  %v3314_v42 = vld [vmem:[%s6341_s1 + $0x360] sm:$0xff]  ;;  %v3351_v60 = vld [vmem:[%s6341_s1 + $0x388] sm:$0xff]  ;;  %v3121_v49 = vld [vmem:[%s6341_s1 + $0x158] sm:$0xff] }
  0x2f   : > { %4732 = vmatprep.subr.bf16.mxu0 %v4731_v55  ;;  %v3350_v59 = vld [vmem:[%s6341_s1 + $0x380] sm:$0xff]  ;;  %v5740_v43 = vld [vmem:[%s5244_s28 + $0x152] sm:$0xff]  ;;  %v3159_v17 = vld [vmem:[%s6341_s1 + $0x188] sm:$0xff] }
  0x30   : > { %3884 = vmatmul.mubr.f32.vlgmr.msra.gmra.mrb[0].mxu1 %v247_v58  ;;  %v4631_v58 = vpack.c.bf16 %v245_v52, %v244_v51  ;;  %v3316_v51 = vld [vmem:[%s6341_s1 + $0x370] sm:$0xff]  ;;  %v3317_v52 = vld [vmem:[%s6341_s1 + $0x378] sm:$0xff]  ;;  %v3122_v37 = vld [vmem:[%s6341_s1 + $0x160] sm:$0xff] }
  0x31   : > { %4204 = vmatmul.mubr.f32.vlgmr.msra.gmra.mrb[0].mxu0 %v3175_v61  ;;  %4606 = vmatpush3.bf16.msra.mxu1 %v4603_v54  ;;  %v5438_v54 = vld [vmem:[%s5244_s28 + $0xc1] sm:$0xff]  ;;  %v3353_v12 = vld [vmem:[%s6341_s1 + $0x398] sm:$0xff] }
  0x32   : > { %4734 = vmatpush3.bf16.msra.mxu0 %v4731_v55  ;;  %3886 = vmatprep.mubr.f32.mxu1 %v5264_v29  ;;  %v3265_v29 = vld [vmem:[%s6341_s1 + $0x2d8] sm:$0xff]  ;;  %v4759_v55 = vpack.c.bf16 %v3269_v48, %v3268_v47  ;;  %v5588_v48 = vld [vmem:[%s5244_s28 + $0xaa] sm:$0xff]  ;;  %v3252_v23 = vld [vmem:[%s5244_s28 + $0x182] sm:$0xff] }
  0x33   : > { %4206 = vmatprep.mubr.f32.mxu0 %v3176_v63  ;;  %4736 = vmatprep.subr.bf16.mxu0 %v4735_v62  ;;  %v4751_v36 = vpack.c.bf16 %v3265_v29, %v3264_v28  ;;  %v5538_v28 = vld [vmem:[%s5244_s28 + $0x6a] sm:$0xff]  ;;  %v5541_v29 = vld [vmem:[%s5244_s28 + $0x121] sm:$0xff] }
  0x34   : > { %3887 = vmatmul.mubr.f32.gmra.mrb[2].mxu1 %v3175_v61  ;;  %4608 = vmatprep.subr.bf16.mxu1 %v4607_v0  ;;  %v5454_v61 = vld [vmem:[%s5244_s28 + $0xc9] sm:$0xff]  ;;  %6392 = vst [vmem:[#allocation11_spill] sm:$0xff] %v5541_v29  ;;  %v5585_v47 = vld [vmem:[%s5244_s28 + $0x151] sm:$0xff] }
  0x35   : > { %4207 = vmatmul.mubr.f32.gmra.mrb[2].mxu0 %v3177_v5  ;;  %3889 = vmatprep.mubr.f32.mxu1 %v3176_v63  ;;  %v4763_v63 = vpack.c.bf16 %v3303_v57, %v3302_v56  ;;  %6396 = vst [vmem:[#allocation15_spill] sm:$0xff] %v5585_v47  ;;  %v5607_v56 = vld [vmem:[%s5244_s28 + $0x169] sm:$0xff] }
  0x36   : > { %4738 = vmatpush3.bf16.msra.mxu0 %v4735_v62  ;;  %4209 = vmatprep.mubr.f32.mxu0 %v3178_v6  ;;  %v5457_v62 = vld [vmem:[%s5244_s28 + $0x1a] sm:$0xff]  ;;  %6398 = vst [vmem:[#allocation17_spill] sm:$0xff] %v5607_v56  ;;  %v5610_v57 = vld [vmem:[%s5244_s28 + $0xc2] sm:$0xff] }
  0x37   : > { %4740 = vmatprep.subr.bf16.mxu0 %v4739_v8  ;;  %4610 = vmatpush3.bf16.msra.mxu1 %v4607_v0  ;;  %v3304_v0 = vld [vmem:[%s6341_s1 + $0x310] sm:$0xff] }
  0x38   : > { %3890 = vmatmul.mubr.f32.gmra.mrb[4].mxu1 %v3177_v5  ;;  %4612 = vmatprep.subr.bf16.mxu1 %v4611_v11  ;;  %v5477_v5 = vld [vmem:[%s5244_s28 + $0x32] sm:$0xff] }
  0x39   : > { %4210 = vmatmul.mubr.f32.gmra.mrb[4].mxu0 %v3179_v15  ;;  %3892 = vmatprep.mubr.f32.mxu1 %v3178_v6  ;;  %v4767_v6 = vpack.c.bf16 %v3305_v1, %v3304_v0  ;;  %v5626_v0 = vld [vmem:[%s5244_s28 + $0xca] sm:$0xff]  ;;  %v198_v1 = vld [vmem:[%s5244_s28] sm:$0xff] }
  0x3a   : > { %4742 = vmatpush3.bf16.msra.mxu0 %v4739_v8  ;;  %4212 = vmatprep.mubr.f32.mxu0 %v3180_v16  ;;  %v3306_v8 = vld [vmem:[%s6341_s1 + $0x320] sm:$0xff] }
  0x3b   : > { %4744 = vmatprep.subr.bf16.mxu0 %v4743_v18  ;;  %4614 = vmatpush3.bf16.msra.mxu1 %v4611_v11  ;;  %v5494_v11 = vld [vmem:[%s5244_s28 + $0x3a] sm:$0xff] }
  0x3c   : > { %3893 = vmatmul.mubr.f32.gmra.mrb[6].mxu1 %v3179_v15  ;;  %4616 = vmatprep.subr.bf16.mxu1 %v4615_v21  ;;  %v4771_v15 = vpack.c.bf16 %v3307_v9, %v3306_v8  ;;  %v5632_v8 = vpack.c.bf16 %v3351_v60, %v3350_v59  ;;  %v3112_v9 = vld [vmem:[%s6341_s1 + $0x110] sm:$0xff]  ;;  %v5693_v59 = vld [vmem:[%s5244_s28 + $0x48] sm:$0xff] }
  0x3d   : > { %4213 = vmatmul.mubr.f32.gmra.mrb[6].mxu0 %v3181_v25  ;;  %3895 = vmatprep.mubr.f32.mxu1 %v3180_v16  ;;  %v3308_v16 = vld [vmem:[%s6341_s1 + $0x330] sm:$0xff]  ;;  %6402 = vst [vmem:[#allocation21_spill] sm:$0xff] %v5693_v59  ;;  %v5696_v60 = vld [vmem:[%s5244_s28 + $0x122] sm:$0xff] }
  0x3e   : > { %4746 = vmatpush3.bf16.msra.mxu0 %v4743_v18  ;;  %4215 = vmatprep.mubr.f32.mxu0 %v3182_v26  ;;  %v3309_v18 = vld [vmem:[%s6341_s1 + $0x338] sm:$0xff] }
  0x3f   : > { %4748 = vmatprep.subr.bf16.mxu0 %v4747_v27  ;;  %4618 = vmatpush3.bf16.msra.mxu1 %v4615_v21  ;;  %v5519_v21 = vld [vmem:[%s5244_s28 + $0x109] sm:$0xff]  ;;  %v4775_v24 = vpack.c.bf16 %v3309_v18, %v3308_v16 }
  0x40   : > { %3896 = vmatmul.mubr.f32.gmra.mrb[8].mxu1 %v3181_v25  ;;  %4620 = vmatprep.subr.bf16.mxu1 %v4619_v30  ;;  %6390 = vst [vmem:[#allocation9_spill] sm:$0xff] %v5519_v21  ;;  %v3310_v25 = vld [vmem:[%s6341_s1 + $0x340] sm:$0xff]  ;;  %v199_v16 = vld [vmem:[%s5244_s28 + $0x8] sm:$0xff] }
  0x41   : > { %4216 = vmatmul.mubr.f32.gmra.mrb[8].mxu0 %v3183_v34  ;;  %3898 = vmatprep.mubr.f32.mxu1 %v3182_v26  ;;  %v3311_v26 = vld [vmem:[%s6341_s1 + $0x348] sm:$0xff] }
  0x42   : > { %4750 = vmatpush3.bf16.msra.mxu0 %v4747_v27  ;;  %4218 = vmatprep.mubr.f32.mxu0 %v5406_v35  ;;  %v5534_v27 = vld [vmem:[%s5244_s28 + $0x111] sm:$0xff]  ;;  %v4779_v32 = vpack.c.bf16 %v3311_v26, %v3310_v25  ;;  %v5645_v18 = vld [vmem:[%s5244_s28 + $0xe2] sm:$0xff] }
  0x43   : > { %4752 = vmatprep.subr.bf16.mxu0 %v4751_v36  ;;  %4622 = vmatpush3.bf16.msra.mxu1 %v4619_v30  ;;  %6391 = vst [vmem:[#allocation10_spill] sm:$0xff] %v5534_v27  ;;  %v5544_v30 = vld [vmem:[%s5244_s28 + $0x7a] sm:$0xff]  ;;  %v5651_v25 = vld [vmem:[%s5244_s28 + $0xf2] sm:$0xff] }
  0x44   : > { %3899 = vmatmul.mubr.f32.gmra.mrb[10].mxu1 %v3183_v34  ;;  %4624 = vmatprep.subr.bf16.mxu1 %v4623_v40  ;;  %v3313_v34 = vld [vmem:[%s6341_s1 + $0x358] sm:$0xff] }
  0x45   : > { %4219 = vmatmul.mubr.f32.gmra.mrb[10].mxu0 %v3185_v44  ;;  %3901 = vmatprep.mubr.f32.mxu1 %v5406_v35  ;;  %v4783_v41 = vpack.c.bf16 %v3313_v34, %v3312_v33  ;;  %v3115_v33 = vld [vmem:[%s6341_s1 + $0x128] sm:$0xff]  ;;  %v5663_v34 = vld [vmem:[%s5244_s28 + $0x20] sm:$0xff] }
  0x46   : > { %4754 = vmatpush3.bf16.msra.mxu0 %v4751_v36  ;;  %4221 = vmatprep.mubr.f32.mxu0 %v3186_v45  ;;  %v5556_v36 = vld [vmem:[%s5244_s28 + $0x129] sm:$0xff] }
  0x47   : > { %4756 = vmatprep.subr.bf16.mxu0 %v4755_v46  ;;  %4626 = vmatpush3.bf16.msra.mxu1 %v4623_v40  ;;  %6393 = vst [vmem:[#allocation12_spill] sm:$0xff] %v5556_v36  ;;  %v5566_v40 = vld [vmem:[%s5244_s28 + $0x92] sm:$0xff] }
  0x48   : > { %3902 = vmatmul.mubr.f32.gmra.mrb[12].mxu1 %v3185_v44  ;;  %4628 = vmatprep.subr.bf16.mxu1 %v4627_v50  ;;  %v3315_v44 = vld [vmem:[%s6341_s1 + $0x368] sm:$0xff] }
  0x49   : > { %4222 = vmatmul.mubr.f32.gmra.mrb[12].mxu0 %v3187_v53  ;;  %3904 = vmatprep.mubr.f32.mxu1 %v3186_v45  ;;  %v5578_v45 = vld [vmem:[%s5244_s28 + $0x141] sm:$0xff] }
  0x4a   : > { %4758 = vmatpush3.bf16.msra.mxu0 %v4755_v46  ;;  %4224 = vmatprep.mubr.f32.mxu0 %v5438_v54  ;;  %6395 = vst [vmem:[#allocation14_spill] sm:$0xff] %v5578_v45  ;;  %v5582_v46 = vld [vmem:[%s5244_s28 + $0x9a] sm:$0xff] }
  0x4b   : > { %4760 = vmatprep.subr.bf16.mxu0 %v4759_v55  ;;  %4630 = vmatpush3.bf16.msra.mxu1 %v4627_v50  ;;  %v4787_v50 = vpack.c.bf16 %v3315_v44, %v3314_v42  ;;  %v5671_v42 = vld [vmem:[%s5244_s28 + $0x30] sm:$0xff] }
  0x4c   : > { %3905 = vmatmul.mubr.f32.gmra.mrb[14].mxu1 %v3187_v53  ;;  %4632 = vmatprep.subr.bf16.mxu1 %v4631_v58  ;;  %v5600_v53 = vld [vmem:[%s5244_s28 + $0x159] sm:$0xff]  ;;  %6400 = vst [vmem:[#allocation19_spill] sm:$0xff] %v5671_v42  ;;  %v5674_v44 = vld [vmem:[%s5244_s28 + $0x10a] sm:$0xff] }
  0x4d   : > { %4225 = vmatmul.mubr.f32.gmra.mrb[14].mxu0 %v5454_v61  ;;  %3907 = vmatprep.mubr.f32.mxu1 %v5438_v54  ;;  %6397 = vst [vmem:[#allocation16_spill] sm:$0xff] %v5600_v53 }
  0x4e   : > { %4762 = vmatpush3.bf16.msra.mxu0 %v4759_v55  ;;  %4283 = vmatprep.mubr.f32.mxu0 %v5457_v62  ;;  %v5604_v55 = vld [vmem:[%s5244_s28 + $0xb2] sm:$0xff] }
  0x4f   : > { %4764 = vmatprep.subr.bf16.mxu0 %v4763_v63  ;;  %4634 = vmatpush3.bf16.msra.mxu1 %v4631_v58  ;;  %v4791_v58 = vpack.c.bf16 %v3317_v52, %v3316_v51  ;;  %v3117_v51 = vld [vmem:[%s6341_s1 + $0x138] sm:$0xff] }
  0x50   : > { %3908 = vmatmul.mubr.f32.gmra.mrb[16].mxu1 %v5454_v61  ;;  %4636 = vmatprep.subr.bf16.mxu1 %v5465_v2  ;;  %v5686_v52 = vld [vmem:[%s5244_s28 + $0x38] sm:$0xff] }
  0x51   : > { %4284 = vmatmul.mubr.f32.vlgmr.msra.gmra.mrb[0].mxu0 %v5471_v3  ;;  %3910 = vmatprep.mubr.f32.mxu1 %v5474_v4  ;;  %6401 = vst [vmem:[#allocation20_spill] sm:$0xff] %v5686_v52 }
  0x52   : > { %4766 = vmatpush3.bf16.msra.mxu0 %v4763_v63  ;;  %4286 = vmatprep.mubr.f32.mxu0 %v5477_v5  ;;  %v5622_v63 = vld [vmem:[%s5244_s28 + $0x171] sm:$0xff] }
  0x53   : > { %4768 = vmatprep.subr.bf16.mxu0 %v4767_v6  ;;  %6399 = vst [vmem:[#allocation18_spill] sm:$0xff] %v5622_v63 }
  0x54   : > { %3911 = vmatmul.mubr.f32.gmra.mrb[18].mxu1 %v5490_v10 }
  0x55   : > { %4287 = vmatmul.mubr.f32.gmra.mrb[2].mxu0 %v5494_v11  ;;  %3913 = vmatprep.mubr.f32.mxu1 %v5497_v13 }
  0x56   : > { %4289 = vmatprep.mubr.f32.mxu0 %v5500_v14  ;;  %4770 = vmatpush3.bf16.msra.mxu0 %v4767_v6  ;;  %v5630_v6 = vld [vmem:[%s5244_s28 + $0xda] sm:$0xff] }
  0x57   : > { %4772 = vmatprep.subr.bf16.mxu0 %v4771_v15 }
  0x58   : > { %3914 = vmatmul.mubr.f32.gmra.mrb[20].mxu1 %v5512_v19 }
  0x59   : > { %4290 = vmatmul.mubr.f32.gmra.mrb[4].mxu0 %v5516_v20  ;;  %3916 = vmatprep.mubr.f32.mxu1 %v5519_v21  ;;  %v3357_v21 = vld [vmem:[%s6341_s1 + $0x3b8] sm:$0xff] }
  0x5a   : > { %4292 = vmatprep.mubr.f32.mxu0 %v5522_v22  ;;  %4774 = vmatpush3.bf16.msra.mxu0 %v4771_v15  ;;  %v3113_v15 = vld [vmem:[%s6341_s1 + $0x118] sm:$0xff] }
  0x5b   : > { %4776 = vmatprep.subr.bf16.mxu0 %v4775_v24  ;;  %v4639_v26 = vpack.c.bf16 %v3113_v15, %v3112_v9  ;;  %v3118_v9 = vld [vmem:[%s6341_s1 + $0x140] sm:$0xff]  ;;  %v3119_v15 = vld [vmem:[%s6341_s1 + $0x148] sm:$0xff] }
  0x5c   : > { %3917 = vmatmul.mubr.f32.gmra.mrb[22].mxu1 %v5534_v27  ;;  %v3352_v27 = vld [vmem:[%s6341_s1 + $0x390] sm:$0xff] }
  0x5d   : > { %4293 = vmatmul.mubr.f32.gmra.mrb[6].mxu0 %v5538_v28  ;;  %3919 = vmatprep.mubr.f32.mxu1 %v5541_v29 }
  0x5e   : > { %4295 = vmatprep.mubr.f32.mxu0 %v5544_v30  ;;  %4778 = vmatpush3.bf16.msra.mxu0 %v4775_v24  ;;  %v5648_v24 = vld [vmem:[%s5244_s28 + $0x18] sm:$0xff] }
  0x5f   : > { %4780 = vmatprep.subr.bf16.mxu0 %v4779_v32 }
  0x60   : > { %3920 = vmatmul.mubr.f32.gmra.mrb[24].mxu1 %v5556_v36  ;;  %v3158_v36 = vld [vmem:[%s6341_s1 + $0x180] sm:$0xff] }
  0x61   : > { %4296 = vmatmul.mubr.f32.gmra.mrb[8].mxu0 %v5560_v38  ;;  %3922 = vmatprep.mubr.f32.mxu1 %v5563_v39  ;;  %v5800_v29 = vpack.c.bf16 %v3159_v17, %v3158_v36  ;;  %v5815_v17 = vld [vmem:[%s5244_s28 + $0xd8] sm:$0xff]  ;;  %v3354_v36 = vld [vmem:[%s6341_s1 + $0x3a0] sm:$0xff] }
  0x62   : > { %4298 = vmatprep.mubr.f32.mxu0 %v5566_v40  ;;  %4782 = vmatpush3.bf16.msra.mxu0 %v4779_v32  ;;  %v3114_v32 = vld [vmem:[%s6341_s1 + $0x120] sm:$0xff] }
  0x63   : > { %4784 = vmatprep.subr.bf16.mxu0 %v4783_v41 }
  0x64   : > { %3923 = vmatmul.mubr.f32.gmra.mrb[26].mxu1 %v5578_v45  ;;  %v3125_v45 = vld [vmem:[%s6341_s1 + $0x178] sm:$0xff] }
  0x65   : > { %4299 = vmatmul.mubr.f32.gmra.mrb[10].mxu0 %v5582_v46  ;;  %3925 = vmatprep.mubr.f32.mxu1 %v5585_v47  ;;  %v3124_v47 = vld [vmem:[%s6341_s1 + $0x170] sm:$0xff] }
  0x66   : > { %4301 = vmatprep.mubr.f32.mxu0 %v5588_v48  ;;  %4786 = vmatpush3.bf16.msra.mxu0 %v4783_v41  ;;  %v5668_v41 = vld [vmem:[%s5244_s28 + $0xfa] sm:$0xff]  ;;  %v4663_v39 = vpack.c.bf16 %v3125_v45, %v3124_v47  ;;  %v3253_v45 = vld [vmem:[%s5244_s28 + $0x18a] sm:$0xff] }
  0x67   : > { %4788 = vmatprep.subr.bf16.mxu0 %v4787_v50  ;;  %v5798_v47 = vld [vmem:[%s5244_s28 + $0xc0] sm:$0xff] }
  0x68   : > { %3926 = vmatmul.mubr.f32.gmra.mrb[28].mxu1 %v5600_v53  ;;  %v5762_v53 = vld [vmem:[%s5244_s28 + $0x16a] sm:$0xff]  ;;  %6412 = vst [vmem:[#allocation31_spill] sm:$0xff] %v5798_v47 }
  0x69   : > { %4302 = vmatmul.mubr.f32.gmra.mrb[12].mxu0 %v5604_v55  ;;  %3928 = vmatprep.mubr.f32.mxu1 %v5607_v56  ;;  %v3123_v56 = vld [vmem:[%s6341_s1 + $0x168] sm:$0xff] }
  0x6a   : > { %4304 = vmatprep.mubr.f32.mxu0 %v5610_v57  ;;  %4790 = vmatpush3.bf16.msra.mxu0 %v4787_v50  ;;  %v4643_v50 = vpack.c.bf16 %v3115_v33, %v3114_v32  ;;  %v5715_v32 = vld [vmem:[%s5244_s28 + $0x60] sm:$0xff]  ;;  %v4659_v31 = vpack.c.bf16 %v3123_v56, %v3122_v37  ;;  %v5778_v37 = vld [vmem:[%s5244_s28 + $0x172] sm:$0xff]  ;;  %v5781_v56 = vld [vmem:[%s5244_s28 + $0xa8] sm:$0xff] }
  0x6b   : > { %4792 = vmatprep.subr.bf16.mxu0 %v4791_v58  ;;  %6404 = vst [vmem:[#allocation23_spill] sm:$0xff] %v5715_v32  ;;  %v5718_v33 = vld [vmem:[%s5244_s28 + $0x13a] sm:$0xff]  ;;  %6410 = vst [vmem:[#allocation29_spill] sm:$0xff] %v5781_v56 }
  0x6c   : > { %3929 = vmatmul.mubr.f32.gmra.mrb[30].mxu1 %v5622_v63 }
  0x6d   : > { %4305 = vmatmul.mubr.f32.gmra.mrb[14].mxu0 %v5626_v0  ;;  %3963 = vmatprep.mubr.f32.mxu1 %v198_v1 }
  0x6e   : > { %4307 = vmatprep.mubr.f32.mxu0 %v5630_v6  ;;  %4794 = vmatpush3.bf16.msra.mxu0 %v4791_v58  ;;  %v5690_v58 = vld [vmem:[%s5244_s28 + $0x112] sm:$0xff] }
  0x6f   : > { %4796 = vmatprep.subr.bf16.mxu0 %v5632_v8 }
  0x70   : > { %3964 = vmatmul.mubr.f32.vlgmr.msra.gmra.mrb[0].mxu1 %v199_v16  ;;  %v5708_v16 = vld [vmem:[%s5244_s28 + $0x50] sm:$0xff] }
  0x71   : > { %4308 = vmatmul.mubr.f32.gmra.mrb[16].mxu0 %v5645_v18  ;;  %4638 = vmatpush3.bf16.msra.mxu1 %v5465_v2  ;;  %v3116_v2 = vld [vmem:[%s6341_s1 + $0x130] sm:$0xff]  ;;  %6403 = vst [vmem:[#allocation22_spill] sm:$0xff] %v5708_v16 }
  0x72   : > { %3966 = vmatprep.mubr.f32.mxu1 %v5648_v24  ;;  %4310 = vmatprep.mubr.f32.mxu0 %v5651_v25  ;;  %v4647_v1 = vpack.c.bf16 %v3117_v51, %v3116_v2  ;;  %v4651_v2 = vpack.c.bf16 %v3119_v15, %v3118_v9  ;;  %v3120_v51 = vld [vmem:[%s6341_s1 + $0x150] sm:$0xff]  ;;  %v5734_v9 = vld [vmem:[%s5244_s28 + $0x142] sm:$0xff]  ;;  %v5737_v15 = vld [vmem:[%s5244_s28 + $0x78] sm:$0xff] }
  0x73   : > { %4640 = vmatprep.subr.bf16.mxu1 %v4639_v26  ;;  %6406 = vst [vmem:[#allocation25_spill] sm:$0xff] %v5737_v15  ;;  %v4655_v63 = vpack.c.bf16 %v3121_v49, %v3120_v51  ;;  %v5756_v49 = vld [vmem:[%s5244_s28 + $0x15a] sm:$0xff]  ;;  %v5759_v51 = vld [vmem:[%s5244_s28 + $0x90] sm:$0xff] }
  0x74   : > { %3967 = vmatmul.mubr.f32.gmra.mrb[2].mxu1 %v5663_v34  ;;  %6408 = vst [vmem:[#allocation27_spill] sm:$0xff] %v5759_v51 }
  0x75   : > { %4311 = vmatmul.mubr.f32.gmra.mrb[18].mxu0 %v5668_v41  ;;  %3969 = vmatprep.mubr.f32.mxu1 %v5671_v42 }
  0x76   : > { %4313 = vmatprep.mubr.f32.mxu0 %v5674_v44  ;;  %4642 = vmatpush3.bf16.msra.mxu1 %v4639_v26  ;;  %v5712_v26 = vld [vmem:[%s5244_s28 + $0x12a] sm:$0xff] }
  0x77   : > { %4644 = vmatprep.subr.bf16.mxu1 %v4643_v50 }
  0x78   : > { %3970 = vmatmul.mubr.f32.gmra.mrb[4].mxu1 %v5686_v52 }
  0x79   : > { %4314 = vmatmul.mubr.f32.gmra.mrb[20].mxu0 %v5690_v58  ;;  %3972 = vmatprep.mubr.f32.mxu1 %v5693_v59 }
  0x7a   : > { %4316 = vmatprep.mubr.f32.mxu0 %v5696_v60  ;;  %4646 = vmatpush3.bf16.msra.mxu1 %v4643_v50  ;;  %v5730_v50 = vld [vmem:[%s5244_s28 + $0x68] sm:$0xff] }
  0x7b   : > { %4648 = vmatprep.subr.bf16.mxu1 %v4647_v1  ;;  %6405 = vst [vmem:[#allocation24_spill] sm:$0xff] %v5730_v50 }
  0x7c   : > { %3973 = vmatmul.mubr.f32.gmra.mrb[6].mxu1 %v5708_v16 }
  0x7d   : > { %4317 = vmatmul.mubr.f32.gmra.mrb[22].mxu0 %v5712_v26  ;;  %3975 = vmatprep.mubr.f32.mxu1 %v5715_v32 }
  0x7e   : > { %4319 = vmatprep.mubr.f32.mxu0 %v5718_v33  ;;  %4650 = vmatpush3.bf16.msra.mxu1 %v4647_v1  ;;  %v5752_v1 = vld [vmem:[%s5244_s28 + $0x80] sm:$0xff] }
  0x7f   : > { %4652 = vmatprep.subr.bf16.mxu1 %v4651_v2  ;;  %6407 = vst [vmem:[#allocation26_spill] sm:$0xff] %v5752_v1 }
  0x80   : > { %3976 = vmatmul.mubr.f32.gmra.mrb[8].mxu1 %v5730_v50 }
  0x81   : > { %4320 = vmatmul.mubr.f32.gmra.mrb[24].mxu0 %v5734_v9  ;;  %3978 = vmatprep.mubr.f32.mxu1 %v5737_v15 }
  0x82   : > { %4322 = vmatprep.mubr.f32.mxu0 %v5740_v43  ;;  %4654 = vmatpush3.bf16.msra.mxu1 %v4651_v2  ;;  %v5774_v2 = vld [vmem:[%s5244_s28 + $0x98] sm:$0xff] }
  0x83   : > { %4656 = vmatprep.subr.bf16.mxu1 %v4655_v63  ;;  %6409 = vst [vmem:[#allocation28_spill] sm:$0xff] %v5774_v2 }
  0x84   : > { %3979 = vmatmul.mubr.f32.gmra.mrb[10].mxu1 %v5752_v1 }
  0x85   : > { %4323 = vmatmul.mubr.f32.gmra.mrb[26].mxu0 %v5756_v49  ;;  %3981 = vmatprep.mubr.f32.mxu1 %v5759_v51 }
  0x86   : > { %4325 = vmatprep.mubr.f32.mxu0 %v5762_v53  ;;  %4658 = vmatpush3.bf16.msra.mxu1 %v4655_v63  ;;  %v5794_v63 = vld [vmem:[%s5244_s28 + $0xb0] sm:$0xff] }
  0x87   : > { %4660 = vmatprep.subr.bf16.mxu1 %v4659_v31  ;;  %6411 = vst [vmem:[#allocation30_spill] sm:$0xff] %v5794_v63 }
  0x88   : > { %3982 = vmatmul.mubr.f32.gmra.mrb[12].mxu1 %v5774_v2 }
  0x89   : > { %4326 = vmatmul.mubr.f32.gmra.mrb[28].mxu0 %v5778_v37  ;;  %3984 = vmatprep.mubr.f32.mxu1 %v5781_v56 }
  0x8a   : > { %4328 = vmatprep.mubr.f32.mxu0 %v3252_v23  ;;  %4662 = vmatpush3.bf16.msra.mxu1 %v4659_v31  ;;  %v5811_v23 = vld [vmem:[%s5244_s28 + $0xc8] sm:$0xff]  ;;  %v4799_v31 = vpack.c.bf16 %v3353_v12, %v3352_v27  ;;  %v5833_v12 = vld [vmem:[%s5244_s28 + $0xf0] sm:$0xff] }
  0x8b   : > { %4664 = vmatprep.subr.bf16.mxu1 %v4663_v39  ;;  %6413 = vst [vmem:[#allocation32_spill] sm:$0xff] %v5811_v23 }
  0x8c   : > { %3985 = vmatmul.mubr.f32.gmra.mrb[14].mxu1 %v5794_v63 }
  0x8d   : > { %4329 = vmatmul.mubr.f32.gmra.mrb[30].mxu0 %v3253_v45  ;;  %3987 = vmatprep.mubr.f32.mxu1 %v5798_v47  ;;  %v3355_v45 = vld [vmem:[%s6341_s1 + $0x3a8] sm:$0xff] }
  0x8e   : > { %4363 = vmatprep.mubr.f32.mxu0 %v5671_v42  ;;  %4666 = vmatpush3.bf16.msra.mxu1 %v4663_v39  ;;  %v5828_v39 = vld [vmem:[%s5244_s28 + $0xe0] sm:$0xff]  ;;  %v4803_v27 = vpack.c.bf16 %v3355_v45, %v3354_v36  ;;  %v5849_v36 = vld [vmem:[%s5244_s28 + $0x108] sm:$0xff] }
  0x8f   : > { %4668 = vmatprep.subr.bf16.mxu1 %v5800_v29  ;;  %v746_v42 = vld [vmem:[%s5244_s28 + $0xa] sm:$0xff] }
  0x90   : > { %3988 = vmatmul.mubr.f32.gmra.mrb[16].mxu1 %v5811_v23 }
  0x91   : > { %4364 = vmatmul.mubr.f32.vlgmr.msra.gmra.mrb[0].mxu0 %v5686_v52  ;;  %3990 = vmatprep.mubr.f32.mxu1 %v5815_v17  ;;  %v3356_v52 = vld [vmem:[%s6341_s1 + $0x3b0] sm:$0xff] }
  0x92   : > { %4798 = vmatpush3.bf16.msra.mxu0 %v5632_v8  ;;  %4366 = vmatprep.mubr.f32.mxu0 %v5693_v59  ;;  %v5845_v8 = vld [vmem:[%s5244_s28 + $0xf8] sm:$0xff]  ;;  %v4807_v45 = vpack.c.bf16 %v3357_v21, %v3356_v52  ;;  %v3358_v59 = vld [vmem:[%s6341_s1 + $0x3c0] sm:$0xff] }
  0x93   : > { %4800 = vmatprep.subr.bf16.mxu0 %v4799_v31  ;;  %v5865_v21 = vld [vmem:[%s5244_s28 + $0x120] sm:$0xff] }
  0x94   : > { %3991 = vmatmul.mubr.f32.gmra.mrb[18].mxu1 %v5828_v39 }
  0x95   : > { %4367 = vmatmul.mubr.f32.gmra.mrb[2].mxu0 %v5708_v16  ;;  %3993 = vmatprep.mubr.f32.mxu1 %v5833_v12  ;;  %v3359_v16 = vld [vmem:[%s6341_s1 + $0x3c8] sm:$0xff] }
  0x96   : > { %4369 = vmatprep.mubr.f32.mxu0 %v5715_v32  ;;  %4802 = vmatpush3.bf16.msra.mxu0 %v4799_v31  ;;  %v5861_v31 = vld [vmem:[%s5244_s28 + $0x110] sm:$0xff]  ;;  %v4811_v52 = vpack.c.bf16 %v3359_v16, %v3358_v59  ;;  %v5881_v59 = vld [vmem:[%s5244_s28 + $0x138] sm:$0xff] }
  0x97   : > { %4804 = vmatprep.subr.bf16.mxu0 %v4803_v27  ;;  %v3360_v32 = vld [vmem:[%s6341_s1 + $0x3d0] sm:$0xff] }
  0x98   : > { %3994 = vmatmul.mubr.f32.gmra.mrb[20].mxu1 %v5845_v8 }
  0x99   : > { %4370 = vmatmul.mubr.f32.gmra.mrb[4].mxu0 %v5730_v50  ;;  %3996 = vmatprep.mubr.f32.mxu1 %v5849_v36  ;;  %v3361_v50 = vld [vmem:[%s6341_s1 + $0x3d8] sm:$0xff] }
  0x9a   : > { %4372 = vmatprep.mubr.f32.mxu0 %v5737_v15  ;;  %4806 = vmatpush3.bf16.msra.mxu0 %v4803_v27  ;;  %v5877_v15 = vld [vmem:[%s5244_s28 + $0x128] sm:$0xff]  ;;  %v4815_v16 = vpack.c.bf16 %v3361_v50, %v3360_v32  ;;  %v3362_v27 = vld [vmem:[%s6341_s1 + $0x3e0] sm:$0xff]  ;;  %v5897_v32 = vld [vmem:[%s5244_s28 + $0x150] sm:$0xff] }
  0x9b   : > { %4808 = vmatprep.subr.bf16.mxu0 %v4807_v45 }
  0x9c   : > { %3997 = vmatmul.mubr.f32.gmra.mrb[22].mxu1 %v5861_v31 }
  0x9d   : > { %4373 = vmatmul.mubr.f32.gmra.mrb[6].mxu0 %v5752_v1  ;;  %3999 = vmatprep.mubr.f32.mxu1 %v5865_v21  ;;  %v3363_v1 = vld [vmem:[%s6341_s1 + $0x3e8] sm:$0xff] }
  0x9e   : > { %4375 = vmatprep.mubr.f32.mxu0 %v5759_v51  ;;  %4810 = vmatpush3.bf16.msra.mxu0 %v4807_v45  ;;  %v5893_v51 = vld [vmem:[%s5244_s28 + $0x140] sm:$0xff]  ;;  %v4819_v50 = vpack.c.bf16 %v3363_v1, %v3362_v27  ;;  %v3364_v45 = vld [vmem:[%s6341_s1 + $0x3f0] sm:$0xff]  ;;  %v5913_v1 = vld [vmem:[%s5244_s28 + $0x168] sm:$0xff] }
  0x9f   : > { %4812 = vmatprep.subr.bf16.mxu0 %v4811_v52  ;;  %v3398_v27 = vld [vmem:[%s6341_s1 + $0x400] sm:$0xff] }
  0xa0   : > { %4000 = vmatmul.mubr.f32.gmra.mrb[24].mxu1 %v5877_v15 }
  0xa1   : > { %4376 = vmatmul.mubr.f32.gmra.mrb[8].mxu0 %v5774_v2  ;;  %4002 = vmatprep.mubr.f32.mxu1 %v5881_v59  ;;  %v3365_v2 = vld [vmem:[%s6341_s1 + $0x3f8] sm:$0xff] }
  0xa2   : > { %4378 = vmatprep.mubr.f32.mxu0 %v5781_v56  ;;  %4814 = vmatpush3.bf16.msra.mxu0 %v4811_v52  ;;  %v5909_v56 = vld [vmem:[%s5244_s28 + $0x158] sm:$0xff]  ;;  %v4823_v52 = vpack.c.bf16 %v3365_v2, %v3364_v45  ;;  %v745_v2 = vld [vmem:[%s5244_s28 + $0x2] sm:$0xff]  ;;  %v3160_v45 = vld [vmem:[%s6341_s1 + $0x190] sm:$0xff] }
  0xa3   : > { %4816 = vmatprep.subr.bf16.mxu0 %v4815_v16 }
  0xa4   : > { %4003 = vmatmul.mubr.f32.gmra.mrb[26].mxu1 %v5893_v51 }
  0xa5   : > { %4379 = vmatmul.mubr.f32.gmra.mrb[10].mxu0 %v5794_v63  ;;  %4005 = vmatprep.mubr.f32.mxu1 %v5897_v32  ;;  %v3399_v63 = vld [vmem:[%s6341_s1 + $0x408] sm:$0xff] }
  0xa6   : > { %4381 = vmatprep.mubr.f32.mxu0 %v5798_v47  ;;  %4818 = vmatpush3.bf16.msra.mxu0 %v4815_v16  ;;  %v5925_v47 = vld [vmem:[%s5244_s28 + $0x170] sm:$0xff]  ;;  %v5929_v16 = vpack.c.bf16 %v3399_v63, %v3398_v27  ;;  %v3162_v63 = vld [vmem:[%s6341_s1 + $0x1a0] sm:$0xff]  ;;  %v3163_v27 = vld [vmem:[%s6341_s1 + $0x1a8] sm:$0xff] }
  0xa7   : > { %4820 = vmatprep.subr.bf16.mxu0 %v4819_v50 }
  0xa8   : > { %4006 = vmatmul.mubr.f32.gmra.mrb[28].mxu1 %v5909_v56 }
  0xa9   : > { %4382 = vmatmul.mubr.f32.gmra.mrb[12].mxu0 %v5811_v23  ;;  %4008 = vmatprep.mubr.f32.mxu1 %v5913_v1  ;;  %v3161_v23 = vld [vmem:[%s6341_s1 + $0x198] sm:$0xff] }
  0xaa   : > { %4384 = vmatprep.mubr.f32.mxu0 %v5815_v17  ;;  %4822 = vmatpush3.bf16.msra.mxu0 %v4819_v50  ;;  %v4671_v50 = vpack.c.bf16 %v3161_v23, %v3160_v45  ;;  %v4675_v23 = vpack.c.bf16 %v3163_v27, %v3162_v63  ;;  %v3171_v45 = vld [vmem:[%s6341_s1 + $0x1e8] sm:$0xff]  ;;  %v3173_v63 = vld [vmem:[%s6341_s1 + $0x1f8] sm:$0xff] }
  0xab   : > { %4824 = vmatprep.subr.bf16.mxu0 %v4823_v52  ;;  %v3300_v27 = vld [vmem:[%s5244_s28 + $0x198] sm:$0xff] }
  0xac   : > { %4009 = vmatmul.mubr.f32.gmra.mrb[30].mxu1 %v5925_v47 }
  0xad   : > { %4385 = vmatmul.mubr.f32.gmra.mrb[14].mxu0 %v5828_v39  ;;  %4043 = vmatprep.mubr.f32.mxu1 %v745_v2  ;;  %v3169_v2 = vld [vmem:[%s6341_s1 + $0x1d8] sm:$0xff] }
  0xae   : > { %4387 = vmatprep.mubr.f32.mxu0 %v5833_v12  ;;  %4826 = vmatpush3.bf16.msra.mxu0 %v4823_v52  ;;  %v3165_v52 = vld [vmem:[%s6341_s1 + $0x1b8] sm:$0xff] }
  0xaf   : > { %4828 = vmatprep.subr.bf16.mxu0 %v5929_v16 }
  0xb0   : > { %4044 = vmatmul.mubr.f32.vlgmr.msra.gmra.mrb[0].mxu1 %v746_v42  ;;  %v3164_v42 = vld [vmem:[%s6341_s1 + $0x1b0] sm:$0xff] }
  0xb1   : > { %4388 = vmatmul.mubr.f32.gmra.mrb[16].mxu0 %v5845_v8  ;;  %4670 = vmatpush3.bf16.msra.mxu1 %v5800_v29  ;;  %v3167_v29 = vld [vmem:[%s6341_s1 + $0x1c8] sm:$0xff] }
  0xb2   : > { %4046 = vmatprep.mubr.f32.mxu1 %v5457_v62  ;;  %4390 = vmatprep.mubr.f32.mxu0 %v5849_v36  ;;  %v4679_v62 = vpack.c.bf16 %v3165_v52, %v3164_v42  ;;  %v3400_v42 = vld [vmem:[%s6341_s1 + $0x410] sm:$0xff] }
  0xb3   : > { %4672 = vmatprep.subr.bf16.mxu1 %v4671_v50  ;;  %v3320_v52 = vld [vmem:[%s5244_s28 + $0x49] sm:$0xff] }
  0xb4   : > { %4047 = vmatmul.mubr.f32.gmra.mrb[2].mxu1 %v5471_v3  ;;  %v3166_v3 = vld [vmem:[%s6341_s1 + $0x1c0] sm:$0xff] }
  0xb5   : > { %4391 = vmatmul.mubr.f32.gmra.mrb[18].mxu0 %v5861_v31  ;;  %4049 = vmatprep.mubr.f32.mxu1 %v5477_v5  ;;  %v4683_v5 = vpack.c.bf16 %v3167_v29, %v3166_v3  ;;  %v3403_v3 = vld [vmem:[%s6341_s1 + $0x428] sm:$0xff] }
  0xb6   : > { %4393 = vmatprep.mubr.f32.mxu0 %v5865_v21  ;;  %4674 = vmatpush3.bf16.msra.mxu1 %v4671_v50  ;;  %v3172_v50 = vld [vmem:[%s6341_s1 + $0x1f0] sm:$0xff]  ;;  %v3322_v29 = vld [vmem:[%s5244_s28 + $0x61] sm:$0xff] }
  0xb7   : > { %4676 = vmatprep.subr.bf16.mxu1 %v4675_v23 }
  0xb8   : > { %4050 = vmatmul.mubr.f32.gmra.mrb[4].mxu1 %v5494_v11  ;;  %v3168_v11 = vld [vmem:[%s6341_s1 + $0x1d0] sm:$0xff] }
  0xb9   : > { %4394 = vmatmul.mubr.f32.gmra.mrb[20].mxu0 %v5877_v15  ;;  %4052 = vmatprep.mubr.f32.mxu1 %v5500_v14  ;;  %v4687_v14 = vpack.c.bf16 %v3169_v2, %v3168_v11  ;;  %v3405_v11 = vld [vmem:[%s6341_s1 + $0x438] sm:$0xff] }
  0xba   : > { %4396 = vmatprep.mubr.f32.mxu0 %v5881_v59  ;;  %4678 = vmatpush3.bf16.msra.mxu1 %v4675_v23  ;;  %v3301_v23 = vld [vmem:[%s5244_s28 + $0x1a0] sm:$0xff] }
  0xbb   : > { %4680 = vmatprep.subr.bf16.mxu1 %v4679_v62 }
  0xbc   : > { %4053 = vmatmul.mubr.f32.gmra.mrb[6].mxu1 %v5516_v20  ;;  %v3170_v20 = vld [vmem:[%s6341_s1 + $0x1e0] sm:$0xff] }
  0xbd   : > { %4397 = vmatmul.mubr.f32.gmra.mrb[22].mxu0 %v5893_v51  ;;  %4055 = vmatprep.mubr.f32.mxu1 %v5522_v22  ;;  %v5993_v22 = vld [vmem:[%s5244_s28 + $0x180] sm:$0xff] }
  0xbe   : > { %4399 = vmatprep.mubr.f32.mxu0 %v5897_v32  ;;  %4682 = vmatpush3.bf16.msra.mxu1 %v4679_v62 }
  0xbf   : > { %4684 = vmatprep.subr.bf16.mxu1 %v4683_v5 }
  0xc0   : > { %4056 = vmatmul.mubr.f32.gmra.mrb[8].mxu1 %v5538_v28  ;;  %v4691_v28 = vpack.c.bf16 %v3171_v45, %v3170_v20  ;;  %v3409_v45 = vld [vmem:[%s6341_s1 + $0x458] sm:$0xff] }
  0xc1   : > { %4400 = vmatmul.mubr.f32.gmra.mrb[24].mxu0 %v5909_v56  ;;  %4058 = vmatprep.mubr.f32.mxu1 %v5544_v30  ;;  %v6006_v30 = vld [vmem:[%s5244_s28 + $0x188] sm:$0xff] }
  0xc2   : > { %4402 = vmatprep.mubr.f32.mxu0 %v5913_v1  ;;  %4686 = vmatpush3.bf16.msra.mxu1 %v4683_v5  ;;  %v3404_v5 = vld [vmem:[%s6341_s1 + $0x430] sm:$0xff] }
  0xc3   : > { %4688 = vmatprep.subr.bf16.mxu1 %v4687_v14  ;;  %v4839_v2 = vpack.c.bf16 %v3405_v11, %v3404_v5  ;;  %v6130_v5 = vld [vmem:[%s5244_s28 + $0x189] sm:$0xff]  ;;  %v3348_v11 = vld [vmem:[%s5244_s28 + $0x199] sm:$0xff] }
  0xc4   : > { %4059 = vmatmul.mubr.f32.gmra.mrb[10].mxu1 %v5560_v38  ;;  %v4695_v38 = vpack.c.bf16 %v3173_v63, %v3172_v50  ;;  %v3411_v63 = vld [vmem:[%s6341_s1 + $0x468] sm:$0xff] }
  0xc5   : > { %4403 = vmatmul.mubr.f32.gmra.mrb[26].mxu0 %v5925_v47  ;;  %4061 = vmatprep.mubr.f32.mxu1 %v5566_v40  ;;  %v3318_v40 = vld [vmem:[%s5244_s28 + $0x31] sm:$0xff] }
  0xc6   : > { %4405 = vmatprep.mubr.f32.mxu0 %v5993_v22  ;;  %4690 = vmatpush3.bf16.msra.mxu1 %v4687_v14  ;;  %v3407_v14 = vld [vmem:[%s6341_s1 + $0x448] sm:$0xff] }
  0xc7   : > { %4692 = vmatprep.subr.bf16.mxu1 %v4691_v28 }
  0xc8   : > { %4062 = vmatmul.mubr.f32.gmra.mrb[12].mxu1 %v5582_v46  ;;  %v3401_v46 = vld [vmem:[%s6341_s1 + $0x418] sm:$0xff] }
  0xc9   : > { %4406 = vmatmul.mubr.f32.gmra.mrb[28].mxu0 %v6006_v30  ;;  %4064 = vmatprep.mubr.f32.mxu1 %v5588_v48  ;;  %v3319_v48 = vld [vmem:[%s5244_s28 + $0x39] sm:$0xff]  ;;  %v4831_v62 = vpack.c.bf16 %v3401_v46, %v3400_v42 }
  0xca   : > { %4408 = vmatprep.mubr.f32.mxu0 %v3300_v27  ;;  %4694 = vmatpush3.bf16.msra.mxu1 %v4691_v28  ;;  %v3328_v28 = vld [vmem:[%s5244_s28 + $0xa9] sm:$0xff]  ;;  %v3413_v27 = vld [vmem:[%s6341_s1 + $0x478] sm:$0xff]  ;;  %v6432_v46 = vld [vmem:[#allocation26_spill] sm:$0xff] }
  0xcb   : > { %4696 = vmatprep.subr.bf16.mxu1 %v4695_v38  ;;  %v6431_v42 = vld [vmem:[#allocation5_spill] sm:$0xff] }
  0xcc   : > { %4065 = vmatmul.mubr.f32.gmra.mrb[14].mxu1 %v5604_v55  ;;  %v3402_v55 = vld [vmem:[%s6341_s1 + $0x420] sm:$0xff] }
  0xcd   : > { %4409 = vmatmul.mubr.f32.gmra.mrb[30].mxu0 %v3301_v23  ;;  %4067 = vmatprep.mubr.f32.mxu1 %v5610_v57  ;;  %v3321_v57 = vld [vmem:[%s5244_s28 + $0x51] sm:$0xff] }
  0xce   : > { %4443 = vmatprep.mubr.f32.mxu0 %v3318_v40  ;;  %4698 = vmatpush3.bf16.msra.mxu1 %v4695_v38  ;;  %v6428_v38 = vld [vmem:[#allocation14_spill] sm:$0xff]  ;;  %v6429_v23 = vld [vmem:[#allocation25_spill] sm:$0xff]  ;;  %v6430_v40 = vld [vmem:[#allocation15_spill] sm:$0xff] }
  0xcf   : > { %4859 = vmatprep.subr.bf16.mxu1 %v5199_v7 }
  0xd0   : > { %4068 = vmatmul.mubr.f32.gmra.mrb[16].mxu1 %v5626_v0  ;;  %v4835_v0 = vpack.c.bf16 %v3403_v3, %v3402_v55  ;;  %v6122_v55 = vld [vmem:[%s5244_s28 + $0x181] sm:$0xff] }
  0xd1   : > { %4444 = vmatmul.mubr.f32.vlgmr.msra.gmra.mrb[0].mxu0 %v3319_v48  ;;  %4070 = vmatprep.mubr.f32.mxu1 %v5630_v6  ;;  %v3323_v6 = vld [vmem:[%s5244_s28 + $0x69] sm:$0xff]  ;;  %v6436_v3 = vld [vmem:[#allocation6_spill] sm:$0xff] }
  0xd2   : > { %4830 = vmatpush3.bf16.msra.mxu0 %v5929_v16  ;;  %4446 = vmatprep.mubr.f32.mxu0 %v3320_v52  ;;  %v3324_v16 = vld [vmem:[%s5244_s28 + $0x79] sm:$0xff]  ;;  %v6433_v48 = vld [vmem:[#allocation16_spill] sm:$0xff]  ;;  %v6434_v52 = vld [vmem:[#allocation27_spill] sm:$0xff] }
  0xd3   : > { %4832 = vmatprep.subr.bf16.mxu0 %v4831_v62 }
  0xd4   : > { %4071 = vmatmul.mubr.f32.gmra.mrb[18].mxu1 %v5645_v18  ;;  %v3406_v18 = vld [vmem:[%s6341_s1 + $0x440] sm:$0xff] }
  0xd5   : > { %4447 = vmatmul.mubr.f32.gmra.mrb[2].mxu0 %v3321_v57  ;;  %4073 = vmatprep.mubr.f32.mxu1 %v5651_v25  ;;  %v3325_v25 = vld [vmem:[%s5244_s28 + $0x81] sm:$0xff]  ;;  %v4843_v20 = vpack.c.bf16 %v3407_v14, %v3406_v18  ;;  %v6437_v57 = vld [vmem:[#allocation28_spill] sm:$0xff] }
  0xd6   : > { %4449 = vmatprep.mubr.f32.mxu0 %v3322_v29  ;;  %4834 = vmatpush3.bf16.msra.mxu0 %v4831_v62  ;;  %v6435_v62 = vld [vmem:[#allocation17_spill] sm:$0xff]  ;;  %v6438_v29 = vld [vmem:[#allocation18_spill] sm:$0xff] }
  0xd7   : > { %4836 = vmatprep.subr.bf16.mxu0 %v4835_v0  ;;  %v3349_v18 = vld [vmem:[%s5244_s28 + $0x1a1] sm:$0xff]  ;;  %v3366_v14 = vld [vmem:[%s5244_s28 + $0x32] sm:$0xff] }
  0xd8   : > { %4074 = vmatmul.mubr.f32.gmra.mrb[20].mxu1 %v5668_v41  ;;  %v3408_v41 = vld [vmem:[%s6341_s1 + $0x450] sm:$0xff] }
  0xd9   : > { %4450 = vmatmul.mubr.f32.gmra.mrb[4].mxu0 %v3323_v6  ;;  %4076 = vmatprep.mubr.f32.mxu1 %v5674_v44  ;;  %v3327_v44 = vld [vmem:[%s5244_s28 + $0x99] sm:$0xff]  ;;  %v4847_v50 = vpack.c.bf16 %v3409_v45, %v3408_v41  ;;  %v6440_v6 = vld [vmem:[#allocation7_spill] sm:$0xff] }
  0xda   : > { %4452 = vmatprep.mubr.f32.mxu0 %v3324_v16  ;;  %4838 = vmatpush3.bf16.msra.mxu0 %v4835_v0  ;;  %v6439_v0 = vld [vmem:[#allocation29_spill] sm:$0xff]  ;;  %v6441_v16 = vld [vmem:[#allocation30_spill] sm:$0xff]  ;;  %v3368_v45 = vld [vmem:[%s5244_s28 + $0x4a] sm:$0xff] }
  0xdb   : > { %4840 = vmatprep.subr.bf16.mxu0 %v4839_v2  ;;  %v3367_v41 = vld [vmem:[%s5244_s28 + $0x3a] sm:$0xff] }
  0xdc   : > { %4077 = vmatmul.mubr.f32.gmra.mrb[22].mxu1 %v5690_v58  ;;  %v3410_v58 = vld [vmem:[%s6341_s1 + $0x460] sm:$0xff] }
  0xdd   : > { %4453 = vmatmul.mubr.f32.gmra.mrb[6].mxu0 %v3325_v25  ;;  %4079 = vmatprep.mubr.f32.mxu1 %v5696_v60  ;;  %v4851_v60 = vpack.c.bf16 %v3411_v63, %v3410_v58  ;;  %v6443_v25 = vld [vmem:[#allocation8_spill] sm:$0xff]  ;;  %v3383_v58 = vld [vmem:[%s5244_s28 + $0xfa] sm:$0xff] }
  0xde   : > { %4455 = vmatprep.mubr.f32.mxu0 %v5406_v35  ;;  %4842 = vmatpush3.bf16.msra.mxu0 %v4839_v2  ;;  %v3329_v35 = vld [vmem:[%s5244_s28 + $0xb1] sm:$0xff]  ;;  %v6442_v2 = vld [vmem:[#allocation31_spill] sm:$0xff]  ;;  %v3193_v63 = vld [vmem:[%s5244_s28 + $0xf9] sm:$0xff] }
  0xdf   : > { %4844 = vmatprep.subr.bf16.mxu0 %v4843_v20 }
  0xe0   : > { %4080 = vmatmul.mubr.f32.gmra.mrb[24].mxu1 %v5712_v26  ;;  %v3412_v26 = vld [vmem:[%s6341_s1 + $0x470] sm:$0xff] }
  0xe1   : > { %4456 = vmatmul.mubr.f32.gmra.mrb[8].mxu0 %v3327_v44  ;;  %4082 = vmatprep.mubr.f32.mxu1 %v5718_v33  ;;  %v4855_v33 = vpack.c.bf16 %v3413_v27, %v3412_v26  ;;  %v3369_v44 = vld [vmem:[%s5244_s28 + $0x52] sm:$0xff]  ;;  %v3387_v27 = vld [vmem:[%s5244_s28 + $0x12a] sm:$0xff] }
  0xe2   : > { %4458 = vmatprep.mubr.f32.mxu0 %v3328_v28  ;;  %4846 = vmatpush3.bf16.msra.mxu0 %v4843_v20  ;;  %v6444_v20 = vld [vmem:[#allocation32_spill] sm:$0xff]  ;;  %v3370_v28 = vld [vmem:[%s5244_s28 + $0x62] sm:$0xff] }
  0xe3   : > { %4848 = vmatprep.subr.bf16.mxu0 %v4847_v50  ;;  %v3195_v26 = vld [vmem:[%s5244_s28 + $0x111] sm:$0xff] }
  0xe4   : > { %4083 = vmatmul.mubr.f32.gmra.mrb[26].mxu1 %v5734_v9  ;;  %v6425_v9 = vld [vmem:[#allocation13_spill] sm:$0xff] }
  0xe5   : > { %4459 = vmatmul.mubr.f32.gmra.mrb[10].mxu0 %v3329_v35  ;;  %4085 = vmatprep.mubr.f32.mxu1 %v5740_v43  ;;  %v6414_v43 = vld [vmem:[#allocation19_spill] sm:$0xff]  ;;  %v3385_v35 = vld [vmem:[%s5244_s28 + $0x112] sm:$0xff] }
  0xe6   : > { %4461 = vmatprep.mubr.f32.mxu0 %v5438_v54  ;;  %4850 = vmatpush3.bf16.msra.mxu0 %v4847_v50  ;;  %v6415_v54 = vld [vmem:[#allocation9_spill] sm:$0xff] }
  0xe7   : > { %4852 = vmatprep.subr.bf16.mxu0 %v4851_v60  ;;  %v3372_v50 = vld [vmem:[%s5244_s28 + $0x7a] sm:$0xff] }
  0xe8   : > { %4086 = vmatmul.mubr.f32.gmra.mrb[28].mxu1 %v5756_v49  ;;  %v6426_v49 = vld [vmem:[#allocation4_spill] sm:$0xff] }
  0xe9   : > { %4462 = vmatmul.mubr.f32.gmra.mrb[12].mxu0 %v5454_v61  ;;  %4088 = vmatprep.mubr.f32.mxu1 %v5762_v53  ;;  %v6416_v61 = vld [vmem:[#allocation2_spill] sm:$0xff]  ;;  %v6419_v53 = vld [vmem:[#allocation21_spill] sm:$0xff] }
  0xea   : > { %4464 = vmatprep.mubr.f32.mxu0 %v5474_v4  ;;  %4854 = vmatpush3.bf16.msra.mxu0 %v4851_v60  ;;  %v6417_v4 = vld [vmem:[#allocation20_spill] sm:$0xff]  ;;  %v3386_v60 = vld [vmem:[%s5244_s28 + $0x122] sm:$0xff] }
  0xeb   : > { %4856 = vmatprep.subr.bf16.mxu0 %v4855_v33 }
  0xec   : > { %4089 = vmatmul.mubr.f32.gmra.mrb[30].mxu1 %v5778_v37  ;;  %v6427_v37 = vld [vmem:[#allocation24_spill] sm:$0xff] }
  0xed   : > { %4465 = vmatmul.mubr.f32.gmra.mrb[14].mxu0 %v5490_v10  ;;  %4123 = vmatprep.mubr.f32.mxu1 %v5648_v24  ;;  %v6418_v10 = vld [vmem:[#allocation10_spill] sm:$0xff]  ;;  %v6421_v24 = vld [vmem:[#allocation3_spill] sm:$0xff] }
  0xee   : > { %4467 = vmatprep.mubr.f32.mxu0 %v5497_v13  ;;  %4858 = vmatpush3.bf16.msra.mxu0 %v4855_v33  ;;  %v6420_v13 = vld [vmem:[#allocation11_spill] sm:$0xff] }
  0xef   : > { %v3196_v33 = vld [vmem:[%s5244_s28 + $0x121] sm:$0xff] }
  0xf0   : > { %4124 = vmatmul.mubr.f32.vlgmr.msra.gmra.mrb[0].mxu1 %v5663_v34  ;;  %v6424_v34 = vld [vmem:[#allocation23_spill] sm:$0xff] }
  0xf1   : > { %4468 = vmatmul.mubr.f32.gmra.mrb[16].mxu0 %v5512_v19  ;;  %4867 = vmatpush3.bf16.msra.mxu1 %v5199_v7  ;;  %v6422_v19 = vld [vmem:[#allocation22_spill] sm:$0xff]  ;;  %v6423_v7 = vld [vmem:[#allocation12_spill] sm:$0xff] }
  0xf2   : > { %4126 = vmatprep.mubr.f32.mxu1 %v6414_v43  ;;  %4470 = vmatprep.mubr.f32.mxu0 %v6415_v54  ;;  %v3388_v43 = vld [vmem:[%s5244_s28 + $0x13a] sm:$0xff]  ;;  %v3197_v54 = vld [vmem:[%s5244_s28 + $0x129] sm:$0xff] }
  0xf3   : > { %4860 = vmatprep.subr.bf16.mxu1 %v6416_v61 }
  0xf4   : > { %4127 = vmatmul.mubr.f32.gmra.mrb[2].mxu1 %v6417_v4  ;;  %v3198_v4 = vld [vmem:[%s5244_s28 + $0x139] sm:$0xff] }
  0xf5   : > { %4471 = vmatmul.mubr.f32.gmra.mrb[18].mxu0 %v6418_v10  ;;  %4129 = vmatprep.mubr.f32.mxu1 %v6419_v53  ;;  %v3390_v10 = vld [vmem:[%s5244_s28 + $0x152] sm:$0xff]  ;;  %v3199_v53 = vld [vmem:[%s5244_s28 + $0x141] sm:$0xff] }
  0xf6   : > { %4473 = vmatprep.mubr.f32.mxu0 %v6420_v13  ;;  %4868 = vmatpush3.bf16.msra.mxu1 %v6416_v61  ;;  %v3389_v61 = vld [vmem:[%s5244_s28 + $0x142] sm:$0xff]  ;;  %v3391_v13 = vld [vmem:[%s5244_s28 + $0x15a] sm:$0xff] }
  0xf7   : > { %4861 = vmatprep.subr.bf16.mxu1 %v6421_v24 }
  0xf8   : > { %4130 = vmatmul.mubr.f32.gmra.mrb[4].mxu1 %v6422_v19  ;;  %v3392_v19 = vld [vmem:[%s5244_s28 + $0x16a] sm:$0xff] }
  0xf9   : > { %4474 = vmatmul.mubr.f32.gmra.mrb[20].mxu0 %v6423_v7  ;;  %4132 = vmatprep.mubr.f32.mxu1 %v6424_v34  ;;  %v3201_v7 = vld [vmem:[%s5244_s28 + $0x159] sm:$0xff] }
  0xfa   : > { %4476 = vmatprep.mubr.f32.mxu0 %v6425_v9  ;;  %4869 = vmatpush3.bf16.msra.mxu1 %v6421_v24  ;;  %v3200_v24 = vld [vmem:[%s5244_s28 + $0x151] sm:$0xff]  ;;  %v3202_v9 = vld [vmem:[%s5244_s28 + $0x169] sm:$0xff] }
  0xfb   : > { %4862 = vmatprep.subr.bf16.mxu1 %v6426_v49  ;;  %v3393_v34 = vld [vmem:[%s5244_s28 + $0x172] sm:$0xff] }
  0xfc   : > { %4133 = vmatmul.mubr.f32.gmra.mrb[6].mxu1 %v6427_v37  ;;  %v3203_v37 = vld [vmem:[%s5244_s28 + $0x171] sm:$0xff] }
  0xfd   : > { %4477 = vmatmul.mubr.f32.gmra.mrb[22].mxu0 %v6428_v38  ;;  %4135 = vmatprep.mubr.f32.mxu1 %v6429_v23  ;;  %v3395_v38 = vld [vmem:[%s5244_s28 + $0x18a] sm:$0xff]  ;;  %v3396_v23 = vld [vmem:[%s5244_s28 + $0x19a] sm:$0xff] }
  0xfe   : > { %4479 = vmatprep.mubr.f32.mxu0 %v6430_v40  ;;  %4870 = vmatpush3.bf16.msra.mxu1 %v6426_v49  ;;  %v3394_v49 = vld [vmem:[%s5244_s28 + $0x182] sm:$0xff] }
  0xff   : > { %4863 = vmatprep.subr.bf16.mxu1 %v6431_v42  ;;  %v3397_v40 = vld [vmem:[%s5244_s28 + $0x1a2] sm:$0xff] }
 0x100   : > { %4136 = vmatmul.mubr.f32.gmra.mrb[8].mxu1 %v6432_v46 }
 0x101   : > { %4480 = vmatmul.mubr.f32.gmra.mrb[24].mxu0 %v6433_v48  ;;  %4138 = vmatprep.mubr.f32.mxu1 %v6434_v52 }
 0x102   : > { %4482 = vmatprep.mubr.f32.mxu0 %v6435_v62  ;;  %4871 = vmatpush3.bf16.msra.mxu1 %v6431_v42 }
 0x103   : > { %4864 = vmatprep.subr.bf16.mxu1 %v6436_v3 }
 0x104   : > { %4139 = vmatmul.mubr.f32.gmra.mrb[10].mxu1 %v6437_v57 }
 0x105   : > { %4483 = vmatmul.mubr.f32.gmra.mrb[26].mxu0 %v6438_v29  ;;  %4141 = vmatprep.mubr.f32.mxu1 %v6439_v0 }
 0x106   : > { %4485 = vmatprep.mubr.f32.mxu0 %v6122_v55  ;;  %4872 = vmatpush3.bf16.msra.mxu1 %v6436_v3 }
 0x107   : > { %4865 = vmatprep.subr.bf16.mxu1 %v6440_v6 }
 0x108   : > { %4142 = vmatmul.mubr.f32.gmra.mrb[12].mxu1 %v6441_v16 }
 0x109   : > { %4486 = vmatmul.mubr.f32.gmra.mrb[28].mxu0 %v6130_v5  ;;  %4144 = vmatprep.mubr.f32.mxu1 %v6442_v2 }
 0x10a   : > { %4488 = vmatprep.mubr.f32.mxu0 %v3348_v11  ;;  %4873 = vmatpush3.bf16.msra.mxu1 %v6440_v6 }
 0x10b   : > { %4866 = vmatprep.subr.bf16.mxu1 %v6443_v25 }
 0x10c   : > { %4145 = vmatmul.mubr.f32.gmra.mrb[14].mxu1 %v6444_v20 }
 0x10d   : > { %4489 = vmatmul.mubr.f32.gmra.mrb[30].mxu0 %v3349_v18  ;;  %4147 = vmatprep.mubr.f32.mxu1 %v5815_v17  ;;  %v3371_v17 = vld [vmem:[%s5244_s28 + $0x6a] sm:$0xff] }
 0x10e   : > { %4523 = vmatprep.mubr.f32.mxu0 %v3366_v14  ;;  %4874 = vmatpush3.bf16.msra.mxu1 %v6443_v25  ;;  %v6222_v25 = vld [vmem:[%s6342_s2] ss:$0 sm:$0xff] }
 0x110   : > { %4148 = vmatmul.mubr.f32.gmra.mrb[16].mxu1 %v5828_v39  ;;  %v3373_v39 = vld [vmem:[%s5244_s28 + $0x82] sm:$0xff] }
 0x111   : > { %4524 = vmatmul.mubr.f32.vlgmr.msra.gmra.mrb[0].mxu0 %v3367_v41  ;;  %4150 = vmatprep.mubr.f32.mxu1 %v5833_v12  ;;  %v3374_v12 = vld [vmem:[%s5244_s28 + $0x92] sm:$0xff] }
 0x112   : > { %4526 = vmatprep.mubr.f32.mxu0 %v3368_v45  ;;  %v6227_v45 = vld [vmem:[%s6343_s3] ss:$0 sm:$0xff] }
 0x114   : > { %4151 = vmatmul.mubr.f32.gmra.mrb[18].mxu1 %v5845_v8  ;;  %v3375_v8 = vld [vmem:[%s5244_s28 + $0x9a] sm:$0xff] }
 0x115   : > { %4527 = vmatmul.mubr.f32.gmra.mrb[2].mxu0 %v3369_v44  ;;  %4153 = vmatprep.mubr.f32.mxu1 %v5849_v36  ;;  %v3376_v36 = vld [vmem:[%s5244_s28 + $0xaa] sm:$0xff] }
 0x116   : > { %4529 = vmatprep.mubr.f32.mxu0 %v3370_v28 }
 0x118   : > { %4154 = vmatmul.mubr.f32.gmra.mrb[20].mxu1 %v5861_v31  ;;  %v3377_v31 = vld [vmem:[%s5244_s28 + $0xb2] sm:$0xff] }
 0x119   : > { %4530 = vmatmul.mubr.f32.gmra.mrb[4].mxu0 %v3371_v17  ;;  %4156 = vmatprep.mubr.f32.mxu1 %v5865_v21  ;;  %v3378_v21 = vld [vmem:[%s5244_s28 + $0xc2] sm:$0xff] }
 0x11a   : > { %4532 = vmatprep.mubr.f32.mxu0 %v3372_v50 }
 0x11c   : > { %4157 = vmatmul.mubr.f32.gmra.mrb[22].mxu1 %v5877_v15  ;;  %v3379_v15 = vld [vmem:[%s5244_s28 + $0xca] sm:$0xff] }
 0x11d   : > { %4533 = vmatmul.mubr.f32.gmra.mrb[6].mxu0 %v3373_v39  ;;  %4159 = vmatprep.mubr.f32.mxu1 %v5881_v59  ;;  %v3381_v59 = vld [vmem:[%s5244_s28 + $0xe2] sm:$0xff] }
 0x11e   : > { %4535 = vmatprep.mubr.f32.mxu0 %v3374_v12 }
 0x120   : > { %4160 = vmatmul.mubr.f32.gmra.mrb[24].mxu1 %v5893_v51  ;;  %v3380_v51 = vld [vmem:[%s5244_s28 + $0xda] sm:$0xff] }
 0x121   : > { %4536 = vmatmul.mubr.f32.gmra.mrb[8].mxu0 %v3375_v8  ;;  %4162 = vmatprep.mubr.f32.mxu1 %v5897_v32  ;;  %v3382_v32 = vld [vmem:[%s5244_s28 + $0xf2] sm:$0xff] }
 0x122   : > { %4538 = vmatprep.mubr.f32.mxu0 %v3376_v36 }
 0x124   : > { %4163 = vmatmul.mubr.f32.gmra.mrb[26].mxu1 %v5909_v56  ;;  %v3190_v56 = vld [vmem:[%s5244_s28 + $0xd9] sm:$0xff] }
 0x125   : > { %4539 = vmatmul.mubr.f32.gmra.mrb[10].mxu0 %v3377_v31  ;;  %4165 = vmatprep.mubr.f32.mxu1 %v5913_v1  ;;  %v3191_v1 = vld [vmem:[%s5244_s28 + $0xe1] sm:$0xff] }
 0x126   : > { %4541 = vmatprep.mubr.f32.mxu0 %v3378_v21 }
 0x128   : > { %4166 = vmatmul.mubr.f32.gmra.mrb[28].mxu1 %v5925_v47  ;;  %v3192_v47 = vld [vmem:[%s5244_s28 + $0xf1] sm:$0xff] }
 0x129   : > { %4542 = vmatmul.mubr.f32.gmra.mrb[12].mxu0 %v3379_v15  ;;  %4168 = vmatprep.mubr.f32.mxu1 %v5993_v22  ;;  %v3384_v22 = vld [vmem:[%s5244_s28 + $0x10a] sm:$0xff] }
 0x12a   : > { %4544 = vmatprep.mubr.f32.mxu0 %v3380_v51 }
 0x12c   : > { %4169 = vmatmul.mubr.f32.gmra.mrb[30].mxu1 %v6006_v30  ;;  %v3194_v30 = vld [vmem:[%s5244_s28 + $0x109] sm:$0xff] }
 0x12d   : > { %4545 = vmatmul.mubr.f32.gmra.mrb[14].mxu0 %v3381_v59  ;;  %4227 = vmatprep.mubr.f32.mxu1 %v3190_v56 }
 0x12e   : > { %4547 = vmatprep.mubr.f32.mxu0 %v3382_v32 }
 0x130   : > { %4228 = vmatmul.mubr.f32.vlgmr.msra.gmra.mrb[16].mxu1 %v3191_v1 }
 0x131   : > { %4548 = vmatmul.mubr.f32.gmra.mrb[16].mxu0 %v3383_v58  ;;  %4230 = vmatprep.mubr.f32.mxu1 %v3192_v47 }
 0x132   : > { %4550 = vmatprep.mubr.f32.mxu0 %v3384_v22 }
 0x134   : > { %4231 = vmatmul.mubr.f32.gmra.mrb[18].mxu1 %v3193_v63 }
 0x135   : > { %4551 = vmatmul.mubr.f32.gmra.mrb[18].mxu0 %v3385_v35  ;;  %4233 = vmatprep.mubr.f32.mxu1 %v3194_v30 }
 0x136   : > { %4553 = vmatprep.mubr.f32.mxu0 %v3386_v60 }
 0x138   : > { %4234 = vmatmul.mubr.f32.gmra.mrb[20].mxu1 %v3195_v26 }
 0x139   : > { %4554 = vmatmul.mubr.f32.gmra.mrb[20].mxu0 %v3387_v27  ;;  %4236 = vmatprep.mubr.f32.mxu1 %v3196_v33 }
 0x13a   : > { %4556 = vmatprep.mubr.f32.mxu0 %v3388_v43 }
 0x13c   : > { %4237 = vmatmul.mubr.f32.gmra.mrb[22].mxu1 %v3197_v54 }
 0x13d   : > { %4557 = vmatmul.mubr.f32.gmra.mrb[22].mxu0 %v3389_v61  ;;  %4239 = vmatprep.mubr.f32.mxu1 %v3198_v4 }
 0x13e   : > { %4559 = vmatprep.mubr.f32.mxu0 %v3390_v10 }
 0x140   : > { %4240 = vmatmul.mubr.f32.gmra.mrb[24].mxu1 %v3199_v53 }
 0x141   : > { %4560 = vmatmul.mubr.f32.gmra.mrb[24].mxu0 %v3391_v13  ;;  %4242 = vmatprep.mubr.f32.mxu1 %v3200_v24 }
 0x142   : > { %4562 = vmatprep.mubr.f32.mxu0 %v3392_v19 }
 0x144   : > { %4243 = vmatmul.mubr.f32.gmra.mrb[26].mxu1 %v3201_v7 }
 0x145   : > { %4563 = vmatmul.mubr.f32.gmra.mrb[26].mxu0 %v3393_v34  ;;  %4245 = vmatprep.mubr.f32.mxu1 %v3202_v9 }
 0x146   : > { %4565 = vmatprep.mubr.f32.mxu0 %v3394_v49 }
 0x148   : > { %4246 = vmatmul.mubr.f32.gmra.mrb[28].mxu1 %v3203_v37 }
 0x149   : > { %4566 = vmatmul.mubr.f32.gmra.mrb[28].mxu0 %v3395_v38  ;;  %4248 = vmatprep.mubr.f32.mxu1 %v6122_v55 }
 0x14a   : > { %4568 = vmatprep.mubr.f32.mxu0 %v3396_v23 }
 0x14c   : > { %4249 = vmatmul.mubr.f32.gmra.mrb[30].mxu1 %v6130_v5 }
 0x14d   : > { %4569 = vmatmul.mubr.f32.gmra.mrb[30].mxu0 %v3397_v40 }
 0x1c3   : > { %v4125_v42 = vpop.f32.mrb[0].mxu1 }
 0x1c4   : > { %v1167_v46 = vpop.f32.mrb[1].mxu1 }
 0x1c7   : > { %v4128_v48 = vpop.f32.mrb[2].mxu1 }
 0x1c8   : > { %v1177_v52 = vpop.f32.mrb[3].mxu1 }
 0x1cb   : > { %v4131_v62 = vpop.f32.mrb[4].mxu1 }
 0x1cc   : > { %v1187_v3 = vpop.f32.mrb[5].mxu1 }
 0x1cf   : > { %v4134_v57 = vpop.f32.mrb[6].mxu1 }
 0x1d0   : > { %v1197_v29 = vpop.f32.mrb[7].mxu1 }
 0x1d3   : > { %v4137_v0 = vpop.f32.mrb[8].mxu1 }
 0x1d4   : > { %v1207_v11 = vpop.f32.mrb[9].mxu1 }
 0x1d7   : > { %v6207_v6 = vpop.f32.mrb[10].mxu1 }
 0x1d8   : > { %v6209_v16 = vpop.f32.mrb[11].mxu1 }
 0x1db   : > { %v6211_v55 = vpop.f32.mrb[12].mxu1 }
 0x1dc   : > { %v6213_v2 = vpop.f32.mrb[13].mxu1 }
 0x1df   : > { %v6215_v5 = vpop.f32.mrb[14].mxu1 }
 0x1e0   : > { %v6217_v18 = vpop.f32.mrb[15].mxu1 }
 0x1e4   : > { %v4525_v14 = vpop.f32.mrb[0].mxu0 }
 0x1e5   : > { %v4875_v20 = vadd.f32 %v4525_v14, %v4125_v42  ;;  %v2698_v41 = vpop.f32.mrb[1].mxu0 }
 0x1e6   : > { %v4876_v44 = vadd.f32 %v2698_v41, %v1167_v46 }
 0x1e7   : > { %v2897_v28 = vmul.f32 %v4875_v20, %v6222_v25 }
 0x1e8   : > { %v2896_v17 = vmul.f32 %v4876_v44, %v6222_v25  ;;  %v4528_v50 = vpop.f32.mrb[2].mxu0 }
 0x1e9   : > { %v2936_v39 = vadd.f32 %v6227_v45, %v2897_v28  ;;  %v4877_v12 = vadd.f32 %v4528_v50, %v4128_v48  ;;  %v2708_v8 = vpop.f32.mrb[3].mxu0 }
 0x1ea   : > { %v2935_v36 = vadd.f32 %v6227_v45, %v2896_v17  ;;  %v4878_v31 = vadd.f32 %v2708_v8, %v1177_v52 }
 0x1eb   : > { %v2968_v21 = vmax.f32 %v2936_v39, 0.0  ;;  %v2899_v15 = vmul.f32 %v4877_v12, %v6222_v25 }
 0x1ec   : > { %v2967_v51 = vmax.f32 %v2935_v36, 0.0  ;;  %v2898_v59 = vmul.f32 %v4878_v31, %v6222_v25  ;;  %v4531_v56 = vpop.f32.mrb[4].mxu0 }
 0x1ed   : > { %3000 = vst [vmem:[%s6236_s12 + $0x8] sm:$0xff] %v2968_v21  ;;  %v2938_v32 = vadd.f32 %v6227_v45, %v2899_v15  ;;  %v4879_v1 = vadd.f32 %v4531_v56, %v4131_v62  ;;  %v2718_v58 = vpop.f32.mrb[5].mxu0 }
 0x1ee   : > { %2999 = vst [vmem:[%s6236_s12] sm:$0xff] %v2967_v51  ;;  %v2937_v47 = vadd.f32 %v6227_v45, %v2898_v59  ;;  %v4880_v22 = vadd.f32 %v2718_v58, %v1187_v3 }
 0x1ef   : > { %v2970_v63 = vmax.f32 %v2938_v32, 0.0  ;;  %v2901_v35 = vmul.f32 %v4879_v1, %v6222_v25 }
 0x1f0   : > { %v2969_v30 = vmax.f32 %v2937_v47, 0.0  ;;  %v2900_v60 = vmul.f32 %v4880_v22, %v6222_v25  ;;  %v4534_v26 = vpop.f32.mrb[6].mxu0 }
 0x1f1   : > { %3002 = vst [vmem:[%s6236_s12 + $0x18] sm:$0xff] %v2970_v63  ;;  %v2940_v27 = vadd.f32 %v6227_v45, %v2901_v35  ;;  %v4881_v33 = vadd.f32 %v4534_v26, %v4134_v57  ;;  %v2728_v43 = vpop.f32.mrb[7].mxu0 }
 0x1f2   : > { %3001 = vst [vmem:[%s6236_s12 + $0x10] sm:$0xff] %v2969_v30  ;;  %v2939_v54 = vadd.f32 %v6227_v45, %v2900_v60  ;;  %v4882_v61 = vadd.f32 %v2728_v43, %v1197_v29 }
 0x1f3   : > { %v2972_v4 = vmax.f32 %v2940_v27, 0.0  ;;  %v2903_v10 = vmul.f32 %v4881_v33, %v6222_v25 }
 0x1f4   : > { %v2971_v53 = vmax.f32 %v2939_v54, 0.0  ;;  %v2902_v13 = vmul.f32 %v4882_v61, %v6222_v25  ;;  %v4537_v24 = vpop.f32.mrb[8].mxu0 }
 0x1f5   : > { %3004 = vst [vmem:[%s6236_s12 + $0x28] sm:$0xff] %v2972_v4  ;;  %v2942_v19 = vadd.f32 %v6227_v45, %v2903_v10  ;;  %v4883_v7 = vadd.f32 %v4537_v24, %v4137_v0  ;;  %v2738_v34 = vpop.f32.mrb[9].mxu0 }
 0x1f6   : > { %3003 = vst [vmem:[%s6236_s12 + $0x20] sm:$0xff] %v2971_v53  ;;  %v2941_v9 = vadd.f32 %v6227_v45, %v2902_v13  ;;  %v4884_v49 = vadd.f32 %v2738_v34, %v1207_v11 }
 0x1f7   : > { %v2974_v37 = vmax.f32 %v2942_v19, 0.0  ;;  %v2905_v38 = vmul.f32 %v4883_v7, %v6222_v25 }
 0x1f8   : > { %v2973_v23 = vmax.f32 %v2941_v9, 0.0  ;;  %v2904_v40 = vmul.f32 %v4884_v49, %v6222_v25  ;;  %v4540_v42 = vpop.f32.mrb[10].mxu0 }
 0x1f9   : > { %3006 = vst [vmem:[%s6236_s12 + $0x38] sm:$0xff] %v2974_v37  ;;  %v2944_v46 = vadd.f32 %v6227_v45, %v2905_v38  ;;  %v4885_v48 = vadd.f32 %v4540_v42, %v6207_v6  ;;  %v2748_v52 = vpop.f32.mrb[11].mxu0 }
 0x1fa   : > { %3005 = vst [vmem:[%s6236_s12 + $0x30] sm:$0xff] %v2973_v23  ;;  %v2943_v62 = vadd.f32 %v6227_v45, %v2904_v40  ;;  %v4886_v3 = vadd.f32 %v2748_v52, %v6209_v16 }
 0x1fb   : > { %v2976_v57 = vmax.f32 %v2944_v46, 0.0  ;;  %v2907_v29 = vmul.f32 %v4885_v48, %v6222_v25 }
 0x1fc   : > { %v2975_v0 = vmax.f32 %v2943_v62, 0.0  ;;  %v2906_v11 = vmul.f32 %v4886_v3, %v6222_v25  ;;  %v4543_v14 = vpop.f32.mrb[12].mxu0 }
 0x1fd   : > { %3008 = vst [vmem:[%s6236_s12 + $0x48] sm:$0xff] %v2976_v57  ;;  %v2946_v20 = vadd.f32 %v6227_v45, %v2907_v29  ;;  %v4887_v6 = vadd.f32 %v4543_v14, %v6211_v55  ;;  %v2758_v41 = vpop.f32.mrb[13].mxu0 }
 0x1fe   : > { %3007 = vst [vmem:[%s6236_s12 + $0x40] sm:$0xff] %v2975_v0  ;;  %v2945_v44 = vadd.f32 %v6227_v45, %v2906_v11  ;;  %v4888_v16 = vadd.f32 %v2758_v41, %v6213_v2 }
 0x1ff   : > { %v2978_v28 = vmax.f32 %v2946_v20, 0.0  ;;  %v2909_v17 = vmul.f32 %v4887_v6, %v6222_v25 }
 0x200   : > { %v2977_v50 = vmax.f32 %v2945_v44, 0.0  ;;  %v2908_v39 = vmul.f32 %v4888_v16, %v6222_v25  ;;  %v4546_v12 = vpop.f32.mrb[14].mxu0 }
 0x201   : > { %3010 = vst [vmem:[%s6236_s12 + $0x58] sm:$0xff] %v2978_v28  ;;  %v2948_v8 = vadd.f32 %v6227_v45, %v2909_v17  ;;  %v4889_v36 = vadd.f32 %v4546_v12, %v6215_v5  ;;  %v2768_v55 = vpop.f32.mrb[15].mxu0 }
 0x202   : > { %3009 = vst [vmem:[%s6236_s12 + $0x50] sm:$0xff] %v2977_v50  ;;  %v2947_v31 = vadd.f32 %v6227_v45, %v2908_v39  ;;  %v4890_v2 = vadd.f32 %v2768_v55, %v6217_v18 }
 0x203   : > { %v2980_v21 = vmax.f32 %v2948_v8, 0.0  ;;  %v2911_v15 = vmul.f32 %v4889_v36, %v6222_v25  ;;  %v4229_v51 = vpop.f32.mrb[16].mxu1 }
 0x204   : > { %v2979_v59 = vmax.f32 %v2947_v31, 0.0  ;;  %v2910_v56 = vmul.f32 %v4890_v2, %v6222_v25  ;;  %v4549_v32 = vpop.f32.mrb[16].mxu0  ;;  %v1553_v1 = vpop.f32.mrb[17].mxu1 }
 0x205   : > { %3012 = vst [vmem:[%s6236_s12 + $0x68] sm:$0xff] %v2980_v21  ;;  %v2950_v5 = vadd.f32 %v6227_v45, %v2911_v15  ;;  %v4891_v58 = vadd.f32 %v4549_v32, %v4229_v51  ;;  %v2778_v47 = vpop.f32.mrb[17].mxu0 }
 0x206   : > { %3011 = vst [vmem:[%s6236_s12 + $0x60] sm:$0xff] %v2979_v59  ;;  %v2949_v22 = vadd.f32 %v6227_v45, %v2910_v56  ;;  %v4892_v18 = vadd.f32 %v2778_v47, %v1553_v1 }
 0x207   : > { %v2982_v63 = vmax.f32 %v2950_v5, 0.0  ;;  %v2913_v35 = vmul.f32 %v4891_v58, %v6222_v25  ;;  %v4232_v30 = vpop.f32.mrb[18].mxu1 }
 0x208   : > { %v2981_v60 = vmax.f32 %v2949_v22, 0.0  ;;  %v2912_v26 = vmul.f32 %v4892_v18, %v6222_v25  ;;  %v4552_v27 = vpop.f32.mrb[18].mxu0  ;;  %v1563_v33 = vpop.f32.mrb[19].mxu1 }
 0x209   : > { %3014 = vst [vmem:[%s6236_s12 + $0x78] sm:$0xff] %v2982_v63  ;;  %v2952_v43 = vadd.f32 %v6227_v45, %v2913_v35  ;;  %v4893_v54 = vadd.f32 %v4552_v27, %v4232_v30  ;;  %v2788_v61 = vpop.f32.mrb[19].mxu0 }
 0x20a   : > { %3013 = vst [vmem:[%s6236_s12 + $0x70] sm:$0xff] %v2981_v60  ;;  %v2951_v4 = vadd.f32 %v6227_v45, %v2912_v26  ;;  %v4894_v10 = vadd.f32 %v2788_v61, %v1563_v33 }
 0x20b   : > { %v2984_v53 = vmax.f32 %v2952_v43, 0.0  ;;  %v2915_v13 = vmul.f32 %v4893_v54, %v6222_v25  ;;  %v4235_v24 = vpop.f32.mrb[20].mxu1 }
 0x20c   : > { %v2983_v19 = vmax.f32 %v2951_v4, 0.0  ;;  %v2914_v7 = vmul.f32 %v4894_v10, %v6222_v25  ;;  %v4555_v34 = vpop.f32.mrb[20].mxu0  ;;  %v1573_v9 = vpop.f32.mrb[21].mxu1 }
 0x20d   : > { %3016 = vst [vmem:[%s6236_s12 + $0x88] sm:$0xff] %v2984_v53  ;;  %v2954_v49 = vadd.f32 %v6227_v45, %v2915_v13  ;;  %v4895_v37 = vadd.f32 %v4555_v34, %v4235_v24  ;;  %v2798_v38 = vpop.f32.mrb[21].mxu0 }
 0x20e   : > { %3015 = vst [vmem:[%s6236_s12 + $0x80] sm:$0xff] %v2983_v19  ;;  %v2953_v23 = vadd.f32 %v6227_v45, %v2914_v7  ;;  %v4896_v40 = vadd.f32 %v2798_v38, %v1573_v9 }
 0x20f   : > { %v2986_v42 = vmax.f32 %v2954_v49, 0.0  ;;  %v2917_v46 = vmul.f32 %v4895_v37, %v6222_v25  ;;  %v4238_v48 = vpop.f32.mrb[22].mxu1 }
 0x210   : > { %v2985_v52 = vmax.f32 %v2953_v23, 0.0  ;;  %v2916_v62 = vmul.f32 %v4896_v40, %v6222_v25  ;;  %v4558_v3 = vpop.f32.mrb[22].mxu0  ;;  %v1583_v57 = vpop.f32.mrb[23].mxu1 }
 0x211   : > { %3018 = vst [vmem:[%s6236_s12 + $0x98] sm:$0xff] %v2986_v42  ;;  %v2956_v29 = vadd.f32 %v6227_v45, %v2917_v46  ;;  %v4897_v0 = vadd.f32 %v4558_v3, %v4238_v48  ;;  %v2808_v11 = vpop.f32.mrb[23].mxu0 }
 0x212   : > { %3017 = vst [vmem:[%s6236_s12 + $0x90] sm:$0xff] %v2985_v52  ;;  %v2955_v14 = vadd.f32 %v6227_v45, %v2916_v62  ;;  %v4898_v20 = vadd.f32 %v2808_v11, %v1583_v57 }
 0x213   : > { %v2988_v6 = vmax.f32 %v2956_v29, 0.0  ;;  %v2919_v41 = vmul.f32 %v4897_v0, %v6222_v25  ;;  %v4241_v44 = vpop.f32.mrb[24].mxu1 }
 0x214   : > { %v2987_v16 = vmax.f32 %v2955_v14, 0.0  ;;  %v2918_v28 = vmul.f32 %v4898_v20, %v6222_v25  ;;  %v4561_v17 = vpop.f32.mrb[24].mxu0  ;;  %v1593_v50 = vpop.f32.mrb[25].mxu1 }
 0x215   : > { %3020 = vst [vmem:[%s6236_s12 + $0xa8] sm:$0xff] %v2988_v6  ;;  %v2958_v39 = vadd.f32 %v6227_v45, %v2919_v41  ;;  %v4899_v12 = vadd.f32 %v4561_v17, %v4241_v44  ;;  %v2818_v8 = vpop.f32.mrb[25].mxu0 }
 0x216   : > { %3019 = vst [vmem:[%s6236_s12 + $0xa0] sm:$0xff] %v2987_v16  ;;  %v2957_v36 = vadd.f32 %v6227_v45, %v2918_v28  ;;  %v4900_v55 = vadd.f32 %v2818_v8, %v1593_v50 }
 0x217   : > { %v2990_v31 = vmax.f32 %v2958_v39, 0.0  ;;  %v2921_v2 = vmul.f32 %v4899_v12, %v6222_v25  ;;  %v4244_v21 = vpop.f32.mrb[26].mxu1 }
 0x218   : > { %v2989_v15 = vmax.f32 %v2957_v36, 0.0  ;;  %v2920_v51 = vmul.f32 %v4900_v55, %v6222_v25  ;;  %v4564_v59 = vpop.f32.mrb[26].mxu0  ;;  %v1603_v56 = vpop.f32.mrb[27].mxu1 }
 0x219   : > { %3022 = vst [vmem:[%s6236_s12 + $0xb8] sm:$0xff] %v2990_v31  ;;  %v2960_v32 = vadd.f32 %v6227_v45, %v2921_v2  ;;  %v4901_v1 = vadd.f32 %v4564_v59, %v4244_v21  ;;  %v2828_v5 = vpop.f32.mrb[27].mxu0 }
 0x21a   : > { %3021 = vst [vmem:[%s6236_s12 + $0xb0] sm:$0xff] %v2989_v15  ;;  %v2959_v58 = vadd.f32 %v6227_v45, %v2920_v51  ;;  %v4902_v47 = vadd.f32 %v2828_v5, %v1603_v56 }
 0x21b   : > { %v2992_v22 = vmax.f32 %v2960_v32, 0.0  ;;  %v2923_v18 = vmul.f32 %v4901_v1, %v6222_v25  ;;  %v4247_v63 = vpop.f32.mrb[28].mxu1 }
 0x21c   : > { %v2991_v35 = vmax.f32 %v2959_v58, 0.0  ;;  %v2922_v30 = vmul.f32 %v4902_v47, %v6222_v25  ;;  %v4567_v60 = vpop.f32.mrb[28].mxu0  ;;  %v1613_v26 = vpop.f32.mrb[29].mxu1 }
 0x21d   : > { %3024 = vst [vmem:[%s6236_s12 + $0xc8] sm:$0xff] %v2992_v22  ;;  %v2962_v27 = vadd.f32 %v6227_v45, %v2923_v18  ;;  %v4903_v33 = vadd.f32 %v4567_v60, %v4247_v63  ;;  %v2838_v43 = vpop.f32.mrb[29].mxu0 }
 0x21e   : > { %3023 = vst [vmem:[%s6236_s12 + $0xc0] sm:$0xff] %v2991_v35  ;;  %v2961_v54 = vadd.f32 %v6227_v45, %v2922_v30  ;;  %v4904_v61 = vadd.f32 %v2838_v43, %v1613_v26 }
 0x21f   : > { %v2994_v4 = vmax.f32 %v2962_v27, 0.0  ;;  %v2925_v10 = vmul.f32 %v4903_v33, %v6222_v25  ;;  %v4250_v53 = vpop.f32.mrb[30].mxu1 }
 0x220   : > { %v2993_v13 = vmax.f32 %v2961_v54, 0.0  ;;  %v2924_v24 = vmul.f32 %v4904_v61, %v6222_v25  ;;  %v4570_v19 = vpop.f32.mrb[30].mxu0  ;;  %v1623_v7 = vpop.f32.mrb[31].mxu1 }
 0x221   : > { %3026 = vst [vmem:[%s6236_s12 + $0xd8] sm:$0xff] %v2994_v4  ;;  %v2964_v34 = vadd.f32 %v6227_v45, %v2925_v10  ;;  %v4905_v9 = vadd.f32 %v4570_v19, %v4250_v53  ;;  %v2848_v49 = vpop.f32.mrb[31].mxu0 }
 0x222   : > { %3025 = vst [vmem:[%s6236_s12 + $0xd0] sm:$0xff] %v2993_v13  ;;  %v2963_v37 = vadd.f32 %v6227_v45, %v2924_v24  ;;  %v4906_v38 = vadd.f32 %v2848_v49, %v1623_v7 }
 0x223   : > { %v2996_v23 = vmax.f32 %v2964_v34, 0.0  ;;  %v2927_v40 = vmul.f32 %v4905_v9, %v6222_v25 }
 0x224   : > { %v2995_v42 = vmax.f32 %v2963_v37, 0.0  ;;  %v2926_v46 = vmul.f32 %v4906_v38, %v6222_v25 }
 0x225   : > { %3028 = vst [vmem:[%s6236_s12 + $0xe8] sm:$0xff] %v2996_v23  ;;  %v2966_v48 = vadd.f32 %v6227_v45, %v2927_v40 }
 0x226   : > { %3027 = vst [vmem:[%s6236_s12 + $0xe0] sm:$0xff] %v2995_v42  ;;  %v2965_v52 = vadd.f32 %v6227_v45, %v2926_v46 }
 0x227   : > { %v2998_v62 = vmax.f32 %v2966_v48, 0.0 }
 0x228   : > { %v2997_v3 = vmax.f32 %v2965_v52, 0.0 }
 0x229   : > { %3030 = vst [vmem:[%s6236_s12 + $0xf8] sm:$0xff] %v2998_v62 }
 0x22a   : > { %3029 = vst [vmem:[%s6236_s12 + $0xf0] sm:$0xff] %v2997_v3 }
 0x22b PF: > { %s14_s15 = sadd.s32 1, %s5146_s15  }
 0x22c   : > { %p11_p4 = scmp.ge.s32.totalorder %s14_s15, 4  }
 0x22e   :  { %13 = sbr.rel (!%p11_p4) target bundleno = 1 (0x1), region = 76 }

</bundles_post_ra>
